<compile_context>
chip_gen: v6e
topology: v6e:2x2x1
jax: 0.10.0
libtpu: 0.0.40
codegen_flags: <defaults>
</compile_context>

<pallas_src>
import functools

import jax
import jax.numpy as jnp
from jax.experimental import pallas as pl
from jax.experimental.pallas import tpu as pltpu


# ----------------------------------------------------------------------------
# Pallas kernel: one image per grid step.
# ----------------------------------------------------------------------------
def _cpe_kernel(xp_ref, w_ref, b_ref, o_ref, *, H, W, C):
    """Fused  x + dwconv3x3(x) + bias  on a lane-flattened NHWC image.

    xp_ref: (1, H+2, (W+2)*C)  zero-padded NHWC feature map, (W, C) flattened
    w_ref : (9, W*C)           depthwise weights, tap-major, tiled along W
    b_ref : (1, W*C)           conv bias, tiled along W
    o_ref : (1, H,   W*C)      output: x + conv(x) + b
    """
    # Residual = interior of the padded map (avoids a second HBM read of x),
    # fused with the bias add.
    acc = xp_ref[0, 1:1 + H, C:C + W * C] + b_ref[...]
    # 9 shifted taps read directly from the VMEM-resident padded block.
    for kh in range(3):
        for kw in range(3):
            t = kh * 3 + kw
            tap = xp_ref[0, kh:kh + H, kw * C: kw * C + W * C]
            acc = acc + tap * w_ref[t:t + 1, :]
    o_ref[0] = acc


# ----------------------------------------------------------------------------
# Wrapper: layout plumbing + pallas_call.
# ----------------------------------------------------------------------------
def conv_pos_enc(x, size, weight, bias):
    """ConvPosEnc forward.

    x      : (B, N, C) float tokens, N == H*W
    size   : (H, W) static python ints
    weight : (C, 1, 3, 3) depthwise Conv2d weight (PyTorch layout)
    bias   : (C,)
    returns (B, N, C) float32
    """
    H, W = size
    B, N, C = x.shape
    assert N == H * W

    x = x.astype(jnp.float32)
    feat = x.reshape(B, H, W, C)
    xp = jnp.pad(feat, ((0, 0), (1, 1), (1, 1), (0, 0)))        # (B, H+2, W+2, C)
    xp2 = xp.reshape(B, H + 2, (W + 2) * C)                      # lane-flatten (W, C)

    # (C, 1, 3, 3) -> (9, C) tap-major -> tiled along W so it broadcasts in the
    # flattened (W*C) lane layout (pure layout plumbing, depthwise weights
    # broadcast per channel).
    w9 = jnp.transpose(weight.reshape(C, 9), (1, 0)).astype(jnp.float32)   # (9, C)
    w_tiled = jnp.tile(w9, (1, W))                                          # (9, W*C)
    b_tiled = jnp.tile(bias.astype(jnp.float32), W).reshape(1, W * C)       # (1, W*C)

    kern = functools.partial(_cpe_kernel, H=H, W=W, C=C)
    out2 = pl.pallas_call(
        kern,
        out_shape=jax.ShapeDtypeStruct((B, H, W * C), jnp.float32),
        grid=(B,),
        in_specs=[
            pl.BlockSpec((1, H + 2, (W + 2) * C), lambda b: (b, 0, 0)),
            pl.BlockSpec((9, W * C), lambda b: (0, 0)),
            pl.BlockSpec((1, W * C), lambda b: (0, 0)),
        ],
        out_specs=pl.BlockSpec((1, H, W * C), lambda b: (b, 0, 0)),
        compiler_params=pltpu.CompilerParams(
            dimension_semantics=("parallel",)),
    )(xp2, w_tiled, b_tiled)
    return out2.reshape(B, N, C)


# ----------------------------------------------------------------------------
# Pure-JAX reference (independent op: lax depthwise conv) for validation.
# ----------------------------------------------------------------------------
def conv_pos_enc_ref(x, size, weight, bias):
    H, W = size
    B, N, C = x.shape
    feat = x.astype(jnp.float32).reshape(B, H, W, C)
    w_hwio = jnp.transpose(weight, (2, 3, 1, 0)).astype(jnp.float32)  # (3,3,1,C)
    conv = jax.lax.conv_general_dilated(
        feat, w_hwio,
        window_strides=(1, 1), padding=((1, 1), (1, 1)),
        dimension_numbers=("NHWC", "HWIO", "NHWC"),
        feature_group_count=C)
    conv = conv + bias.reshape(1, 1, 1, C).astype(jnp.float32)
    return x.astype(jnp.float32) + conv.reshape(B, N, C)


# ----------------------------------------------------------------------------
if __name__ == "__main__":
    key = jax.random.PRNGKey(0)
    k_x, k_w, k_b = jax.random.split(key, 3)

    B, H, W, C = 2, 16, 16, 64           # tokens: (B, N=H*W, C), dim = 64
    x = jax.random.normal(k_x, (B, H * W, C), jnp.float32)
    weight = jax.random.normal(k_w, (C, 1, 3, 3), jnp.float32) * 0.1
    bias = jax.random.normal(k_b, (C,), jnp.float32) * 0.1

    fwd = jax.jit(conv_pos_enc, static_argnums=1)
    out = jax.block_until_ready(fwd(x, (H, W), weight, bias))

    ref = jax.block_until_ready(conv_pos_enc_ref(x, (H, W), weight, bias))

    assert out.shape == (B, H * W, C)
    assert bool(jnp.all(jnp.isfinite(out)))
    assert float(jnp.max(jnp.abs(out - ref))) < 1e-4
    print("KERNEL_OK")
</pallas_src>

<mosaic_0001>
module attributes {stable_mosaic.version = 11 : i64} {
  func.func @_cpe_kernel(%arg0: i32, %arg1: memref<1x18x1152xf32, #tpu.memory_space<vmem>>, %arg2: memref<9x1024xf32, #tpu.memory_space<vmem>>, %arg3: memref<1x1024xf32, #tpu.memory_space<vmem>>, %arg4: memref<1x16x1024xf32, #tpu.memory_space<vmem>>) attributes {dimension_semantics = [#tpu.dimension_semantics<parallel>], iteration_bounds = array<i64: 2>, scalar_prefetch = 0 : i64, scratch_operands = 0 : i64, tpu.core_type = #tpu.core_type<tc>, window_params = [{transform_indices = @transform_0, window_bounds = array<i64: 1, 18, 1152>}, {pipeline_mode = #tpu.pipeline_mode<synchronous>, transform_indices = @transform_1, window_bounds = array<i64: 9, 1024>}, {pipeline_mode = #tpu.pipeline_mode<synchronous>, transform_indices = @transform_2, window_bounds = array<i64: 1, 1024>}, {transform_indices = @transform_3, window_bounds = array<i64: 1, 16, 1024>}]} {
    %c0 = arith.constant 0 : index
    %c1 = arith.constant 1 : index
    %c64 = arith.constant 64 : index
    %0 = vector.load %arg1[%c0, %c1, %c64] : memref<1x18x1152xf32, #tpu.memory_space<vmem>>, vector<1x16x1024xf32>
    %1 = vector.shape_cast %0 : vector<1x16x1024xf32> to vector<16x1024xf32>
    %c0_0 = arith.constant 0 : index
    %c0_1 = arith.constant 0 : index
    %2 = vector.load %arg3[%c0_0, %c0_1] : memref<1x1024xf32, #tpu.memory_space<vmem>>, vector<1x1024xf32>
    %3 = vector.broadcast %2 : vector<1x1024xf32> to vector<16x1024xf32>
    %4 = arith.addf %1, %3 : vector<16x1024xf32>
    %c0_2 = arith.constant 0 : index
    %c0_3 = arith.constant 0 : index
    %c0_4 = arith.constant 0 : index
    %5 = vector.load %arg1[%c0_2, %c0_3, %c0_4] : memref<1x18x1152xf32, #tpu.memory_space<vmem>>, vector<1x16x1024xf32>
    %6 = vector.shape_cast %5 : vector<1x16x1024xf32> to vector<16x1024xf32>
    %c0_5 = arith.constant 0 : index
    %c0_6 = arith.constant 0 : index
    %7 = vector.load %arg2[%c0_5, %c0_6] : memref<9x1024xf32, #tpu.memory_space<vmem>>, vector<1x1024xf32>
    %8 = vector.broadcast %7 : vector<1x1024xf32> to vector<16x1024xf32>
    %9 = arith.mulf %6, %8 : vector<16x1024xf32>
    %10 = arith.addf %4, %9 : vector<16x1024xf32>
    %c0_7 = arith.constant 0 : index
    %c0_8 = arith.constant 0 : index
    %c64_9 = arith.constant 64 : index
    %11 = vector.load %arg1[%c0_7, %c0_8, %c64_9] : memref<1x18x1152xf32, #tpu.memory_space<vmem>>, vector<1x16x1024xf32>
    %12 = vector.shape_cast %11 : vector<1x16x1024xf32> to vector<16x1024xf32>
    %c1_10 = arith.constant 1 : index
    %c0_11 = arith.constant 0 : index
    %13 = vector.load %arg2[%c1_10, %c0_11] : memref<9x1024xf32, #tpu.memory_space<vmem>>, vector<1x1024xf32>
    %14 = vector.broadcast %13 : vector<1x1024xf32> to vector<16x1024xf32>
    %15 = arith.mulf %12, %14 : vector<16x1024xf32>
    %16 = arith.addf %10, %15 : vector<16x1024xf32>
    %c0_12 = arith.constant 0 : index
    %c0_13 = arith.constant 0 : index
    %c128 = arith.constant 128 : index
    %17 = vector.load %arg1[%c0_12, %c0_13, %c128] : memref<1x18x1152xf32, #tpu.memory_space<vmem>>, vector<1x16x1024xf32>
    %18 = vector.shape_cast %17 : vector<1x16x1024xf32> to vector<16x1024xf32>
    %c2 = arith.constant 2 : index
    %c0_14 = arith.constant 0 : index
    %19 = vector.load %arg2[%c2, %c0_14] : memref<9x1024xf32, #tpu.memory_space<vmem>>, vector<1x1024xf32>
    %20 = vector.broadcast %19 : vector<1x1024xf32> to vector<16x1024xf32>
    %21 = arith.mulf %18, %20 : vector<16x1024xf32>
    %22 = arith.addf %16, %21 : vector<16x1024xf32>
    %c0_15 = arith.constant 0 : index
    %c1_16 = arith.constant 1 : index
    %c0_17 = arith.constant 0 : index
    %23 = vector.load %arg1[%c0_15, %c1_16, %c0_17] : memref<1x18x1152xf32, #tpu.memory_space<vmem>>, vector<1x16x1024xf32>
    %24 = vector.shape_cast %23 : vector<1x16x1024xf32> to vector<16x1024xf32>
    %c3 = arith.constant 3 : index
    %c0_18 = arith.constant 0 : index
    %25 = vector.load %arg2[%c3, %c0_18] : memref<9x1024xf32, #tpu.memory_space<vmem>>, vector<1x1024xf32>
    %26 = vector.broadcast %25 : vector<1x1024xf32> to vector<16x1024xf32>
    %27 = arith.mulf %24, %26 : vector<16x1024xf32>
    %28 = arith.addf %22, %27 : vector<16x1024xf32>
    %c0_19 = arith.constant 0 : index
    %c1_20 = arith.constant 1 : index
    %c64_21 = arith.constant 64 : index
    %29 = vector.load %arg1[%c0_19, %c1_20, %c64_21] : memref<1x18x1152xf32, #tpu.memory_space<vmem>>, vector<1x16x1024xf32>
    %30 = vector.shape_cast %29 : vector<1x16x1024xf32> to vector<16x1024xf32>
    %c4 = arith.constant 4 : index
    %c0_22 = arith.constant 0 : index
    %31 = vector.load %arg2[%c4, %c0_22] : memref<9x1024xf32, #tpu.memory_space<vmem>>, vector<1x1024xf32>
    %32 = vector.broadcast %31 : vector<1x1024xf32> to vector<16x1024xf32>
    %33 = arith.mulf %30, %32 : vector<16x1024xf32>
    %34 = arith.addf %28, %33 : vector<16x1024xf32>
    %c0_23 = arith.constant 0 : index
    %c1_24 = arith.constant 1 : index
    %c128_25 = arith.constant 128 : index
    %35 = vector.load %arg1[%c0_23, %c1_24, %c128_25] : memref<1x18x1152xf32, #tpu.memory_space<vmem>>, vector<1x16x1024xf32>
    %36 = vector.shape_cast %35 : vector<1x16x1024xf32> to vector<16x1024xf32>
    %c5 = arith.constant 5 : index
    %c0_26 = arith.constant 0 : index
    %37 = vector.load %arg2[%c5, %c0_26] : memref<9x1024xf32, #tpu.memory_space<vmem>>, vector<1x1024xf32>
    %38 = vector.broadcast %37 : vector<1x1024xf32> to vector<16x1024xf32>
    %39 = arith.mulf %36, %38 : vector<16x1024xf32>
    %40 = arith.addf %34, %39 : vector<16x1024xf32>
    %c0_27 = arith.constant 0 : index
    %c2_28 = arith.constant 2 : index
    %c0_29 = arith.constant 0 : index
    %41 = vector.load %arg1[%c0_27, %c2_28, %c0_29] : memref<1x18x1152xf32, #tpu.memory_space<vmem>>, vector<1x16x1024xf32>
    %42 = vector.shape_cast %41 : vector<1x16x1024xf32> to vector<16x1024xf32>
    %c6 = arith.constant 6 : index
    %c0_30 = arith.constant 0 : index
    %43 = vector.load %arg2[%c6, %c0_30] : memref<9x1024xf32, #tpu.memory_space<vmem>>, vector<1x1024xf32>
    %44 = vector.broadcast %43 : vector<1x1024xf32> to vector<16x1024xf32>
    %45 = arith.mulf %42, %44 : vector<16x1024xf32>
    %46 = arith.addf %40, %45 : vector<16x1024xf32>
    %c0_31 = arith.constant 0 : index
    %c2_32 = arith.constant 2 : index
    %c64_33 = arith.constant 64 : index
    %47 = vector.load %arg1[%c0_31, %c2_32, %c64_33] : memref<1x18x1152xf32, #tpu.memory_space<vmem>>, vector<1x16x1024xf32>
    %48 = vector.shape_cast %47 : vector<1x16x1024xf32> to vector<16x1024xf32>
    %c7 = arith.constant 7 : index
    %c0_34 = arith.constant 0 : index
    %49 = vector.load %arg2[%c7, %c0_34] : memref<9x1024xf32, #tpu.memory_space<vmem>>, vector<1x1024xf32>
    %50 = vector.broadcast %49 : vector<1x1024xf32> to vector<16x1024xf32>
    %51 = arith.mulf %48, %50 : vector<16x1024xf32>
    %52 = arith.addf %46, %51 : vector<16x1024xf32>
    %c0_35 = arith.constant 0 : index
    %c2_36 = arith.constant 2 : index
    %c128_37 = arith.constant 128 : index
    %53 = vector.load %arg1[%c0_35, %c2_36, %c128_37] : memref<1x18x1152xf32, #tpu.memory_space<vmem>>, vector<1x16x1024xf32>
    %54 = vector.shape_cast %53 : vector<1x16x1024xf32> to vector<16x1024xf32>
    %c8 = arith.constant 8 : index
    %c0_38 = arith.constant 0 : index
    %55 = vector.load %arg2[%c8, %c0_38] : memref<9x1024xf32, #tpu.memory_space<vmem>>, vector<1x1024xf32>
    %56 = vector.broadcast %55 : vector<1x1024xf32> to vector<16x1024xf32>
    %57 = arith.mulf %54, %56 : vector<16x1024xf32>
    %58 = arith.addf %52, %57 : vector<16x1024xf32>
    %c0_39 = arith.constant 0 : index
    %c0_40 = arith.constant 0 : index
    %c0_41 = arith.constant 0 : index
    %59 = vector.load %arg4[%c0_39, %c0_40, %c0_41] : memref<1x16x1024xf32, #tpu.memory_space<vmem>>, vector<1x16x1024xf32>
    %60 = vector.shape_cast %59 : vector<1x16x1024xf32> to vector<16x1024xf32>
    %61 = vector.shape_cast %58 : vector<16x1024xf32> to vector<1x16x1024xf32>
    tpu.vector_store %arg4[%c0_39, %c0_40, %c0_41], %61 {strides = array<i32>} : memref<1x16x1024xf32, #tpu.memory_space<vmem>>, vector<1x16x1024xf32>,
    return
  }
  func.func @transform_0(%arg0: i32) -> (i32, i32, i32) {
    %c0_i32 = arith.constant 0 : i32
    %c0_i32_0 = arith.constant 0 : i32
    %c0_i32_1 = arith.constant 0 : i32
    return %arg0, %c0_i32, %c0_i32_0 : i32, i32, i32
  }
  func.func @transform_1(%arg0: i32) -> (i32, i32) {
    %c0_i32 = arith.constant 0 : i32
    %c0_i32_0 = arith.constant 0 : i32
    %c0_i32_1 = arith.constant 0 : i32
    return %c0_i32, %c0_i32_0 : i32, i32
  }
  func.func @transform_2(%arg0: i32) -> (i32, i32) {
    %c0_i32 = arith.constant 0 : i32
    %c0_i32_0 = arith.constant 0 : i32
    %c0_i32_1 = arith.constant 0 : i32
    return %c0_i32, %c0_i32_0 : i32, i32
  }
  func.func @transform_3(%arg0: i32) -> (i32, i32, i32) {
    %c0_i32 = arith.constant 0 : i32
    %c0_i32_0 = arith.constant 0 : i32
    %c0_i32_1 = arith.constant 0 : i32
    return %arg0, %c0_i32, %c0_i32_0 : i32, i32, i32
  }
}

</mosaic_0001>

<bundles_post_ra>
// kernel: tile.18
= control target key start
LH: loop header
LB: loop body
LE: loop exit
PB: predicated region body
PF: predicated region fallthrough
CT: control target
= control target key end

     0   :  { %s28_s0 = inlined_call_operand.vmem [shape: f32[64], index: 0, kind: input, shape index: {}]   ;;  %s29_s1 = inlined_call_operand.vmem [shape: f32[16,64], index: 1, kind: output, shape index: {}]  }
   0x1   :  { %v4_v0 = vld [vmem:[%s28_s0] ss:$0 sm:$0xff] }
   0x2   :  { %5 = vst [vmem:[%s29_s1] sm:$0xff] %v4_v0  ;;  %8 = vst [vmem:[%s29_s1 + $0x8] sm:$0xff] %v4_v0 }

// kernel: tile.19
= control target key start
LH: loop header
LB: loop body
LE: loop exit
PB: predicated region body
PF: predicated region fallthrough
CT: control target
= control target key end

     0   :  { %vm3_vm0 = vcmask 523264   ;;  %vm10_vm1 = vcmask 1048064   ;;  %s125_s0 = inlined_call_operand.vmem [shape: f32[16,64], index: 0, kind: input, shape index: {}]   ;;  %s126_s1 = inlined_call_operand.vmem [shape: f32[1,1024], index: 1, kind: output, shape index: {}]  }
   0x1   :  { %v75_v0 = vld [vmem:[%s125_s0 + $0x1] ss:$2 sm:$0xff]   ;;  %v2_v1 = vld [vmem:[%s125_s0] ss:$2 sm:$0xff]   ;;  %s84_s0 = smov 64  }
   0x2   :  { %8 = vrot.lane.b32.xlu0 %v75_v0, %s84_s0  ;;  %4 = vst.msk [vmem:[#allocation0] ss:$8 sm:$0xf] %vm3_vm0, %v2_v1   ;;  %5 = vst.msk [vmem:[#allocation0] ss:$8 sm:$0xf0] %vm3_vm0, %v2_v1  }
  0x74   :  { %v9_v2 = vpop.permute.xlu0 %8  }
  0x75   :  { %11 = vst.msk [vmem:[#allocation0] ss:$8 sm:$0xf] %vm10_vm1, %v9_v2   ;;  %12 = vst.msk [vmem:[#allocation0] ss:$8 sm:$0xf0] %vm10_vm1, %v9_v2  }
  0x7c   :  { %v17_v3 = vld [vmem:[#allocation0] sm:$0x1]  ;;  %v22_v4 = vld [vmem:[#allocation0 + $0x8] sm:$0x1]  ;;  %v28_v5 = vld [vmem:[#allocation0 + $0x10] sm:$0x1] }
  0x7d   :  { %20 = vst [vmem:[%s126_s1] sm:$0x1] %v17_v3  ;;  %76 = vst [vmem:[%s126_s1 + $0x1] sm:$0x1] %v22_v4  ;;  %v35_v6 = vld [vmem:[#allocation0 + $0x18] sm:$0x1] }
  0x7e   :  { %77 = vst [vmem:[%s126_s1 + $0x2] sm:$0x1] %v28_v5  ;;  %v42_v7 = vld [vmem:[#allocation0 + $0x20] sm:$0x1]  ;;  %v49_v8 = vld [vmem:[#allocation0 + $0x28] sm:$0x1] }
  0x7f   :  { %78 = vst [vmem:[%s126_s1 + $0x3] sm:$0x1] %v35_v6  ;;  %79 = vst [vmem:[%s126_s1 + $0x4] sm:$0x1] %v42_v7  ;;  %v56_v9 = vld [vmem:[#allocation0 + $0x30] sm:$0x1] }
  0x80   :  { %80 = vst [vmem:[%s126_s1 + $0x5] sm:$0x1] %v49_v8  ;;  %v63_v10 = vld [vmem:[#allocation0 + $0x38] sm:$0x1]  ;;  %81 = vst [vmem:[%s126_s1 + $0x6] sm:$0x1] %v56_v9 }
  0x81   :  { %82 = vst [vmem:[%s126_s1 + $0x7] sm:$0x1] %v63_v10 }

// kernel: tile.14
= control target key start
LH: loop header
LB: loop body
LE: loop exit
PB: predicated region body
PF: predicated region fallthrough
CT: control target
= control target key end

     0   :  { %s63_s6 = smov 3  ;;  %s66_s7 = smov 12  ;;  %vm68_vm0 = vcmask 1043458   ;;  %vm73_vm1 = vcmask 1045508   ;;  %vm78_vm2 = vcmask 1047558   ;;  %vm212_vm3 = vcmask 1042433   ;;  %s706_s0 = inlined_call_operand.vmem [shape: f32[9,16,64], index: 0, kind: input, shape index: {}]   ;;  %s707_s1 = inlined_call_operand.vmem [shape: f32[9,1024], index: 1, kind: output, shape index: {}]  }
   0x1   :  { %v316_v0 = vld [vmem:[%s706_s0 + $0x1] ss:$16 sm:%s63_s6]   ;;  %s71_s12 = smov 48  ;;  %s76_s13 = smov 192  ;;  %v349_v33 = vld [vmem:[%s706_s0 + $0x85] sm:$0x1]  }
   0x2   :  { %v317_v1 = vld [vmem:[%s706_s0 + $0x1] ss:$16 sm:%s66_s7]   ;;  %s108_s18 = smov 3  ;;  %s111_s21 = smov 12  ;;  %vm217_vm4 = vcmask 1044483   ;;  %vm222_vm5 = vcmask 1046533  }
   0x3   :  { %v69_v2 = vsel %vm68_vm0, %v317_v1, %v316_v0  ;;  %v318_v3 = vld [vmem:[%s706_s0 + $0x1] ss:$16 sm:%s71_s12]   ;;  %s116_s22 = smov 48  ;;  %v326_v8 = vld [vmem:[%s706_s0 - $0xd] ss:$16 sm:%s111_s21]   ;;  %s121_s27 = smov 192 }
   0x4   :  { %v319_v4 = vld [vmem:[%s706_s0 + $0x1] ss:$16 sm:%s76_s13]   ;;  %v74_v5 = vsel %vm73_vm1, %v318_v3, %v69_v2  ;;  %v327_v9 = vld [vmem:[%s706_s0 - $0xd] ss:$16 sm:%s116_s22]   ;;  %s85_s28 = smov 3  ;;  %s372_s29 = smov 64  }
   0x5   :  { %v325_v6 = vld [vmem:[%s706_s0 + $0x81] ss:$-126 sm:%s108_s18]   ;;  %v79_v7 = vsel %vm78_vm2, %v319_v4, %v74_v5  ;;  %s88_s3 = smov 12  ;;  %s93_s4 = smov 48  ;;  %vm226_vm6 = vcmask 1047559   ;;  %vm3_vm7 = vcmask 523264  }
   0x6   :  { %80 = vrot.lane.b32.xlu0 %v79_v7, %s372_s29  ;;  %v114_v10 = vsel %vm68_vm0, %v326_v8, %v325_v6  ;;  %v328_v11 = vld [vmem:[%s706_s0 - $0xd] ss:$16 sm:%s121_s27]   ;;  %s98_s9 = smov 192  ;;  %s133_s10 = smov 3  ;;  %v353_v41 = vld [vmem:[%s706_s0 + $0x40] sm:$0x80]  }
   0x7   :  { %v119_v12 = vsel %vm73_vm1, %v327_v9, %v114_v10  ;;  %v320_v13 = vld [vmem:[%s706_s0 + $0x9] ss:$16 sm:%s85_s28]   ;;  %s136_s15 = smov 12  ;;  %s141_s16 = smov 48  ;;  %v356_v42 = vld [vmem:[%s706_s0 + $0x8d] sm:$0x1]  }
   0x8   :  { %v321_v14 = vld [vmem:[%s706_s0 + $0x9] ss:$16 sm:%s88_s3]   ;;  %v124_v15 = vsel %vm78_vm2, %v328_v11, %v119_v12  ;;  %s146_s19 = smov 192  ;;  %s158_s20 = smov 3  ;;  %v332_v22 = vld [vmem:[%s706_s0 - $0x5] ss:$16 sm:%s136_s15]  }
   0x9   :  { %v91_v16 = vsel %vm68_vm0, %v321_v14, %v320_v13  ;;  %v322_v17 = vld [vmem:[%s706_s0 + $0x9] ss:$16 sm:%s93_s4]   ;;  %125 = vrot.lane.b32.xlu1 %v124_v15, %s372_s29  ;;  %s161_s25 = smov 12  ;;  %s166_s26 = smov 48  ;;  %v360_v46 = vld [vmem:[%s706_s0 + $0x48] sm:$0x80]  }
   0xa   :  { %v323_v18 = vld [vmem:[%s706_s0 + $0x9] ss:$16 sm:%s98_s9]   ;;  %v96_v19 = vsel %vm73_vm1, %v322_v17, %v91_v16  ;;  %v333_v23 = vld [vmem:[%s706_s0 - $0x5] ss:$16 sm:%s141_s16]   ;;  %s171_s30 = smov 192  ;;  %s183_s2 = smov 3 }
   0xb   :  { %v331_v20 = vld [vmem:[%s706_s0 + $0x89] ss:$-126 sm:%s133_s10]   ;;  %v101_v21 = vsel %vm78_vm2, %v323_v18, %v96_v19  ;;  %s186_s7 = smov 12  ;;  %s191_s8 = smov 48  ;;  %v2_v54 = vld [vmem:[%s706_s0] ss:$2 sm:$0xff]  }
   0xc   :  { %102 = vrot.lane.b32.xlu0 %v101_v21, %s372_s29  ;;  %v139_v24 = vsel %vm68_vm0, %v332_v22, %v331_v20  ;;  %v334_v25 = vld [vmem:[%s706_s0 - $0x5] ss:$16 sm:%s146_s19]   ;;  %s196_s13 = smov 192  ;;  %s210_s18 = smov 6  ;;  %v292_v2 = vld [vmem:[%s706_s0 + $0x10] ss:$2 sm:$0xff]  }
   0xd   :  { %v144_v26 = vsel %vm73_vm1, %v333_v23, %v139_v24  ;;  %v337_v27 = vld [vmem:[%s706_s0 + $0x83] ss:$-16 sm:%s158_s20]   ;;  %v338_v28 = vld [vmem:[%s706_s0 - $0x1b] ss:$16 sm:%s161_s25]   ;;  %s215_s19 = smov 24  ;;  %s220_s24 = smov 96 }
   0xe   :  { %v149_v29 = vsel %vm78_vm2, %v334_v25, %v144_v26  ;;  %v164_v30 = vsel %vm68_vm0, %v338_v28, %v337_v27  ;;  %v339_v31 = vld [vmem:[%s706_s0 - $0x1b] ss:$16 sm:%s166_s26]   ;;  %v343_v35 = vld [vmem:[%s706_s0 + $0x8b] ss:$-16 sm:%s183_s2]   ;;  %s238_s25 = smov 6  ;;  %s243_s4 = smov 24 }
   0xf   :  { %v340_v32 = vld [vmem:[%s706_s0 - $0x1b] ss:$16 sm:%s171_s30]   ;;  %150 = vrot.lane.b32.xlu1 %v149_v29, %s372_s29  ;;  %v169_v34 = vsel %vm73_vm1, %v339_v31, %v164_v30  ;;  %s248_s9 = smov 96  ;;  %s264_s12 = smov 3  ;;  %v295_v4 = vld [vmem:[%s706_s0 + $0x20] ss:$2 sm:$0xff]  }
  0x10   :  { %v174_v36 = vsel %vm78_vm2, %v340_v32, %v169_v34  ;;  %v344_v37 = vld [vmem:[%s706_s0 - $0x13] ss:$16 sm:%s186_s7]   ;;  %v350_v44 = vld [vmem:[%s706_s0 + $0x55] ss:$16 sm:%s210_s18]   ;;  %s267_s17 = smov 12  ;;  %s272_s18 = smov 48 }
  0x11   :  { %v345_v38 = vld [vmem:[%s706_s0 - $0x13] ss:$16 sm:%s191_s8]   ;;  %175 = vrot.lane.b32.xlu0 %v174_v36, %s372_s29  ;;  %v189_v39 = vsel %vm68_vm0, %v344_v37, %v343_v35  ;;  %v213_v48 = vsel %vm212_vm3, %v350_v44, %v349_v33  ;;  %s277_s21 = smov 192  ;;  %4 = vst.msk [vmem:[%s707_s1] ss:$8 sm:$0xf] %vm3_vm7, %v2_v54  }
  0x12   :  { %v346_v40 = vld [vmem:[%s706_s0 - $0x13] ss:$16 sm:%s196_s13]   ;;  %v194_v43 = vsel %vm73_vm1, %v345_v38, %v189_v39  ;;  %v351_v45 = vld [vmem:[%s706_s0 - $0x29] ss:$16 sm:%s215_s19]   ;;  %vm82_vm8 = vcmask 1048064  }
  0x13   :  { %v199_v47 = vsel %vm78_vm2, %v346_v40, %v194_v43  ;;  %v352_v49 = vld [vmem:[%s706_s0 - $0x29] ss:$16 sm:%s220_s24]   ;;  %v357_v50 = vld [vmem:[%s706_s0 + $0x5d] ss:$16 sm:%s238_s25]   ;;  %v218_v51 = vsel %vm217_vm4, %v351_v45, %v213_v48 }
  0x14   :  { %200 = vrot.lane.b32.xlu1 %v199_v47, %s372_s29  ;;  %v241_v52 = vsel %vm212_vm3, %v357_v50, %v356_v42  ;;  %v358_v53 = vld [vmem:[%s706_s0 - $0x21] ss:$16 sm:%s243_s4]   ;;  %v223_v55 = vsel %vm222_vm5, %v352_v49, %v218_v51  ;;  %5 = vst.msk [vmem:[%s707_s1] ss:$8 sm:$0xf0] %vm3_vm7, %v2_v54  }
  0x15   :  { %v246_v56 = vsel %vm217_vm4, %v358_v53, %v241_v52  ;;  %v359_v57 = vld [vmem:[%s706_s0 - $0x21] ss:$16 sm:%s248_s9]   ;;  %v363_v58 = vld [vmem:[%s706_s0 + $0x87] ss:$-48 sm:%s264_s12]   ;;  %v227_v59 = vsel %vm226_vm6, %v353_v41, %v223_v55 }
  0x16   :  { %v251_v60 = vsel %vm222_vm5, %v359_v57, %v246_v56  ;;  %v364_v61 = vld [vmem:[%s706_s0 + $0x47] ss:$16 sm:%s267_s17]   ;;  %v365_v62 = vld [vmem:[%s706_s0 + $0x14f] ss:$-48 sm:%s272_s18]  }
  0x17   :  { %228 = vrot.lane.b32.xlu0 %v227_v59, %s372_s29  ;;  %v255_v63 = vsel %vm226_vm6, %v360_v46, %v251_v60  ;;  %v270_v0 = vsel %vm68_vm0, %v364_v61, %v363_v58  ;;  %v366_v1 = vld [vmem:[%s706_s0 + $0xf] ss:$16 sm:%s277_s21]   ;;  %293 = vst.msk [vmem:[%s707_s1 + $0x1] ss:$8 sm:$0xf] %vm3_vm7, %v292_v2  }
  0x18   :  { %256 = vrot.lane.b32.xlu1 %v255_v63, %s372_s29  ;;  %v275_v3 = vsel %vm73_vm1, %v365_v62, %v270_v0  ;;  %v298_v5 = vld [vmem:[%s706_s0 + $0x30] ss:$2 sm:$0xff]   ;;  %v301_v6 = vld [vmem:[%s706_s0 + $0x40] ss:$2 sm:$0xff]  }
  0x19   :  { %294 = vst.msk [vmem:[%s707_s1 + $0x1] ss:$8 sm:$0xf0] %vm3_vm7, %v292_v2   ;;  %v280_v7 = vsel %vm78_vm2, %v366_v1, %v275_v3  ;;  %296 = vst.msk [vmem:[%s707_s1 + $0x2] ss:$8 sm:$0xf] %vm3_vm7, %v295_v4  }
  0x1a   :  { %299 = vst.msk [vmem:[%s707_s1 + $0x3] ss:$8 sm:$0xf] %vm3_vm7, %v298_v5   ;;  %302 = vst.msk [vmem:[%s707_s1 + $0x4] ss:$8 sm:$0xf] %vm3_vm7, %v301_v6  }
  0x1b   :  { %v304_v8 = vld [vmem:[%s706_s0 + $0x50] ss:$2 sm:$0xff]   ;;  %v307_v9 = vld [vmem:[%s706_s0 + $0x60] ss:$2 sm:$0xff]   ;;  %281 = vrot.lane.b32.xlu0 %v280_v7, %s372_s29 }
  0x1c   :  { %v310_v10 = vld [vmem:[%s706_s0 + $0x70] ss:$2 sm:$0xff]   ;;  %297 = vst.msk [vmem:[%s707_s1 + $0x2] ss:$8 sm:$0xf0] %vm3_vm7, %v295_v4  }
  0x1d   :  { %300 = vst.msk [vmem:[%s707_s1 + $0x3] ss:$8 sm:$0xf0] %vm3_vm7, %v298_v5   ;;  %303 = vst.msk [vmem:[%s707_s1 + $0x4] ss:$8 sm:$0xf0] %vm3_vm7, %v301_v6  }
  0x1e   :  { %305 = vst.msk [vmem:[%s707_s1 + $0x5] ss:$8 sm:$0xf] %vm3_vm7, %v304_v8   ;;  %308 = vst.msk [vmem:[%s707_s1 + $0x6] ss:$8 sm:$0xf] %vm3_vm7, %v307_v9  }
  0x1f   :  { %311 = vst.msk [vmem:[%s707_s1 + $0x7] ss:$8 sm:$0xf] %vm3_vm7, %v310_v10   ;;  %306 = vst.msk [vmem:[%s707_s1 + $0x5] ss:$8 sm:$0xf0] %vm3_vm7, %v304_v8  }
  0x20   :  { %309 = vst.msk [vmem:[%s707_s1 + $0x6] ss:$8 sm:$0xf0] %vm3_vm7, %v307_v9   ;;  %312 = vst.msk [vmem:[%s707_s1 + $0x7] ss:$8 sm:$0xf0] %vm3_vm7, %v310_v10  }
  0x21   :  { %v313_v11 = vld [vmem:[%s706_s0 + $0x80] ss:$2 sm:$0xff]  }
  0x22   :  { %314 = vst.msk [vmem:[%s707_s1 + $0x40] ss:$8 sm:$0xf] %vm3_vm7, %v313_v11   ;;  %315 = vst.msk [vmem:[%s707_s1 + $0x40] ss:$8 sm:$0xf0] %vm3_vm7, %v313_v11  }
  0x78   :  { %v81_v12 = vpop.permute.xlu0 %80  }
  0x79   :  { %83 = vst.msk [vmem:[%s707_s1] sm:$0xff] %vm82_vm8, %v81_v12  }
  0x7b   :  { %v126_v13 = vpop.permute.xlu1 %125  }
  0x7c   :  { %329 = vst.msk [vmem:[%s707_s1 + $0x40] ss:$-56 sm:$0x3] %vm82_vm8, %v126_v13   ;;  %330 = vst.msk [vmem:[%s707_s1 + $0x7] sm:$0xfc] %vm82_vm8, %v126_v13  }
  0x7e   :  { %v103_v14 = vpop.permute.xlu0 %102  }
  0x7f   :  { %324 = vst.msk [vmem:[%s707_s1 + $0x20] sm:$0xff] %vm82_vm8, %v103_v14  }
  0x81   :  { %v151_v15 = vpop.permute.xlu1 %150  }
  0x82   :  { %335 = vst.msk [vmem:[%s707_s1 + $0x60] ss:$-56 sm:$0x3] %vm82_vm8, %v151_v15   ;;  %336 = vst.msk [vmem:[%s707_s1 + $0x27] sm:$0xfc] %vm82_vm8, %v151_v15  }
  0x83   :  { %v176_v16 = vpop.permute.xlu0 %175  }
  0x84   :  { %341 = vst.msk [vmem:[%s707_s1 + $0x48] ss:$-57 sm:$0x3] %vm82_vm8, %v176_v16   ;;  %342 = vst.msk [vmem:[%s707_s1 + $0xe] sm:$0xfc] %vm82_vm8, %v176_v16  }
  0x86   :  { %v201_v17 = vpop.permute.xlu1 %200  }
  0x87   :  { %347 = vst.msk [vmem:[%s707_s1 + $0x68] ss:$-57 sm:$0x3] %vm82_vm8, %v201_v17   ;;  %348 = vst.msk [vmem:[%s707_s1 + $0x2e] sm:$0xfc] %vm82_vm8, %v201_v17  }
  0x89   :  { %v229_v18 = vpop.permute.xlu0 %228  }
  0x8a   :  { %354 = vst.msk [vmem:[%s707_s1 + $0x50] ss:$-58 sm:$0x3] %vm82_vm8, %v229_v18   ;;  %355 = vst.msk [vmem:[%s707_s1 + $0x15] sm:$0xfc] %vm82_vm8, %v229_v18   ;;  %v257_v19 = vpop.permute.xlu1 %256  }
  0x8b   :  { %361 = vst.msk [vmem:[%s707_s1 + $0x70] ss:$-58 sm:$0x3] %vm82_vm8, %v257_v19   ;;  %362 = vst.msk [vmem:[%s707_s1 + $0x35] sm:$0xfc] %vm82_vm8, %v257_v19  }
  0x8d   :  { %v282_v20 = vpop.permute.xlu0 %281  }
  0x8e   :  { %367 = vst.msk [vmem:[%s707_s1 + $0x58] ss:$-59 sm:$0x3] %vm82_vm8, %v282_v20   ;;  %368 = vst.msk [vmem:[%s707_s1 + $0x1c] sm:$0xc] %vm82_vm8, %v282_v20  }
  0x8f   :  { %369 = vst.msk [vmem:[%s707_s1 + $0x164] ss:$-59 sm:$0x30] %vm82_vm8, %v282_v20   ;;  %370 = vst.msk [vmem:[%s707_s1 + $0x38] sm:$0xc0] %vm82_vm8, %v282_v20  }

// kernel: conv_pos_enc.1
= control target key start
LH: loop header
LB: loop body
LE: loop exit
PB: predicated region body
PF: predicated region fallthrough
CT: control target
= control target key end

     0   :  { %s2580_s12 = smov 0   ;;  %s5134_s0 = inlined_call_operand.vmem [shape: f32[2,18,1152], index: 0, kind: input, shape index: {}]   ;;  %s5135_s1 = inlined_call_operand.vmem [shape: f32[9,1024], index: 1, kind: input, shape index: {}]   ;;  %s5136_s2 = inlined_call_operand.vmem [shape: f32[1,1024], index: 2, kind: input, shape index: {}]   ;;  %s5137_s3 = inlined_call_operand.vmem [shape: f32[2,16,1024], index: 3, kind: output, shape index: {}]  }
   0x1 LB: > { %s2454_s13 = sadd.s32 4294967295, %s2557_s12   ;;  %p2458_p0 = scmp.ge.s32.totalorder %s2557_s12, 1  ;;  %s2557_s12 = sphi %s2580_s12, %s13_s12  }
   0x2   : > { %p137_p1 = scmp.lt.s32.totalorder %s2557_s12, 3 }
   0x4   : > { %p138_p2 = pnand %p2458_p0, %p137_p1 }
   0x6   : > { %141 = sbr.rel (%p138_p2) target bundleno = 619 (0x26b), region = 32 }
   0xb   : > { %v200_v0 = vlaneseq  ;;  %p161_p3 = scmp.lt.s32.totalorder %s2454_s13, 1  ;;  %v198_v2 = vld [vmem:[%s5136_s2] sm:$0xff]  ;;  %s2559_s21 = smov 64   ;;  %vm376_vm0 = vcmask 1040384   ;;  %vm1599_vm1 = vcmask 1046528   ;;  %vm248_vm2 = vcmask 523264  }
   0xc   : > { %v300_v7 = vld [vmem:[%s5135_s1] ss:$8 sm:$0xf] }
   0xd   : > { %v201_v1 = vshrl.u32 %v200_v0, 7  ;;  %s5701_s13 = smov (!%p161_p3, %s2454_s13), 1  ;;  %v301_v8 = vld [vmem:[%s5135_s1] ss:$8 sm:$0xf0] }
   0xe   : > { %s2481_s20 = smul.u32 216, %s5701_s13  ;;  %v302_v15 = vor.u32 %v301_v8, %v300_v7 }
   0xf   : > { %v2593_v3 = vsub.s32 2, %v201_v1  ;;  %v2595_v4 = vsub.s32 0, %v201_v1  ;;  %v2597_v5 = vsub.s32 3, %v201_v1  ;;  %v2599_v6 = vsub.s32 1, %v201_v1 }
  0x10   : > { %v2610_v11 = vsub.s32 5, %v201_v1  ;;  %v2616_v14 = vsub.s32 4, %v201_v1  ;;  %s2621_s24 = scalar_lea.vmem %s5134_s0, %s2481_s20  ;;  %v2624_v17 = vsub.s32 7, %v201_v1  ;;  %v2626_v18 = vsub.s32 6, %v201_v1 }
  0x11   : > { %v211_v9 = vrot.slane %v198_v2, %v2593_v3  ;;  %v203_v10 = vrot.slane %v198_v2, %v2595_v4  ;;  %v215_v12 = vrot.slane %v198_v2, %v2597_v5  ;;  %v207_v13 = vrot.slane %v198_v2, %v2599_v6  ;;  %v2634_v22 = vld [vmem:[%s2621_s24 + $0x8] sm:$0xff]  ;;  %v292_v23 = vld [vmem:[%s2621_s24] sm:$0xff]  ;;  %v2645_v30 = vld [vmem:[%s2621_s24 + $0x18] sm:$0xff] }
  0x12   : > { %v223_v16 = vrot.slane %v198_v2, %v2610_v11  ;;  %v219_v19 = vrot.slane %v198_v2, %v2616_v14  ;;  %v311_v20 = vrot.slane %v302_v15, %v2599_v6  ;;  %v307_v21 = vrot.slane %v302_v15, %v2595_v4  ;;  %v2648_v31 = vld [vmem:[%s2621_s24 + $0x10] sm:$0xff]  ;;  %v2657_v38 = vld [vmem:[%s2621_s24 + $0x28] sm:$0xff]  ;;  %v2660_v39 = vld [vmem:[%s2621_s24 + $0x20] sm:$0xff] }
  0x13   : > { %236 = vrot.lane.b32.xlu1 %v211_v9, %s2559_s21  ;;  %232 = vrot.lane.b32.xlu0 %v203_v10, %s2559_s21  ;;  %v231_v24 = vrot.slane %v198_v2, %v2624_v17  ;;  %v227_v25 = vrot.slane %v198_v2, %v2626_v18  ;;  %v319_v26 = vrot.slane %v302_v15, %v2597_v5  ;;  %v2669_v46 = vld [vmem:[%s2621_s24 + $0x38] sm:$0xff]  ;;  %v2672_v47 = vld [vmem:[%s2621_s24 + $0x30] sm:$0xff] }
  0x14   : > { %v345_v27 = vmul.f32 %v311_v20, %v2634_v22  ;;  %v344_v28 = vmul.f32 %v307_v21, %v292_v23  ;;  %v315_v29 = vrot.slane %v302_v15, %v2593_v3  ;;  %v327_v32 = vrot.slane %v302_v15, %v2610_v11  ;;  %v2675_v48 = vld [vmem:[%s2621_s24 + $0x50] sm:$0xff]  ;;  %v2678_v49 = vld [vmem:[%s2621_s24 + $0x48] sm:$0xff]  ;;  %v2687_v56 = vld [vmem:[%s2621_s24 + $0x60] sm:$0xff] }
  0x15   : > { %v323_v33 = vrot.slane %v302_v15, %v2616_v14  ;;  %v347_v36 = vmul.f32 %v319_v26, %v2645_v30  ;;  %v335_v40 = vrot.slane %v302_v15, %v2624_v17  ;;  %v331_v41 = vrot.slane %v302_v15, %v2626_v18  ;;  %v2690_v57 = vld [vmem:[%s2621_s24 + $0x58] sm:$0xff]  ;;  %v2697_v0 = vld [vmem:[%s2621_s24 + $0x70] sm:$0xff]  ;;  %v2700_v1 = vld [vmem:[%s2621_s24 + $0x68] sm:$0xff] }
  0x16   : > { %v378_v34 = vrot.slane %v345_v27, 7  ;;  %v377_v35 = vrot.slane %v344_v28, 7  ;;  %v346_v37 = vmul.f32 %v315_v29, %v2648_v31  ;;  %v349_v44 = vmul.f32 %v327_v32, %v2657_v38  ;;  %v2712_v15 = vld [vmem:[%s2621_s24 + $0x78] sm:$0xff] }
  0x17   : > { %238 = vrot.lane.b32.xlu1 %v215_v12, %s2559_s21  ;;  %234 = vrot.lane.b32.xlu0 %v207_v13, %s2559_s21  ;;  %v380_v42 = vrot.slane %v347_v36, 7  ;;  %v348_v45 = vmul.f32 %v323_v33, %v2660_v39  ;;  %v351_v52 = vmul.f32 %v335_v40, %v2669_v46  ;;  %v350_v53 = vmul.f32 %v331_v41, %v2672_v47  ;;  %v2709_v13 = vld [vmem:[%s2621_s24 + $0x80] sm:$0xff] }
  0x18   : > { %v379_v43 = vrot.slane %v346_v37, 7  ;;  %v382_v50 = vrot.slane %v349_v44, 7  ;;  %v353_v54 = vmul.f32 %v311_v20, %v2675_v48  ;;  %v352_v55 = vmul.f32 %v307_v21, %v2678_v49 }
  0x19   : > { %v381_v51 = vrot.slane %v348_v45, 7  ;;  %v384_v58 = vrot.slane %v351_v52, 7  ;;  %v383_v59 = vrot.slane %v350_v53, 7  ;;  %v355_v62 = vmul.f32 %v319_v26, %v2687_v56 }
  0x1a   : > { %v387_v60 = vrot.slane %v353_v54, 7  ;;  %v385_v61 = vrot.slane %v352_v55, 7  ;;  %v354_v63 = vmul.f32 %v315_v29, %v2690_v57  ;;  %v357_v2 = vmul.f32 %v327_v32, %v2697_v0 }
  0x1b   : > { %242 = vrot.lane.b32.xlu1 %v223_v16, %s2559_s21  ;;  %240 = vrot.lane.b32.xlu0 %v219_v19, %s2559_s21  ;;  %v356_v7 = vmul.f32 %v323_v33, %v2700_v1  ;;  %v391_v10 = vrot.slane %v355_v62, 7  ;;  %v359_v16 = vmul.f32 %v335_v40, %v2709_v13  ;;  %v358_v19 = vmul.f32 %v331_v41, %v2712_v15  ;;  %v2462_v33 = vld [vmem:[%s5135_s1 + $0x1] ss:$8 sm:$0xf] }
  0x1c   : > { %v388_v8 = vsel %vm376_vm0, %v378_v34, %v387_v60  ;;  %v386_v9 = vsel %vm376_vm0, %v377_v35, %v385_v61  ;;  %v389_v12 = vrot.slane %v354_v63, 7  ;;  %v395_v23 = vrot.slane %v357_v2, 7  ;;  %v2464_v40 = vld [vmem:[%s5135_s1 + $0x2] ss:$8 sm:$0xf] }
  0x1d   : > { %v392_v20 = vsel %vm376_vm0, %v380_v42, %v391_v10  ;;  %v399_v27 = vrot.slane %v359_v16, 7  ;;  %v397_v28 = vrot.slane %v358_v19, 7  ;;  %v2465_v41 = vld [vmem:[%s5135_s1 + $0x2] ss:$8 sm:$0xf0] }
  0x1e   : > { %v390_v21 = vsel %vm376_vm0, %v379_v43, %v389_v12  ;;  %v714_v44 = vor.u32 %v2465_v41, %v2464_v40  ;;  %v524_v19 = vld [vmem:[%s2621_s24 + $0x40] sm:$0xff] }
  0x1f   : > { %246 = vrot.lane.b32.xlu1 %v231_v24, %s2559_s21  ;;  %244 = vrot.lane.b32.xlu0 %v227_v25, %s2559_s21  ;;  %v393_v24 = vrot.slane %v356_v7, 7  ;;  %v396_v25 = vsel %vm376_vm0, %v382_v50, %v395_v23  ;;  %v400_v29 = vsel %vm376_vm0, %v384_v58, %v399_v27  ;;  %v398_v32 = vsel %vm376_vm0, %v383_v59, %v397_v28 }
  0x20   : > { %v719_v52 = vrot.slane %v714_v44, %v2595_v4  ;;  %v731_v55 = vrot.slane %v714_v44, %v2597_v5  ;;  %v735_v62 = vrot.slane %v714_v44, %v2616_v14 }
  0x21   : > { %v394_v26 = vsel %vm376_vm0, %v381_v51, %v393_v24 }
  0x22   : > { %v759_v7 = vmul.f32 %v731_v55, %v2660_v39  ;;  %v760_v16 = vmul.f32 %v735_v62, %v2657_v38 }
  0x23   : > { %403 = vrot.lane.b32.xlu1 %v378_v34, %s2559_s21  ;;  %401 = vrot.lane.b32.xlu0 %v377_v35, %s2559_s21  ;;  %v2463_v34 = vld [vmem:[%s5135_s1 + $0x1] ss:$8 sm:$0xf0] }
  0x24   : > { %v528_v35 = vor.u32 %v2463_v34, %v2462_v33  ;;  %v792_v39 = vrot.slane %v760_v16, 7 }
  0x26   : > { %v537_v36 = vrot.slane %v528_v35, %v2599_v6  ;;  %v533_v37 = vrot.slane %v528_v35, %v2595_v4  ;;  %v553_v45 = vrot.slane %v528_v35, %v2610_v11  ;;  %v561_v53 = vrot.slane %v528_v35, %v2624_v17 }
  0x27   : > { %407 = vrot.lane.b32.xlu1 %v380_v42, %s2559_s21  ;;  %405 = vrot.lane.b32.xlu0 %v379_v43, %s2559_s21  ;;  %v545_v42 = vrot.slane %v528_v35, %v2597_v5  ;;  %v541_v43 = vrot.slane %v528_v35, %v2593_v3  ;;  %v557_v54 = vrot.slane %v528_v35, %v2626_v18 }
  0x2b   : > { %411 = vrot.lane.b32.xlu1 %v382_v50, %s2559_s21  ;;  %409 = vrot.lane.b32.xlu0 %v381_v51, %s2559_s21  ;;  %v549_v50 = vrot.slane %v528_v35, %v2616_v14  ;;  %v723_v51 = vrot.slane %v714_v44, %v2599_v6 }
  0x2f   : > { %415 = vrot.lane.b32.xlu1 %v384_v58, %s2559_s21  ;;  %413 = vrot.lane.b32.xlu0 %v383_v59, %s2559_s21  ;;  %v757_v58 = vmul.f32 %v723_v51, %v2648_v31  ;;  %v756_v59 = vmul.f32 %v719_v52, %v2634_v22  ;;  %v747_v31 = vrot.slane %v714_v44, %v2624_v17 }
  0x30   : > { %v743_v22 = vrot.slane %v714_v44, %v2626_v18 }
  0x31   : > { %v789_v63 = vrot.slane %v757_v58, 7  ;;  %v788_v2 = vrot.slane %v756_v59, 7  ;;  %v2467_v58 = vld [vmem:[%s5135_s1 + $0x3] ss:$8 sm:$0xf0] }
  0x32   : > { %v770_v40 = vmul.f32 %v743_v22, %v2709_v13 }
  0x33   : > { %419 = vrot.lane.b32.xlu1 %v388_v8, %s2559_s21  ;;  %417 = vrot.lane.b32.xlu0 %v386_v9, %s2559_s21  ;;  %v791_v9 = vrot.slane %v759_v7, 7 }
  0x37   : > { %423 = vrot.lane.b32.xlu1 %v392_v20, %s2559_s21  ;;  %421 = vrot.lane.b32.xlu0 %v390_v21, %s2559_s21  ;;  %v763_v20 = vmul.f32 %v747_v31, %v524_v19  ;;  %v762_v21 = vmul.f32 %v743_v22, %v2669_v46  ;;  %v2848_v22 = vld [vmem:[%s2621_s24 + $0x8] sm:$0xfe] }
  0x39   : > { %v795_v38 = vrot.slane %v763_v20, 7  ;;  %v2870_v20 = vld [vmem:[%s2621_s24 + $0x18] sm:$0xfe] }
  0x3b   : > { %427 = vrot.lane.b32.xlu1 %v396_v25, %s2559_s21  ;;  %425 = vrot.lane.b32.xlu0 %v394_v26, %s2559_s21 }
  0x3f   : > { %431 = vrot.lane.b32.xlu1 %v400_v29, %s2559_s21  ;;  %429 = vrot.lane.b32.xlu0 %v398_v32, %s2559_s21  ;;  %v768_v29 = vmul.f32 %v735_v62, %v2697_v0 }
  0x43   : > { %435 = vrot.lane.b32.xlu1 %v387_v60, %s2559_s21  ;;  %433 = vrot.lane.b32.xlu0 %v385_v61, %s2559_s21  ;;  %v727_v60 = vrot.slane %v714_v44, %v2593_v3  ;;  %v739_v61 = vrot.slane %v714_v44, %v2610_v11  ;;  %v804_v44 = vrot.slane %v768_v29, 7 }
  0x45   : > { %v758_v8 = vmul.f32 %v727_v60, %v2645_v30  ;;  %v769_v46 = vmul.f32 %v739_v61, %v2712_v15 }
  0x47   : > { %439 = vrot.lane.b32.xlu1 %v391_v10, %s2559_s21  ;;  %437 = vrot.lane.b32.xlu0 %v389_v12, %s2559_s21  ;;  %v790_v10 = vrot.slane %v758_v8, 7  ;;  %v761_v12 = vmul.f32 %v739_v61, %v2672_v47  ;;  %v794_v47 = vrot.slane %v762_v21, 7  ;;  %v2873_v21 = vld [vmem:[%s2621_s24 + $0x10] sm:$0xfe] }
  0x49   : > { %v793_v30 = vrot.slane %v761_v12, 7 }
  0x4b   : > { %443 = vrot.lane.b32.xlu1 %v395_v23, %s2559_s21  ;;  %441 = vrot.lane.b32.xlu0 %v393_v24, %s2559_s21  ;;  %v765_v23 = vmul.f32 %v723_v51, %v2690_v57  ;;  %v764_v24 = vmul.f32 %v719_v52, %v2675_v48  ;;  %v808_v52 = vrot.slane %v770_v40, 7  ;;  %v2917_v40 = vld [vmem:[%s2621_s24 + $0x30] sm:$0xfe] }
  0x4c   : > { %5284 = vst [vmem:[#allocation10_spill] sm:$0xff] %v2917_v40 }
  0x4d   : > { %v798_v25 = vrot.slane %v765_v23, 7  ;;  %v796_v26 = vrot.slane %v764_v24, 7 }
  0x4f   : > { %447 = vrot.lane.b32.xlu1 %v399_v27, %s2559_s21  ;;  %445 = vrot.lane.b32.xlu0 %v397_v28, %s2559_s21  ;;  %v767_v27 = vmul.f32 %v731_v55, %v2700_v1  ;;  %v766_v28 = vmul.f32 %v727_v60, %v2687_v56  ;;  %v799_v32 = vsel %vm376_vm0, %v789_v63, %v798_v25  ;;  %v2466_v55 = vld [vmem:[%s5135_s1 + $0x3] ss:$8 sm:$0xf] }
  0x50   : > { %v797_v33 = vsel %vm376_vm0, %v788_v2, %v796_v26  ;;  %v938_v61 = vor.u32 %v2467_v58, %v2466_v55 }
  0x51   : > { %v802_v34 = vrot.slane %v767_v27, 7  ;;  %v800_v35 = vrot.slane %v766_v28, 7  ;;  %v2892_v27 = vld [vmem:[%s2621_s24 + $0x28] sm:$0xfe]  ;;  %v2895_v28 = vld [vmem:[%s2621_s24 + $0x20] sm:$0xfe] }
  0x52   : > { %v2841_v7 = vrot.slane %v938_v61, %v2595_v4  ;;  %v2857_v12 = vrot.slane %v938_v61, %v2597_v5  ;;  %v2863_v19 = vrot.slane %v938_v61, %v2593_v3  ;;  %v2879_v24 = vrot.slane %v938_v61, %v2610_v11  ;;  %5280 = vst [vmem:[#allocation6_spill] sm:$0xff] %v2892_v27 }
  0x53   : > { %564 = vrot.lane.b32.xlu1 %v537_v36, %s2559_s21  ;;  %562 = vrot.lane.b32.xlu0 %v533_v37, %s2559_s21  ;;  %v2799_v36 = vld [vmem:[%s2621_s24 + $0x88] sm:$0xff]  ;;  %v803_v41 = vsel %vm376_vm0, %v791_v9, %v802_v34  ;;  %v2901_v29 = vrot.slane %v938_v61, %v2624_v17 }
  0x54   : > { %v771_v37 = vmul.f32 %v747_v31, %v2799_v36  ;;  %v983_v23 = vmul.f32 %v2857_v12, %v2870_v20 }
  0x56   : > { %v810_v51 = vrot.slane %v771_v37, 7  ;;  %v2914_v37 = vld [vmem:[%s2621_s24 + $0x38] sm:$0xfe] }
  0x57   : > { %568 = vrot.lane.b32.xlu1 %v545_v42, %s2559_s21  ;;  %566 = vrot.lane.b32.xlu0 %v541_v43, %s2559_s21  ;;  %v801_v42 = vsel %vm376_vm0, %v790_v10, %v800_v35  ;;  %v806_v43 = vrot.slane %v769_v46, 7  ;;  %v985_v46 = vmul.f32 %v2879_v24, %v2892_v27  ;;  %5283 = vst [vmem:[#allocation9_spill] sm:$0xff] %v2914_v37 }
  0x5b   : > { %572 = vrot.lane.b32.xlu1 %v553_v45, %s2559_s21  ;;  %570 = vrot.lane.b32.xlu0 %v549_v50, %s2559_s21  ;;  %v807_v45 = vsel %vm376_vm0, %v793_v30, %v806_v43  ;;  %v805_v50 = vsel %vm376_vm0, %v792_v39, %v804_v44 }
  0x5f   : > { %576 = vrot.lane.b32.xlu1 %v561_v53, %s2559_s21  ;;  %574 = vrot.lane.b32.xlu0 %v557_v54, %s2559_s21  ;;  %v811_v53 = vsel %vm376_vm0, %v795_v38, %v810_v51  ;;  %v809_v54 = vsel %vm376_vm0, %v794_v47, %v808_v52 }
  0x63   : > { %814 = vrot.lane.b32.xlu1 %v789_v63, %s2559_s21  ;;  %812 = vrot.lane.b32.xlu0 %v788_v2, %s2559_s21  ;;  %v2837_v2 = vrot.slane %v938_v61, %v2599_v6 }
  0x67   : > { %818 = vrot.lane.b32.xlu1 %v791_v9, %s2559_s21  ;;  %816 = vrot.lane.b32.xlu0 %v790_v10, %s2559_s21  ;;  %v981_v9 = vmul.f32 %v2837_v2, %v2848_v22  ;;  %v2854_v10 = vld [vmem:[%s2621_s24] sm:$0xfe] }
  0x68   : > { %v980_v16 = vmul.f32 %v2841_v7, %v2854_v10 }
  0x6b   : > { %822 = vrot.lane.b32.xlu1 %v793_v30, %s2559_s21  ;;  %820 = vrot.lane.b32.xlu0 %v792_v39, %s2559_s21 }
  0x6f   : > { %826 = vrot.lane.b32.xlu1 %v795_v38, %s2559_s21  ;;  %824 = vrot.lane.b32.xlu0 %v794_v47, %s2559_s21  ;;  %v982_v38 = vmul.f32 %v2863_v19, %v2873_v21  ;;  %v2885_v47 = vrot.slane %v938_v61, %v2616_v14 }
  0x73   : > { %830 = vrot.lane.b32.xlu1 %v799_v32, %s2559_s21  ;;  %828 = vrot.lane.b32.xlu0 %v797_v33, %s2559_s21  ;;  %v984_v32 = vmul.f32 %v2885_v47, %v2895_v28  ;;  %v2907_v33 = vrot.slane %v938_v61, %v2626_v18  ;;  %v993_v61 = vmul.f32 %v2879_v24, %v2697_v0 }
  0x77   : > { %834 = vrot.lane.b32.xlu1 %v803_v41, %s2559_s21  ;;  %832 = vrot.lane.b32.xlu0 %v801_v42, %s2559_s21  ;;  %v987_v41 = vmul.f32 %v2901_v29, %v2914_v37  ;;  %v986_v42 = vmul.f32 %v2907_v33, %v2917_v40 }
  0x7b   : > { %838 = vrot.lane.b32.xlu1 %v807_v45, %s2559_s21  ;;  %836 = vrot.lane.b32.xlu0 %v805_v50, %s2559_s21  ;;  %v989_v45 = vmul.f32 %v2837_v2, %v2675_v48  ;;  %v988_v50 = vmul.f32 %v2841_v7, %v2678_v49 }
  0x7f   : > { %842 = vrot.lane.b32.xlu1 %v811_v53, %s2559_s21  ;;  %840 = vrot.lane.b32.xlu0 %v809_v54, %s2559_s21  ;;  %v991_v53 = vmul.f32 %v2857_v12, %v2687_v56  ;;  %v990_v54 = vmul.f32 %v2863_v19, %v2690_v57 }
  0x83   : > { %846 = vrot.lane.b32.xlu1 %v798_v25, %s2559_s21  ;;  %844 = vrot.lane.b32.xlu0 %v796_v26, %s2559_s21 }
  0x85   : > { %v2825_v59 = vpop.permute.xlu1 %236  ;;  %v2827_v60 = vpop.permute.xlu0 %232 }
  0x87   : > { %850 = vrot.lane.b32.xlu1 %v802_v34, %s2559_s21  ;;  %848 = vrot.lane.b32.xlu0 %v800_v35, %s2559_s21 }
  0x89   : > { %v2831_v62 = vpop.permute.xlu1 %238  ;;  %v2833_v63 = vpop.permute.xlu0 %234 }
  0x8b   : > { %854 = vrot.lane.b32.xlu1 %v806_v43, %s2559_s21  ;;  %852 = vrot.lane.b32.xlu0 %v804_v44, %s2559_s21 }
  0x8d   : > { %v2843_v8 = vpop.permute.xlu1 %242  ;;  %v2845_v31 = vpop.permute.xlu0 %240 }
  0x8f   : > { %858 = vrot.lane.b32.xlu1 %v810_v51, %s2559_s21  ;;  %856 = vrot.lane.b32.xlu0 %v808_v52, %s2559_s21 }
  0x91   : > { %v2865_v30 = vpop.permute.xlu1 %246  ;;  %v2867_v39 = vpop.permute.xlu0 %244 }
  0x92   : > { %5276 = vst [vmem:[#allocation2_spill] sm:$0xff] %v2865_v30  ;;  %5277 = vst [vmem:[#allocation3_spill] sm:$0xff] %v2867_v39 }
  0x93   : > { %1030 = vrot.lane.b32.xlu1 %v981_v9, %s2559_s21  ;;  %1028 = vrot.lane.b32.xlu0 %v980_v16, %s2559_s21  ;;  %v992_v9 = vmul.f32 %v2885_v47, %v2700_v1 }
  0x95   : > { %v2887_v25 = vpop.permute.xlu1 %403  ;;  %v2889_v26 = vpop.permute.xlu0 %401 }
  0x96   : > { %5278 = vst [vmem:[#allocation4_spill] sm:$0xff] %v2887_v25  ;;  %5279 = vst [vmem:[#allocation5_spill] sm:$0xff] %v2889_v26 }
  0x97   : > { %1034 = vrot.lane.b32.xlu1 %v983_v23, %s2559_s21  ;;  %1032 = vrot.lane.b32.xlu0 %v982_v38, %s2559_s21  ;;  %v995_v38 = vmul.f32 %v2901_v29, %v2709_v13 }
  0x99   : > { %v2909_v34 = vpop.permute.xlu1 %407  ;;  %v2911_v35 = vpop.permute.xlu0 %405 }
  0x9a   : > { %5281 = vst [vmem:[#allocation7_spill] sm:$0xff] %v2909_v34  ;;  %5282 = vst [vmem:[#allocation8_spill] sm:$0xff] %v2911_v35 }
  0x9b   : > { %1038 = vrot.lane.b32.xlu1 %v985_v46, %s2559_s21  ;;  %1036 = vrot.lane.b32.xlu0 %v984_v32, %s2559_s21  ;;  %v994_v46 = vmul.f32 %v2907_v33, %v2712_v15 }
  0x9d   : > { %v2925_v43 = vpop.permute.xlu1 %411  ;;  %v2927_v44 = vpop.permute.xlu0 %409 }
  0x9e   : > { %5285 = vst [vmem:[#allocation11_spill] sm:$0xff] %v2925_v43  ;;  %5286 = vst [vmem:[#allocation12_spill] sm:$0xff] %v2927_v44 }
  0x9f   : > { %1042 = vrot.lane.b32.xlu1 %v987_v41, %s2559_s21  ;;  %1040 = vrot.lane.b32.xlu0 %v986_v42, %s2559_s21  ;;  %v2970_v42 = vld [vmem:[%s2621_s24 + $0x98] sm:$0x1] }
  0xa1   : > { %v2935_v51 = vpop.permute.xlu1 %415  ;;  %v2937_v52 = vpop.permute.xlu0 %413 }
  0xa2   : > { %5287 = vst [vmem:[#allocation13_spill] sm:$0xff] %v2935_v51  ;;  %5288 = vst [vmem:[#allocation14_spill] sm:$0xff] %v2937_v52 }
  0xa3   : > { %1046 = vrot.lane.b32.xlu1 %v989_v45, %s2559_s21  ;;  %1044 = vrot.lane.b32.xlu0 %v988_v50, %s2559_s21  ;;  %v997_v45 = vmul.f32 %v2837_v2, %v2970_v42  ;;  %v2976_v50 = vld [vmem:[%s2621_s24 + $0x90] sm:$0x1] }
  0xa5   : > { %v2945_v55 = vpop.permute.xlu1 %419  ;;  %v2947_v58 = vpop.permute.xlu0 %417 }
  0xa6   : > { %5289 = vst [vmem:[#allocation15_spill] sm:$0xff] %v2945_v55  ;;  %5290 = vst [vmem:[#allocation16_spill] sm:$0xff] %v2947_v58 }
  0xa7   : > { %1050 = vrot.lane.b32.xlu1 %v991_v53, %s2559_s21  ;;  %1048 = vrot.lane.b32.xlu0 %v990_v54, %s2559_s21  ;;  %v996_v53 = vmul.f32 %v2841_v7, %v2976_v50 }
  0xa9   : > { %v2955_v16 = vpop.permute.xlu1 %423  ;;  %v2957_v23 = vpop.permute.xlu0 %421 }
  0xaa   : > { %5291 = vst [vmem:[#allocation17_spill] sm:$0xff] %v2955_v16  ;;  %5292 = vst [vmem:[#allocation18_spill] sm:$0xff] %v2957_v23 }
  0xab   : > { %1054 = vrot.lane.b32.xlu1 %v993_v61, %s2559_s21  ;;  %1052 = vrot.lane.b32.xlu0 %v992_v9, %s2559_s21  ;;  %v2986_v9 = vld [vmem:[%s2621_s24 + $0xa8] sm:$0x1] }
  0xac   : > { %v999_v2 = vmul.f32 %v2857_v12, %v2986_v9 }
  0xad   : > { %v2965_v32 = vpop.permute.xlu1 %427  ;;  %v2967_v41 = vpop.permute.xlu0 %425 }
  0xae   : > { %5293 = vst [vmem:[#allocation19_spill] sm:$0xff] %v2965_v32  ;;  %5294 = vst [vmem:[#allocation20_spill] sm:$0xff] %v2967_v41  ;;  %v2989_v32 = vld [vmem:[%s2621_s24 + $0xa0] sm:$0x1] }
  0xaf   : > { %1058 = vrot.lane.b32.xlu1 %v995_v38, %s2559_s21  ;;  %1056 = vrot.lane.b32.xlu0 %v994_v46, %s2559_s21  ;;  %v998_v7 = vmul.f32 %v2863_v19, %v2989_v32  ;;  %v2468_v19 = vld [vmem:[%s5135_s1 + $0x4] ss:$8 sm:$0xf] }
  0xb1   : > { %v2981_v54 = vpop.permute.xlu1 %431  ;;  %v2983_v61 = vpop.permute.xlu0 %429 }
  0xb2   : > { %5295 = vst [vmem:[#allocation21_spill] sm:$0xff] %v2981_v54  ;;  %5296 = vst [vmem:[#allocation22_spill] sm:$0xff] %v2983_v61  ;;  %v3002_v61 = vld [vmem:[%s2621_s24 + $0xb8] sm:$0x1]  ;;  %v3005_v54 = vld [vmem:[%s2621_s24 + $0xb0] sm:$0x1] }
  0xb3   : > { %1062 = vrot.lane.b32.xlu1 %v997_v45, %s2559_s21  ;;  %1060 = vrot.lane.b32.xlu0 %v996_v53, %s2559_s21  ;;  %5299 = vst [vmem:[#allocation25_spill] sm:$0xff] %v3002_v61  ;;  %5300 = vst [vmem:[#allocation26_spill] sm:$0xff] %v3005_v54  ;;  %v1001_v45 = vmul.f32 %v2879_v24, %v3002_v61  ;;  %v1000_v12 = vmul.f32 %v2885_v47, %v3005_v54  ;;  %v2469_v53 = vld [vmem:[%s5135_s1 + $0x4] ss:$8 sm:$0xf0] }
  0xb4   : > { %v3027_v24 = vld [vmem:[%s2621_s24 + $0xc0] sm:$0x1] }
  0xb5   : > { %v2997_v38 = vpop.permute.xlu1 %435  ;;  %v2999_v46 = vpop.permute.xlu0 %433  ;;  %5304 = vst [vmem:[#allocation30_spill] sm:$0xff] %v3027_v24  ;;  %v1002_v41 = vmul.f32 %v2907_v33, %v3027_v24 }
  0xb6   : > { %5297 = vst [vmem:[#allocation23_spill] sm:$0xff] %v2997_v38  ;;  %5298 = vst [vmem:[#allocation24_spill] sm:$0xff] %v2999_v46 }
  0xb7   : > { %1066 = vrot.lane.b32.xlu1 %v999_v2, %s2559_s21  ;;  %1064 = vrot.lane.b32.xlu0 %v998_v7, %s2559_s21  ;;  %v3024_v2 = vld [vmem:[%s2621_s24 + $0xc8] sm:$0x1]  ;;  %v1154_v7 = vor.u32 %v2469_v53, %v2468_v19  ;;  %v2470_v19 = vld [vmem:[%s5135_s1 + $0x5] ss:$8 sm:$0xf] }
  0xb8   : > { %5303 = vst [vmem:[#allocation29_spill] sm:$0xff] %v3024_v2  ;;  %v1003_v47 = vmul.f32 %v2901_v29, %v3024_v2 }
  0xb9   : > { %v3019_v46 = vpop.permute.xlu1 %439  ;;  %v3021_v38 = vpop.permute.xlu0 %437  ;;  %v1171_v33 = vrot.slane %v1154_v7, %v2597_v5 }
  0xba   : > { %5301 = vst [vmem:[#allocation27_spill] sm:$0xff] %v3019_v46  ;;  %5302 = vst [vmem:[#allocation28_spill] sm:$0xff] %v3021_v38  ;;  %v1163_v38 = vrot.slane %v1154_v7, %v2599_v6 }
  0xbb   : > { %1070 = vrot.lane.b32.xlu1 %v1001_v45, %s2559_s21  ;;  %1068 = vrot.lane.b32.xlu0 %v1000_v12, %s2559_s21  ;;  %v1159_v45 = vrot.slane %v1154_v7, %v2595_v4  ;;  %v1167_v12 = vrot.slane %v1154_v7, %v2593_v3 }
  0xbd   : > { %v3035_v16 = vpop.permute.xlu1 %443  ;;  %v3037_v46 = vpop.permute.xlu0 %441 }
  0xbe   : > { %5305 = vst [vmem:[#allocation31_spill] sm:$0xff] %v3035_v16  ;;  %5306 = vst [vmem:[#allocation32_spill] sm:$0xff] %v3037_v46  ;;  %v1187_v46 = vrot.slane %v1154_v7, %v2624_v17 }
  0xbf   : > { %1074 = vrot.lane.b32.xlu1 %v1003_v47, %s2559_s21  ;;  %1072 = vrot.lane.b32.xlu0 %v1002_v41, %s2559_s21  ;;  %v2471_v41 = vld [vmem:[%s5135_s1 + $0x5] ss:$8 sm:$0xf0] }
  0xc1   : > { %v3043_v23 = vpop.permute.xlu1 %447  ;;  %v3045_v29 = vpop.permute.xlu0 %445 }
  0xc2   : > { %5307 = vst [vmem:[#allocation33_spill] sm:$0xff] %v3043_v23  ;;  %5308 = vst [vmem:[#allocation34_spill] sm:$0xff] %v3045_v29  ;;  %v1277_v23 = vor.u32 %v2471_v41, %v2470_v19 }
  0xc3   : > { %1190 = vrot.lane.b32.xlu1 %v1163_v38, %s2559_s21  ;;  %1188 = vrot.lane.b32.xlu0 %v1159_v45, %s2559_s21  ;;  %v1179_v38 = vrot.slane %v1154_v7, %v2610_v11  ;;  %v1175_v45 = vrot.slane %v1154_v7, %v2616_v14 }
  0xc4   : > { %v3077_v19 = vrot.slane %v1277_v23, %v2595_v4  ;;  %v3122_v55 = vrot.slane %v1277_v23, %v2626_v18 }
  0xc5   : > { %v3057_v53 = vpop.permute.xlu1 %564  ;;  %v3059_v47 = vpop.permute.xlu0 %562 }
  0xc6   : > { %5309 = vst [vmem:[#allocation35_spill] sm:$0xff] %v3057_v53  ;;  %5310 = vst [vmem:[#allocation36_spill] sm:$0xff] %v3059_v47  ;;  %v3072_v53 = vrot.slane %v1277_v23, %v2599_v6  ;;  %v3106_v47 = vrot.slane %v1277_v23, %v2616_v14 }
  0xc7   : > { %1194 = vrot.lane.b32.xlu1 %v1171_v33, %s2559_s21  ;;  %1192 = vrot.lane.b32.xlu0 %v1167_v12, %s2559_s21  ;;  %v1183_v33 = vrot.slane %v1154_v7, %v2626_v18  ;;  %v1319_v7 = vmul.f32 %v3077_v19, %v2848_v22 }
  0xc9   : > { %v3065_v29 = vpop.permute.xlu1 %568  ;;  %v3067_v16 = vpop.permute.xlu0 %566 }
  0xca   : > { %5311 = vst [vmem:[#allocation37_spill] sm:$0xff] %v3065_v29  ;;  %5312 = vst [vmem:[#allocation38_spill] sm:$0xff] %v3067_v16  ;;  %v3087_v29 = vrot.slane %v1277_v23, %v2597_v5 }
  0xcb   : > { %1198 = vrot.lane.b32.xlu1 %v1179_v38, %s2559_s21  ;;  %1196 = vrot.lane.b32.xlu0 %v1175_v45, %s2559_s21  ;;  %v1320_v38 = vmul.f32 %v3072_v53, %v2873_v21  ;;  %v1290_v45 = vrot.slane %v1277_v23, %v2593_v3 }
  0xcc   : > { %v1338_v44 = vmul.f32 %v3087_v29, %v3005_v54 }
  0xcd   : > { %v3079_v12 = vpop.permute.xlu1 %572  ;;  %v3081_v41 = vpop.permute.xlu0 %570 }
  0xce   : > { %5313 = vst [vmem:[#allocation39_spill] sm:$0xff] %v3079_v12  ;;  %5314 = vst [vmem:[#allocation40_spill] sm:$0xff] %v3081_v41  ;;  %v3101_v41 = vrot.slane %v1277_v23, %v2610_v11 }
  0xcf   : > { %1202 = vrot.lane.b32.xlu1 %v1187_v46, %s2559_s21  ;;  %1200 = vrot.lane.b32.xlu0 %v1183_v33, %s2559_s21  ;;  %v1322_v46 = vmul.f32 %v3087_v29, %v2895_v28  ;;  %v1321_v33 = vmul.f32 %v1290_v45, %v2870_v20 }
  0xd1   : > { %v3093_v16 = vpop.permute.xlu1 %576  ;;  %v3095_v12 = vpop.permute.xlu0 %574 }
  0xd2   : > { %5315 = vst [vmem:[#allocation41_spill] sm:$0xff] %v3093_v16  ;;  %5316 = vst [vmem:[#allocation42_spill] sm:$0xff] %v3095_v12  ;;  %v3116_v12 = vrot.slane %v1277_v23, %v2624_v17 }
  0xd3   : > { %1369 = vrot.lane.b32.xlu1 %v1320_v38, %s2559_s21  ;;  %1367 = vrot.lane.b32.xlu0 %v1319_v7, %s2559_s21  ;;  %v1324_v38 = vmul.f32 %v3101_v41, %v2917_v40  ;;  %v1323_v7 = vmul.f32 %v3106_v47, %v2892_v27 }
  0xd5   : > { %v3108_v58 = vpop.permute.xlu1 %814  ;;  %v3110_v16 = vpop.permute.xlu0 %812 }
  0xd6   : > { %5317 = vst [vmem:[#allocation43_spill] sm:$0xff] %v3108_v58  ;;  %5318 = vst [vmem:[#allocation44_spill] sm:$0xff] %v3110_v16  ;;  %v3129_v16 = vld [vmem:[%s2621_s24 + $0x40] sm:$0xfe] }
  0xd7   : > { %1373 = vrot.lane.b32.xlu1 %v1322_v46, %s2559_s21  ;;  %1371 = vrot.lane.b32.xlu0 %v1321_v33, %s2559_s21  ;;  %5321 = vst [vmem:[#allocation47_spill] sm:$0xff] %v3129_v16  ;;  %v1326_v46 = vmul.f32 %v3116_v12, %v3129_v16  ;;  %v1325_v33 = vmul.f32 %v3122_v55, %v2914_v37  ;;  %v3277_v37 = vld [vmem:[%s2621_s24 + $0x28] sm:$0xfc] }
  0xd9   : > { %v3124_v52 = vpop.permute.xlu1 %818  ;;  %v3126_v58 = vpop.permute.xlu0 %816 }
  0xda   : > { %5319 = vst [vmem:[#allocation45_spill] sm:$0xff] %v3124_v52  ;;  %5320 = vst [vmem:[#allocation46_spill] sm:$0xff] %v3126_v58  ;;  %v1328_v52 = vmul.f32 %v3072_v53, %v2690_v57 }
  0xdb   : > { %1377 = vrot.lane.b32.xlu1 %v1324_v38, %s2559_s21  ;;  %1375 = vrot.lane.b32.xlu0 %v1323_v7, %s2559_s21  ;;  %v1327_v38 = vmul.f32 %v3077_v19, %v2675_v48 }
  0xdd   : > { %v3137_v51 = vpop.permute.xlu1 %822  ;;  %v3139_v23 = vpop.permute.xlu0 %820 }
  0xde   : > { %5322 = vst [vmem:[#allocation48_spill] sm:$0xff] %v3137_v51  ;;  %5323 = vst [vmem:[#allocation49_spill] sm:$0xff] %v3139_v23  ;;  %v1330_v51 = vmul.f32 %v3087_v29, %v2700_v1  ;;  %v1490_v29 = vld [vmem:[%s2621_s24] sm:$0xfc] }
  0xdf   : > { %1381 = vrot.lane.b32.xlu1 %v1326_v46, %s2559_s21  ;;  %1379 = vrot.lane.b32.xlu0 %v1325_v33, %s2559_s21  ;;  %v1329_v46 = vmul.f32 %v1290_v45, %v2687_v56  ;;  %v1332_v33 = vmul.f32 %v3101_v41, %v2712_v15 }
  0xe1   : > { %v3147_v58 = vpop.permute.xlu1 %826  ;;  %v3149_v7 = vpop.permute.xlu0 %824 }
  0xe2   : > { %5324 = vst [vmem:[#allocation50_spill] sm:$0xff] %v3147_v58  ;;  %5325 = vst [vmem:[#allocation51_spill] sm:$0xff] %v3149_v7 }
  0xe3   : > { %1385 = vrot.lane.b32.xlu1 %v1328_v52, %s2559_s21  ;;  %1383 = vrot.lane.b32.xlu0 %v1327_v38, %s2559_s21  ;;  %v1331_v52 = vmul.f32 %v3106_v47, %v2697_v0  ;;  %v1334_v38 = vmul.f32 %v3116_v12, %v2799_v36 }
  0xe5   : > { %v3156_v23 = vpop.permute.xlu1 %830  ;;  %v3158_v43 = vpop.permute.xlu0 %828 }
  0xe6   : > { %5326 = vst [vmem:[#allocation52_spill] sm:$0xff] %v3156_v23  ;;  %5327 = vst [vmem:[#allocation53_spill] sm:$0xff] %v3158_v43 }
  0xe7   : > { %1389 = vrot.lane.b32.xlu1 %v1330_v51, %s2559_s21  ;;  %1387 = vrot.lane.b32.xlu0 %v1329_v46, %s2559_s21  ;;  %v1333_v51 = vmul.f32 %v3122_v55, %v2709_v13 }
  0xe9   : > { %v3166_v7 = vpop.permute.xlu1 %834  ;;  %v3168_v58 = vpop.permute.xlu0 %832 }
  0xea   : > { %5328 = vst [vmem:[#allocation54_spill] sm:$0xff] %v3166_v7  ;;  %5329 = vst [vmem:[#allocation55_spill] sm:$0xff] %v3168_v58  ;;  %v2472_v7 = vld [vmem:[%s5135_s1 + $0x6] ss:$8 sm:$0xf] }
  0xeb   : > { %1393 = vrot.lane.b32.xlu1 %v1332_v33, %s2559_s21  ;;  %1391 = vrot.lane.b32.xlu0 %v1331_v52, %s2559_s21  ;;  %v2473_v33 = vld [vmem:[%s5135_s1 + $0x6] ss:$8 sm:$0xf0]  ;;  %v1336_v52 = vmul.f32 %v3072_v53, %v2989_v32  ;;  %v1337_v53 = vmul.f32 %v1290_v45, %v2986_v9 }
  0xed   : > { %v3176_v43 = vpop.permute.xlu1 %838  ;;  %v3178_v46 = vpop.permute.xlu0 %836 }
  0xee   : > { %5330 = vst [vmem:[#allocation56_spill] sm:$0xff] %v3176_v43  ;;  %5331 = vst [vmem:[#allocation57_spill] sm:$0xff] %v3178_v46  ;;  %v1335_v43 = vmul.f32 %v3077_v19, %v2970_v42  ;;  %v1509_v46 = vor.u32 %v2473_v33, %v2472_v7 }
  0xef   : > { %1397 = vrot.lane.b32.xlu1 %v1334_v38, %s2559_s21  ;;  %1395 = vrot.lane.b32.xlu0 %v1333_v51, %s2559_s21  ;;  %v3209_v51 = vld [vmem:[%s2621_s24 + $0x8] sm:$0xfc] }
  0xf0   : > { %v3202_v38 = vrot.slane %v1509_v46, %v2599_v6  ;;  %v3212_v33 = vrot.slane %v1509_v46, %v2595_v4  ;;  %v3219_v45 = vrot.slane %v1509_v46, %v2597_v5 }
  0xf1   : > { %v3192_v58 = vpop.permute.xlu1 %842  ;;  %v3194_v23 = vpop.permute.xlu0 %840 }
  0xf2   : > { %5332 = vst [vmem:[#allocation58_spill] sm:$0xff] %v3192_v58  ;;  %5333 = vst [vmem:[#allocation59_spill] sm:$0xff] %v3194_v23  ;;  %v3234_v58 = vld [vmem:[%s2621_s24 + $0x18] sm:$0xfc]  ;;  %v3240_v23 = vld [vmem:[%s2621_s24 + $0xd0] sm:$0x1] }
  0xf3   : > { %1401 = vrot.lane.b32.xlu1 %v1336_v52, %s2559_s21  ;;  %1399 = vrot.lane.b32.xlu0 %v1335_v43, %s2559_s21  ;;  %v1340_v43 = vmul.f32 %v3101_v41, %v3027_v24  ;;  %v3222_v52 = vrot.slane %v1509_v46, %v2593_v3  ;;  %v3237_v41 = vld [vmem:[%s2621_s24 + $0x10] sm:$0xfc]  ;;  %5336 = vst [vmem:[#allocation62_spill] sm:$0xff] %v3240_v23 }
  0xf4   : > { %v1554_v26 = vmul.f32 %v3219_v45, %v3234_v58 }
  0xf5   : > { %v3204_v19 = vpop.permute.xlu1 %846  ;;  %v3206_v7 = vpop.permute.xlu0 %844 }
  0xf6   : > { %5334 = vst [vmem:[#allocation60_spill] sm:$0xff] %v3204_v19  ;;  %5335 = vst [vmem:[#allocation61_spill] sm:$0xff] %v3206_v7  ;;  %v1339_v7 = vmul.f32 %v3106_v47, %v3002_v61  ;;  %v1552_v19 = vmul.f32 %v3202_v38, %v3209_v51  ;;  %v3249_v47 = vmul.f32 %v3212_v33, %v2678_v49 }
  0xf7   : > { %1405 = vrot.lane.b32.xlu1 %v1338_v44, %s2559_s21  ;;  %1403 = vrot.lane.b32.xlu0 %v1337_v53, %s2559_s21  ;;  %v3231_v44 = vmul.f32 %v3202_v38, %v2675_v48  ;;  %v1551_v53 = vmul.f32 %v3212_v33, %v1490_v29  ;;  %v1342_v48 = vmul.f32 %v3116_v12, %v3240_v23 }
  0xf8   : > { %v1553_v29 = vmul.f32 %v3222_v52, %v3237_v41  ;;  %v3264_v49 = vmul.f32 %v3222_v52, %v2690_v57  ;;  %v1341_v12 = vmul.f32 %v3122_v55, %v3024_v2  ;;  %v3271_v23 = vrot.slane %v1509_v46, %v2610_v11  ;;  %v3285_v55 = vld [vmem:[%s2621_s24 + $0x20] sm:$0xfc] }
  0xf9   : > { %v3242_v34 = vpop.permute.xlu1 %850  ;;  %v3244_v35 = vpop.permute.xlu0 %848  ;;  %v1600_v25 = vrot.slane %v1551_v53, 1  ;;  %v3280_v57 = vrot.slane %v1509_v46, %v2616_v14  ;;  %v5341_v24 = vrot.slane %v3231_v44, 1 }
  0xfa   : > { %5337 = vst [vmem:[#allocation63_spill] sm:$0xff] %v3242_v34  ;;  %5338 = vst [vmem:[#allocation64_spill] sm:$0xff] %v3244_v35  ;;  %v3258_v34 = vmul.f32 %v3219_v45, %v2687_v56  ;;  %v3298_v40 = vmul.f32 %v3271_v23, %v2697_v0  ;;  %v3318_v0 = vrot.slane %v1509_v46, %v2626_v18  ;;  %v5346_v16 = vrot.slane %v3264_v49, 1 }
  0xfb   : > { %1409 = vrot.lane.b32.xlu1 %v1340_v43, %s2559_s21  ;;  %1407 = vrot.lane.b32.xlu0 %v1339_v7, %s2559_s21  ;;  %v1603_v43 = vrot.slane %v1552_v19, 1  ;;  %v1609_v19 = vrot.slane %v1554_v26, 1  ;;  %v3301_v26 = vrot.slane %v1509_v46, %v2624_v17  ;;  %v1555_v53 = vmul.f32 %v3280_v57, %v3285_v55 }
  0xfc   : > { %v5207_v46 = vrot.slane %v3298_v40, 1 }
  0xfd   : > { %v3273_v56 = vpop.permute.xlu1 %854  ;;  %v3282_v7 = vpop.permute.xlu0 %852  ;;  %v1605_v2 = vsel %vm1599_vm1, %v1603_v43, %v5341_v24  ;;  %v3312_v24 = vmul.f32 %v3280_v57, %v2700_v1  ;;  %v3315_v43 = vld [vmem:[%s2621_s24 + $0x38] sm:$0xfc]  ;;  %v3338_v30 = vmul.f32 %v3301_v26, %v2709_v13  ;;  %v1612_v39 = vrot.slane %v1555_v53, 1 }
  0xfe   : > { %5339 = vst [vmem:[#allocation65_spill] sm:$0xff] %v3273_v56  ;;  %5340 = vst [vmem:[#allocation66_spill] sm:$0xff] %v3282_v7  ;;  %v1606_v56 = vrot.slane %v1553_v29, 1  ;;  %v1556_v7 = vmul.f32 %v3271_v23, %v3277_v37  ;;  %v5343_v29 = vrot.slane %v3249_v47, 1 }
  0xff   : > { %1413 = vrot.lane.b32.xlu1 %v1342_v48, %s2559_s21  ;;  %1411 = vrot.lane.b32.xlu0 %v1341_v12, %s2559_s21  ;;  %v2474_v13 = vld [vmem:[%s5135_s1 + $0x7] ss:$8 sm:$0xf] }
 0x100   : > { %v1602_v12 = vsel %vm1599_vm1, %v1600_v25, %v5343_v29  ;;  %v5345_v25 = vrot.slane %v3258_v34, 1  ;;  %v1608_v1 = vsel %vm1599_vm1, %v1606_v56, %v5346_v16  ;;  %v1615_v61 = vrot.slane %v1556_v7, 1 }
 0x101   : > { %v3303_v48 = vpop.permute.xlu1 %858  ;;  %v3320_v35 = vpop.permute.xlu0 %856  ;;  %v3347_v56 = vmul.f32 %v3318_v0, %v2712_v15  ;;  %v2475_v15 = vld [vmem:[%s5135_s1 + $0x7] ss:$8 sm:$0xf0] }
 0x102   : > { %5342 = vst [vmem:[#allocation67_spill] sm:$0xff] %v3303_v48  ;;  %5344 = vst [vmem:[#allocation68_spill] sm:$0xff] %v3320_v35  ;;  %v3323_v48 = vld [vmem:[%s2621_s24 + $0x30] sm:$0xfc]  ;;  %v1611_v29 = vsel %vm1599_vm1, %v1609_v19, %v5345_v25  ;;  %v1558_v35 = vmul.f32 %v3301_v26, %v3315_v43  ;;  %v1617_v53 = vsel %vm1599_vm1, %v1615_v61, %v5207_v46  ;;  %v5211_v19 = vrot.slane %v3338_v30, 1 }
 0x103   : > { %1642 = vrot.lane.b32.xlu1 %v1605_v2, %s2559_s21  ;;  %1640 = vrot.lane.b32.xlu0 %v1602_v12, %s2559_s21  ;;  %v1557_v16 = vmul.f32 %v3318_v0, %v3323_v48  ;;  %v1498_v12 = vld [vmem:[%s2621_s24 + $0x90] sm:$0x3] }
 0x104   : > { %v1621_v25 = vrot.slane %v1558_v35, 1  ;;  %v3371_v27 = vmul.f32 %v3212_v33, %v1498_v12  ;;  %v1768_v35 = vor.u32 %v2475_v15, %v2474_v13  ;;  %v5355_v13 = vrot.slane %v3249_v47, 1 }
 0x105   : > { %v3340_v2 = vpop.permute.xlu1 %1030  ;;  %v3349_v7 = vpop.permute.xlu0 %1028  ;;  %v1618_v54 = vrot.slane %v1557_v16, 1 }
 0x106   : > { %5347 = vst [vmem:[#allocation69_spill] sm:$0xff] %v3340_v2  ;;  %5348 = vst [vmem:[#allocation70_spill] sm:$0xff] %v3349_v7  ;;  %v1623_v46 = vsel %vm1599_vm1, %v1621_v25, %v5211_v19  ;;  %v5209_v33 = vrot.slane %v3371_v27, 1  ;;  %v1773_v12 = vrot.slane %v1768_v35, %v2595_v4  ;;  %v1777_v25 = vrot.slane %v1768_v35, %v2599_v6  ;;  %v3425_v19 = vld [vmem:[%s2621_s24 + $0xa0] sm:$0x3] }
 0x107   : > { %1646 = vrot.lane.b32.xlu1 %v1611_v29, %s2559_s21  ;;  %1644 = vrot.lane.b32.xlu0 %v1608_v1, %s2559_s21  ;;  %v5350_v29 = vrot.slane %v3312_v24, 1  ;;  %v5210_v1 = vrot.slane %v3347_v56, 1  ;;  %v1789_v47 = vrot.slane %v1768_v35, %v2616_v14 }
 0x109   : > { %v3364_v7 = vpop.permute.xlu1 %1034  ;;  %v1614_v2 = vsel %vm1599_vm1, %v1612_v39, %v5350_v29  ;;  %v3373_v61 = vpop.permute.xlu0 %1032  ;;  %v1620_v39 = vsel %vm1599_vm1, %v1618_v54, %v5210_v1  ;;  %v3407_v29 = vld [vmem:[%s2621_s24 + $0x98] sm:$0x3] }
 0x10a   : > { %5349 = vst [vmem:[#allocation71_spill] sm:$0xff] %v3364_v7  ;;  %5351 = vst [vmem:[#allocation72_spill] sm:$0xff] %v3373_v61 }
 0x10b   : > { %1650 = vrot.lane.b32.xlu1 %v1617_v53, %s2559_s21  ;;  %1648 = vrot.lane.b32.xlu0 %v1614_v2, %s2559_s21  ;;  %v1625_v53 = vsel %vm1599_vm1, %v5355_v13, %v5209_v33  ;;  %v1568_v13 = vmul.f32 %v3202_v38, %v3407_v29  ;;  %v3420_v33 = vld [vmem:[%s2621_s24 + $0xa8] sm:$0x3] }
 0x10c   : > { %v1570_v38 = vmul.f32 %v3219_v45, %v3420_v33 }
 0x10d   : > { %v3380_v7 = vpop.permute.xlu1 %1038  ;;  %v3386_v16 = vpop.permute.xlu0 %1036 }
 0x10e   : > { %5352 = vst [vmem:[#allocation73_spill] sm:$0xff] %v3380_v7  ;;  %5353 = vst [vmem:[#allocation74_spill] sm:$0xff] %v3386_v16  ;;  %v3458_v16 = vld [vmem:[%s2621_s24 + $0xc8] sm:$0x3] }
 0x10f   : > { %1654 = vrot.lane.b32.xlu1 %v1623_v46, %s2559_s21  ;;  %1652 = vrot.lane.b32.xlu0 %v1620_v39, %s2559_s21  ;;  %v1781_v46 = vrot.slane %v1768_v35, %v2593_v3 }
 0x111   : > { %v3391_v2 = vpop.permute.xlu1 %1042  ;;  %v3398_v54 = vpop.permute.xlu0 %1040 }
 0x112   : > { %5354 = vst [vmem:[#allocation75_spill] sm:$0xff] %v3391_v2  ;;  %5356 = vst [vmem:[#allocation76_spill] sm:$0xff] %v3398_v54  ;;  %v3443_v54 = vld [vmem:[%s2621_s24 + $0xb0] sm:$0x3] }
 0x113   : > { %1802 = vrot.lane.b32.xlu1 %v1773_v12, %s2559_s21  ;;  %1656 = vrot.lane.b32.xlu0 %v1625_v53, %s2559_s21  ;;  %v1785_v12 = vrot.slane %v1768_v35, %v2597_v5 }
 0x115   : > { %v3404_v15 = vpop.permute.xlu1 %1046  ;;  %v3409_v39 = vpop.permute.xlu0 %1044 }
 0x116   : > { %5357 = vst [vmem:[#allocation77_spill] sm:$0xff] %v3404_v15  ;;  %5358 = vst [vmem:[#allocation78_spill] sm:$0xff] %v3409_v39  ;;  %v1626_v39 = vrot.slane %v1568_v13, 1  ;;  %v3438_v15 = vld [vmem:[%s2621_s24 + $0xb8] sm:$0x3]  ;;  %v1801_v13 = vrot.slane %v1768_v35, %v2624_v17 }
 0x117   : > { %1806 = vrot.lane.b32.xlu1 %v1781_v46, %s2559_s21  ;;  %1804 = vrot.lane.b32.xlu0 %v1777_v25, %s2559_s21  ;;  %v1797_v46 = vrot.slane %v1768_v35, %v2626_v18  ;;  %v1793_v25 = vrot.slane %v1768_v35, %v2610_v11 }
 0x119   : > { %v3417_v53 = vpop.permute.xlu1 %1050  ;;  %v3422_v1 = vpop.permute.xlu0 %1048 }
 0x11a   : > { %5359 = vst [vmem:[#allocation79_spill] sm:$0xff] %v3417_v53  ;;  %5360 = vst [vmem:[#allocation80_spill] sm:$0xff] %v3422_v1  ;;  %v1569_v1 = vmul.f32 %v3222_v52, %v3425_v19  ;;  %v1572_v52 = vmul.f32 %v3271_v23, %v3438_v15 }
 0x11b   : > { %1810 = vrot.lane.b32.xlu1 %v1789_v47, %s2559_s21  ;;  %1808 = vrot.lane.b32.xlu0 %v1785_v12, %s2559_s21  ;;  %v5363_v12 = vrot.slane %v3231_v44, 1  ;;  %v5366_v44 = vrot.slane %v3258_v34, 1  ;;  %v5370_v34 = vrot.slane %v3298_v40, 1  ;;  %v5374_v40 = vrot.slane %v3338_v30, 1 }
 0x11c   : > { %v1628_v7 = vrot.slane %v1569_v1, 1  ;;  %v1634_v35 = vrot.slane %v1572_v52, 1  ;;  %v3472_v1 = vmul.f32 %v3301_v26, %v3458_v16 }
 0x11d   : > { %v3433_v53 = vpop.permute.xlu1 %1054  ;;  %v3440_v47 = vpop.permute.xlu0 %1052  ;;  %v1627_v45 = vsel %vm1599_vm1, %v5363_v12, %v1626_v39 }
 0x11e   : > { %5361 = vst [vmem:[#allocation81_spill] sm:$0xff] %v3433_v53  ;;  %5362 = vst [vmem:[#allocation82_spill] sm:$0xff] %v3440_v47  ;;  %v1630_v53 = vrot.slane %v1570_v38, 1  ;;  %v1571_v47 = vmul.f32 %v3280_v57, %v3443_v54  ;;  %v5368_v38 = vrot.slane %v3264_v49, 1  ;;  %v1635_v26 = vsel %vm1599_vm1, %v5370_v34, %v1634_v35 }
 0x11f   : > { %1814 = vrot.lane.b32.xlu1 %v1797_v46, %s2559_s21  ;;  %1812 = vrot.lane.b32.xlu0 %v1793_v25, %s2559_s21  ;;  %v3463_v25 = vld [vmem:[%s2621_s24 + $0xc0] sm:$0x3]  ;;  %v1638_v52 = vrot.slane %v3472_v1, 1  ;;  %v5376_v1 = vrot.slane %v3347_v56, 1 }
 0x120   : > { %v1631_v23 = vsel %vm1599_vm1, %v5366_v44, %v1630_v53  ;;  %v1629_v12 = vsel %vm1599_vm1, %v5368_v38, %v1628_v7  ;;  %v2477_v34 = vld [vmem:[%s5135_s1 + $0x40] ss:$8 sm:$0xf0] }
 0x121   : > { %v3453_v2 = vpop.permute.xlu1 %1058  ;;  %v3460_v46 = vpop.permute.xlu0 %1056 }
 0x122   : > { %5364 = vst [vmem:[#allocation83_spill] sm:$0xff] %v3453_v2  ;;  %5365 = vst [vmem:[#allocation84_spill] sm:$0xff] %v3460_v46  ;;  %v1632_v2 = vrot.slane %v1571_v47, 1  ;;  %v5372_v47 = vrot.slane %v3312_v24, 1 }
 0x123   : > { %1658 = vrot.lane.b32.xlu1 %v1627_v45, %s2559_s21  ;;  %1816 = vrot.lane.b32.xlu0 %v1801_v13, %s2559_s21  ;;  %v3481_v45 = vmul.f32 %v3318_v0, %v3463_v25 }
 0x124   : > { %v1633_v44 = vsel %vm1599_vm1, %v5372_v47, %v1632_v2 }
 0x125   : > { %v3474_v57 = vpop.permute.xlu1 %1062  ;;  %v3483_v13 = vpop.permute.xlu0 %1060  ;;  %v1636_v0 = vrot.slane %v3481_v45, 1  ;;  %v2476_v45 = vld [vmem:[%s5135_s1 + $0x40] ss:$8 sm:$0xf] }
 0x126   : > { %5367 = vst [vmem:[#allocation85_spill] sm:$0xff] %v3474_v57  ;;  %5369 = vst [vmem:[#allocation86_spill] sm:$0xff] %v3483_v13  ;;  %v1990_v30 = vor.u32 %v2477_v34, %v2476_v45 }
 0x127   : > { %1662 = vrot.lane.b32.xlu1 %v1631_v23, %s2559_s21  ;;  %1660 = vrot.lane.b32.xlu0 %v1629_v12, %s2559_s21  ;;  %v1639_v23 = vsel %vm1599_vm1, %v5374_v40, %v1638_v52  ;;  %v1637_v24 = vsel %vm1599_vm1, %v5376_v1, %v1636_v0 }
 0x128   : > { %v3528_v40 = vrot.slane %v1990_v30, %v2599_v6  ;;  %v3539_v45 = vrot.slane %v1990_v30, %v2597_v5  ;;  %v3599_v57 = vrot.slane %v1990_v30, %v2616_v14 }
 0x129   : > { %v3491_v49 = vpop.permute.xlu1 %1066  ;;  %v3497_v38 = vpop.permute.xlu0 %1064 }
 0x12a   : > { %5371 = vst [vmem:[#allocation87_spill] sm:$0xff] %v3491_v49  ;;  %5373 = vst [vmem:[#allocation88_spill] sm:$0xff] %v3497_v38  ;;  %v2033_v6 = vmul.f32 %v3528_v40, %v3237_v41  ;;  %v2035_v41 = vmul.f32 %v3539_v45, %v3285_v55  ;;  %v3593_v49 = vadd.f32 %v2827_v60, %v2854_v10  ;;  %v1763_v55 = vld [vmem:[%s2621_s24 + $0x40] sm:$0xfc] }
 0x12b   : > { %1666 = vrot.lane.b32.xlu1 %v1635_v26, %s2559_s21  ;;  %1664 = vrot.lane.b32.xlu0 %v1633_v44, %s2559_s21  ;;  %v5380_v44 = vrot.slane %v3371_v27, 1  ;;  %v3548_v27 = vld [vmem:[%s2621_s24 + $0x58] sm:$0xff] }
 0x12c   : > { %5382 = vst [vmem:[#allocation94_spill] sm:$0xff] %v3548_v27  ;;  %v2089_v13 = vrot.slane %v2035_v41, 1  ;;  %v3637_v41 = vrot.slane %v1990_v30, %v2624_v17 }
 0x12d   : > { %v3504_v12 = vpop.permute.xlu1 %1070  ;;  %v3515_v26 = vpop.permute.xlu0 %1068 }
 0x12e   : > { %5375 = vst [vmem:[#allocation89_spill] sm:$0xff] %v3504_v12  ;;  %5377 = vst [vmem:[#allocation90_spill] sm:$0xff] %v3515_v26  ;;  %v3589_v26 = vrot.slane %v1990_v30, %v2610_v11  ;;  %v249_v11 = vsel %vm248_vm2, %v2827_v60, %v2833_v63 }
 0x12f   : > { %1670 = vrot.lane.b32.xlu1 %v1639_v23, %s2559_s21  ;;  %1668 = vrot.lane.b32.xlu0 %v1637_v24, %s2559_s21  ;;  %v3533_v23 = vrot.slane %v1990_v30, %v2595_v4  ;;  %v3552_v4 = vmul.f32 %v3548_v27, %v3528_v40 }
 0x131   : > { %v3519_v47 = vpop.permute.xlu1 %1074  ;;  %v3521_v56 = vpop.permute.xlu0 %1072  ;;  %v2032_v5 = vmul.f32 %v3533_v23, %v3209_v51  ;;  %v5391_v61 = vrot.slane %v3552_v4, 1 }
 0x132   : > { %5378 = vst [vmem:[#allocation91_spill] sm:$0xff] %v3519_v47  ;;  %5379 = vst [vmem:[#allocation92_spill] sm:$0xff] %v3521_v56  ;;  %v3580_v56 = vld [vmem:[%s2621_s24 + $0x60] sm:$0xff] }
 0x133   : > { %1674 = vrot.lane.b32.xlu1 %v1626_v39, %s2559_s21  ;;  %1672 = vrot.lane.b32.xlu0 %v5380_v44, %s2559_s21  ;;  %v3542_v39 = vrot.slane %v1990_v30, %v2593_v3  ;;  %v3571_v44 = vld [vmem:[%s2621_s24 + $0x68] sm:$0xff]  ;;  %5387 = vst [vmem:[#allocation99_spill] sm:$0xff] %v3580_v56 }
 0x134   : > { %5386 = vst [vmem:[#allocation98_spill] sm:$0xff] %v3571_v44  ;;  %v3575_v51 = vmul.f32 %v3571_v44, %v3539_v45 }
 0x135   : > { %v3530_v1 = vpop.permute.xlu1 %1190  ;;  %v3535_v24 = vpop.permute.xlu0 %1188  ;;  %v2034_v47 = vmul.f32 %v3542_v39, %v3234_v58  ;;  %v3584_v12 = vmul.f32 %v3580_v56, %v3542_v39  ;;  %v2080_v58 = vrot.slane %v2032_v5, 1  ;;  %v3616_v5 = vadd.f32 %v2827_v60, %v2976_v50  ;;  %v3630_v50 = vld [vmem:[%s2621_s24 + $0x78] sm:$0xff] }
 0x136   : > { %5381 = vst [vmem:[#allocation93_spill] sm:$0xff] %v3535_v24  ;;  %5392 = vst [vmem:[#allocation103_spill] sm:$0xff] %v3630_v50 }
 0x137   : > { %1678 = vrot.lane.b32.xlu1 %v1630_v53, %s2559_s21  ;;  %1676 = vrot.lane.b32.xlu0 %v1628_v7, %s2559_s21  ;;  %v3559_v53 = vld [vmem:[%s2621_s24 + $0x50] sm:$0xff]  ;;  %v2086_v46 = vrot.slane %v2034_v47, 1 }
 0x138   : > { %5384 = vst [vmem:[#allocation96_spill] sm:$0xff] %v3559_v53  ;;  %v3563_v3 = vmul.f32 %v3559_v53, %v3533_v23 }
 0x139   : > { %v3554_v34 = vpop.permute.xlu1 %1194  ;;  %v3565_v7 = vpop.permute.xlu0 %1192 }
 0x13a   : > { %5383 = vst [vmem:[#allocation95_spill] sm:$0xff] %v3554_v34  ;;  %5385 = vst [vmem:[#allocation97_spill] sm:$0xff] %v3565_v7  ;;  %v3672_v7 = vadd.f32 %v249_v11, %v2848_v22 }
 0x13b   : > { %1682 = vrot.lane.b32.xlu1 %v1634_v35, %s2559_s21  ;;  %1680 = vrot.lane.b32.xlu0 %v1632_v2, %s2559_s21  ;;  %v2083_v35 = vrot.slane %v2033_v6, 1  ;;  %v251_v2 = vsel %vm248_vm2, %v2825_v59, %v2831_v62  ;;  %v3608_v6 = vld [vmem:[%s2621_s24 + $0x48] sm:$0xff] }
 0x13c   : > { %5389 = vst [vmem:[#allocation101_spill] sm:$0xff] %v3608_v6  ;;  %v3612_v10 = vadd.f32 %v3608_v6, %v2827_v60  ;;  %v2037_v60 = vmul.f32 %v3589_v26, %v3323_v48  ;;  %v3658_v17 = vadd.f32 %v251_v2, %v2870_v20  ;;  %v5397_v20 = vrot.slane %v3575_v51, 1 }
 0x13d   : > { %v3595_v38 = vpop.permute.xlu1 %1198  ;;  %v3618_v14 = vpop.permute.xlu0 %1196  ;;  %v2085_v34 = vsel %vm1599_vm1, %v2083_v35, %v5391_v61  ;;  %v2036_v61 = vmul.f32 %v3599_v57, %v3277_v37  ;;  %v3647_v35 = vld [vmem:[%s2621_s24 + $0x70] sm:$0xff]  ;;  %v250_v37 = vsel %vm248_vm2, %v2833_v63, %v2825_v59 }
 0x13e   : > { %5388 = vst [vmem:[#allocation100_spill] sm:$0xff] %v3595_v38  ;;  %5390 = vst [vmem:[#allocation102_spill] sm:$0xff] %v3618_v14  ;;  %v3651_v48 = vmul.f32 %v3647_v35, %v3599_v57  ;;  %v3655_v14 = vrot.slane %v1990_v30, %v2626_v18  ;;  %v252_v18 = vsel %vm248_vm2, %v2831_v62, %v2845_v31  ;;  %v5398_v30 = vrot.slane %v3584_v12, 1 }
 0x13f   : > { %1686 = vrot.lane.b32.xlu1 %v1638_v52, %s2559_s21  ;;  %1684 = vrot.lane.b32.xlu0 %v1636_v0, %s2559_s21  ;;  %v3634_v52 = vmul.f32 %v3630_v50, %v3589_v26  ;;  %v5394_v0 = vrot.slane %v3563_v3, 1  ;;  %5395 = vst [vmem:[#allocation105_spill] sm:$0xff] %v3647_v35  ;;  %v2095_v63 = vrot.slane %v2037_v60, 1  ;;  %v3689_v62 = vmul.f32 %v3637_v41, %v2799_v36 }
 0x140   : > { %v2088_v59 = vsel %vm1599_vm1, %v2086_v46, %v5398_v30  ;;  %v3708_v36 = vadd.f32 %v3548_v27, %v250_v37  ;;  %v3711_v60 = vadd.f32 %v249_v11, %v2970_v42  ;;  %v253_v30 = vsel %vm248_vm2, %v2845_v31, %v2843_v8 }
 0x141   : > { %v3639_v47 = vpop.permute.xlu1 %1202  ;;  %v2082_v38 = vsel %vm1599_vm1, %v2080_v58, %v5394_v0  ;;  %v3664_v58 = vadd.f32 %v251_v2, %v2986_v9  ;;  %v3669_v0 = vpop.permute.xlu0 %1200  ;;  %v2091_v9 = vsel %vm1599_vm1, %v2089_v13, %v5397_v20  ;;  %v5241_v22 = vrot.slane %v3634_v52, 1  ;;  %v3695_v20 = vld [vmem:[%s2621_s24 + $0x80] sm:$0xff] }
 0x142   : > { %5393 = vst [vmem:[#allocation104_spill] sm:$0xff] %v3639_v47  ;;  %v3661_v47 = vadd.f32 %v3580_v56, %v251_v2  ;;  %5396 = vst [vmem:[#allocation106_spill] sm:$0xff] %v3669_v0  ;;  %v2039_v2 = vmul.f32 %v3637_v41, %v1763_v55  ;;  %v2092_v0 = vrot.slane %v2036_v61, 1  ;;  %v2038_v13 = vmul.f32 %v3655_v14, %v3315_v43 }
 0x143   : > { %2122 = vrot.lane.b32.xlu1 %v2085_v34, %s2559_s21  ;;  %2120 = vrot.lane.b32.xlu0 %v2082_v38, %s2559_s21  ;;  %5399 = vst [vmem:[#allocation107_spill] sm:$0xff] %v3695_v20  ;;  %v3699_v46 = vmul.f32 %v3695_v20, %v3655_v14  ;;  %v3702_v38 = vadd.f32 %v250_v37, %v2873_v21 }
 0x144   : > { %v3705_v55 = vadd.f32 %v3559_v53, %v249_v11  ;;  %v3716_v43 = vadd.f32 %v250_v37, %v2989_v32  ;;  %v3722_v21 = vadd.f32 %v252_v18, %v2895_v28  ;;  %v2097_v32 = vsel %vm1599_vm1, %v2095_v63, %v5241_v22  ;;  %v5403_v63 = vld [vmem:[#allocation6_spill] sm:$0xff] }
 0x145   : > { %v1370_v34 = vpop.permute.xlu1 %1369  ;;  %v3713_v61 = vpop.permute.xlu0 %1367  ;;  %v2101_v42 = vrot.slane %v2039_v2, 1  ;;  %v3736_v31 = vmul.f32 %v3528_v40, %v3425_v19  ;;  %v5402_v37 = vrot.slane %v3651_v48, 1  ;;  %v3747_v2 = vadd.f32 %v253_v30, %v5403_v63  ;;  %v5404_v40 = vld [vmem:[#allocation26_spill] sm:$0xff] }
 0x146   : > { %5400 = vst [vmem:[#allocation108_spill] sm:$0xff] %v3713_v61  ;;  %v3726_v24 = vsel %vm248_vm2, %v3713_v61, %v1370_v34  ;;  %v2098_v61 = vrot.slane %v2038_v13, 1  ;;  %v3750_v22 = vadd.f32 %v3571_v44, %v252_v18  ;;  %v3753_v19 = vadd.f32 %v3647_v35, %v253_v30  ;;  %v5406_v13 = vld [vmem:[#allocation3_spill] sm:$0xff] }
 0x147   : > { %5401 = vst [vmem:[#allocation109_spill] sm:$0xff] %v3726_v24  ;;  %2126 = vrot.lane.b32.xlu1 %v2091_v9, %s2559_s21  ;;  %2124 = vrot.lane.b32.xlu0 %v2088_v59, %s2559_s21  ;;  %v2094_v24 = vsel %vm1599_vm1, %v2092_v0, %v5402_v37  ;;  %v3744_v59 = vmul.f32 %v3533_v23, %v3407_v29  ;;  %v5407_v9 = vld [vmem:[#allocation2_spill] sm:$0xff]  ;;  %v5412_v35 = vld [vmem:[#allocation47_spill] sm:$0xff] }
 0x148   : > { %v3756_v11 = vadd.f32 %v252_v18, %v5404_v40  ;;  %v254_v37 = vsel %vm248_vm2, %v2843_v8, %v5406_v13  ;;  %v255_v29 = vsel %vm248_vm2, %v5406_v13, %v5407_v9  ;;  %v5409_v18 = vld [vmem:[#allocation25_spill] sm:$0xff]  ;;  %v5411_v8 = vrot.slane %v3689_v62, 1 }
 0x149   : > { %v1374_v28 = vpop.permute.xlu1 %1373  ;;  %v1372_v0 = vpop.permute.xlu0 %1371  ;;  %v3772_v40 = vadd.f32 %v253_v30, %v5409_v18  ;;  %v3791_v18 = vmul.f32 %v3542_v39, %v3420_v33  ;;  %v5415_v13 = vld [vmem:[#allocation9_spill] sm:$0xff]  ;;  %v5417_v33 = vld [vmem:[#allocation30_spill] sm:$0xff] }
 0x14a   : > { %5405 = vst [vmem:[#allocation6_spill] sm:$0xff] %v3756_v11  ;;  %v3765_v23 = vsel %vm248_vm2, %v1370_v34, %v1372_v0  ;;  %v3768_v63 = vsel %vm248_vm2, %v1372_v0, %v1374_v28  ;;  %v2103_v11 = vsel %vm1599_vm1, %v2101_v42, %v5411_v8  ;;  %v3781_v34 = vmul.f32 %v3539_v45, %v3443_v54  ;;  %v5414_v42 = vld [vmem:[#allocation10_spill] sm:$0xff]  ;;  %v3799_v45 = vld [vmem:[%s2621_s24 + $0x88] sm:$0xff] }
 0x14b   : > { %5408 = vst [vmem:[#allocation26_spill] sm:$0xff] %v3768_v63  ;;  %2130 = vrot.lane.b32.xlu1 %v2097_v32, %s2559_s21  ;;  %5410 = vst [vmem:[#allocation3_spill] sm:$0xff] %v3772_v40  ;;  %2128 = vrot.lane.b32.xlu0 %v2094_v24, %s2559_s21  ;;  %v273_v0 = vadd.f32 %v5407_v9, %v5412_v35  ;;  %v5413_v32 = vrot.slane %v3699_v46, 1  ;;  %v271_v8 = vadd.f32 %v254_v37, %v5414_v42  ;;  %v5421_v24 = vld [vmem:[#allocation29_spill] sm:$0xff] }
 0x14c   : > { %v272_v40 = vadd.f32 %v255_v29, %v5415_v13  ;;  %v3796_v54 = vadd.f32 %v3630_v50, %v254_v37  ;;  %5416 = vst [vmem:[#allocation2_spill] sm:$0xff] %v3799_v45  ;;  %v3803_v35 = vadd.f32 %v3799_v45, %v5407_v9  ;;  %v3809_v39 = vadd.f32 %v254_v37, %v5417_v33  ;;  %v5430_v33 = vld [vmem:[#allocation8_spill] sm:$0xff] }
 0x14d   : > { %v1378_v63 = vpop.permute.xlu1 %1377  ;;  %v2100_v30 = vsel %vm1599_vm1, %v2098_v61, %v5413_v32  ;;  %v1376_v61 = vpop.permute.xlu0 %1375  ;;  %v3806_v32 = vadd.f32 %v3695_v20, %v255_v29  ;;  %v3819_v50 = vadd.f32 %v255_v29, %v5421_v24  ;;  %v5423_v45 = vrot.slane %v3736_v31, 1 }
 0x14e   : > { %5418 = vst [vmem:[#allocation25_spill] sm:$0xff] %v3809_v39  ;;  %v3812_v42 = vsel %vm248_vm2, %v1374_v28, %v1376_v61  ;;  %v3815_v13 = vsel %vm248_vm2, %v1376_v61, %v1378_v63  ;;  %v5424_v20 = vrot.slane %v3552_v4, 1  ;;  %v3830_v28 = vmul.f32 %v3589_v26, %v3463_v25  ;;  %v5425_v61 = vld [vmem:[#allocation4_spill] sm:$0xff]  ;;  %v5426_v39 = vld [vmem:[#allocation5_spill] sm:$0xff] }
 0x14f   : > { %5419 = vst [vmem:[#allocation47_spill] sm:$0xff] %v3812_v42  ;;  %5420 = vst [vmem:[#allocation10_spill] sm:$0xff] %v3815_v13  ;;  %2134 = vrot.lane.b32.xlu1 %v2103_v11, %s2559_s21  ;;  %2132 = vrot.lane.b32.xlu0 %v2100_v30, %s2559_s21  ;;  %v449_v11 = vsel %vm248_vm2, %v5426_v39, %v5425_v61  ;;  %v5427_v30 = vrot.slane %v3744_v59, 1  ;;  %v5428_v24 = vrot.slane %v3563_v3, 1  ;;  %v3848_v25 = vld [vmem:[%s2621_s24 + $0xd0] sm:$0x3] }
 0x150   : > { %5422 = vst [vmem:[#allocation9_spill] sm:$0xff] %v3819_v50  ;;  %v2107_v37 = vsel %vm1599_vm1, %v5424_v20, %v5423_v45  ;;  %v3845_v45 = vmul.f32 %v3599_v57, %v3438_v15  ;;  %5429 = vst [vmem:[#allocation30_spill] sm:$0xff] %v3848_v25  ;;  %v3852_v26 = vadd.f32 %v5426_v39, %v3593_v49  ;;  %v5431_v13 = vld [vmem:[#allocation7_spill] sm:$0xff]  ;;  %v5434_v57 = vld [vmem:[#allocation12_spill] sm:$0xff] }
 0x151   : > { %v3835_v29 = vpop.permute.xlu1 %1381  ;;  %v2105_v4 = vsel %vm1599_vm1, %v5428_v24, %v5427_v30  ;;  %v450_v50 = vsel %vm248_vm2, %v5425_v61, %v5430_v33  ;;  %v451_v3 = vsel %vm248_vm2, %v5430_v33, %v5431_v13  ;;  %v5432_v30 = vld [vmem:[#allocation62_spill] sm:$0xff]  ;;  %v1380_v15 = vpop.permute.xlu0 %1379  ;;  %v452_v20 = vsel %vm248_vm2, %v5431_v13, %v5434_v57  ;;  %v5435_v42 = vld [vmem:[#allocation11_spill] sm:$0xff] }
 0x152   : > { %v3862_v24 = vadd.f32 %v5407_v9, %v5432_v30  ;;  %v453_v49 = vsel %vm248_vm2, %v5434_v57, %v5435_v42  ;;  %v3871_v39 = vsel %vm248_vm2, %v1378_v63, %v1380_v15  ;;  %v3875_v61 = vsel %vm248_vm2, %v1380_v15, %v3835_v29 }
 0x153   : > { %5436 = vst [vmem:[#allocation4_spill] sm:$0xff] %v3875_v61  ;;  %2138 = vrot.lane.b32.xlu1 %v2107_v37, %s2559_s21  ;;  %v3879_v9 = vadd.f32 %v449_v11, %v3672_v7  ;;  %2136 = vrot.lane.b32.xlu0 %v2105_v4, %s2559_s21  ;;  %v5437_v13 = vrot.slane %v3781_v34, 1  ;;  %v5438_v33 = vrot.slane %v3575_v51, 1  ;;  %v3890_v57 = vmul.f32 %v3637_v41, %v3848_v25  ;;  %v5451_v25 = vld [vmem:[#allocation20_spill] sm:$0xff] }
 0x154   : > { %5433 = vst [vmem:[#allocation29_spill] sm:$0xff] %v3862_v24  ;;  %v3893_v15 = vadd.f32 %v450_v50, %v3702_v38  ;;  %v5439_v7 = vrot.slane %v3791_v18, 1  ;;  %v5440_v11 = vrot.slane %v3584_v12, 1  ;;  %v3909_v41 = vadd.f32 %v452_v20, %v3722_v21  ;;  %v5441_v38 = vld [vmem:[#allocation13_spill] sm:$0xff] }
 0x155   : > { %v2111_v30 = vsel %vm1599_vm1, %v5438_v33, %v5437_v13  ;;  %v1386_v37 = vpop.permute.xlu1 %1385  ;;  %v3903_v13 = vmul.f32 %v3655_v14, %v3458_v16  ;;  %v3906_v33 = vadd.f32 %v451_v3, %v3658_v17  ;;  %v3912_v50 = vadd.f32 %v453_v49, %v3747_v2  ;;  %v3917_v12 = vpop.permute.xlu0 %1383  ;;  %v5444_v14 = vld [vmem:[#allocation15_spill] sm:$0xff]  ;;  %v5445_v17 = vld [vmem:[#allocation16_spill] sm:$0xff]  ;;  %v5448_v3 = vld [vmem:[#allocation17_spill] sm:$0xff] }
 0x156   : > { %v2109_v4 = vsel %vm1599_vm1, %v5440_v11, %v5439_v7  ;;  %v3915_v63 = vadd.f32 %v5441_v38, %v273_v0  ;;  %5442 = vst [vmem:[#allocation5_spill] sm:$0xff] %v3917_v12  ;;  %v5443_v7 = vld [vmem:[#allocation14_spill] sm:$0xff]  ;;  %v456_v21 = vsel %vm248_vm2, %v5445_v17, %v5444_v14  ;;  %v3930_v2 = vsel %vm248_vm2, %v3917_v12, %v1386_v37 }
 0x157   : > { %v454_v11 = vsel %vm248_vm2, %v5435_v42, %v5443_v7  ;;  %v455_v16 = vsel %vm248_vm2, %v5443_v7, %v5441_v38  ;;  %5446 = vst [vmem:[#allocation8_spill] sm:$0xff] %v3930_v2  ;;  %2142 = vrot.lane.b32.xlu1 %v2111_v30, %s2559_s21  ;;  %v5447_v0 = vld [vmem:[#allocation18_spill] sm:$0xff]  ;;  %2140 = vrot.lane.b32.xlu0 %v2109_v4, %s2559_s21  ;;  %v5449_v49 = vrot.slane %v3830_v28, 1  ;;  %v5450_v38 = vrot.slane %v3634_v52, 1  ;;  %v5452_v2 = vld [vmem:[#allocation19_spill] sm:$0xff] }
 0x158   : > { %v457_v20 = vsel %vm248_vm2, %v5444_v14, %v5447_v0  ;;  %v458_v42 = vsel %vm248_vm2, %v5447_v0, %v5448_v3  ;;  %v459_v30 = vsel %vm248_vm2, %v5448_v3, %v5451_v25  ;;  %v460_v14 = vsel %vm248_vm2, %v5451_v25, %v5452_v2 }
 0x159   : > { %v2115_v7 = vsel %vm1599_vm1, %v5450_v38, %v5449_v49  ;;  %v1390_v12 = vpop.permute.xlu1 %1389  ;;  %v5453_v0 = vrot.slane %v3845_v45, 1  ;;  %v5454_v4 = vrot.slane %v3651_v48, 1  ;;  %v5252_v52 = vrot.slane %v3903_v13, 1  ;;  %v1388_v25 = vpop.permute.xlu0 %1387 }
 0x15a   : > { %v3958_v49 = vadd.f32 %v454_v11, %v271_v8  ;;  %v3960_v38 = vadd.f32 %v455_v16, %v272_v40  ;;  %v3964_v3 = vadd.f32 %v5445_v17, %v3612_v10  ;;  %v3967_v51 = vadd.f32 %v456_v21, %v3705_v55  ;;  %v5464_v16 = vld [vmem:[#allocation22_spill] sm:$0xff]  ;;  %v5465_v17 = vld [vmem:[#allocation23_spill] sm:$0xff]  ;;  %v5466_v21 = vld [vmem:[#allocation24_spill] sm:$0xff] }
 0x15b   : > { %v2113_v24 = vsel %vm1599_vm1, %v5454_v4, %v5453_v0  ;;  %v3970_v61 = vadd.f32 %v457_v20, %v3708_v36  ;;  %v3973_v48 = vadd.f32 %v458_v42, %v3661_v47  ;;  %v3976_v0 = vsel %vm248_vm2, %v1386_v37, %v1388_v25  ;;  %2146 = vrot.lane.b32.xlu1 %v2115_v7, %s2559_s21  ;;  %v5460_v36 = vld [vmem:[#allocation21_spill] sm:$0xff]  ;;  %v5468_v42 = vld [vmem:[#allocation28_spill] sm:$0xff] }
 0x15c   : > { %5456 = vst [vmem:[#allocation62_spill] sm:$0xff] %v3976_v0  ;;  %v3979_v40 = vsel %vm248_vm2, %v1388_v25, %v1390_v12  ;;  %v3983_v10 = vadd.f32 %v459_v30, %v3750_v22  ;;  %v3986_v55 = vadd.f32 %v460_v14, %v3753_v19  ;;  %v3990_v8 = vadd.f32 %v5460_v36, %v3803_v35  ;;  %v5470_v14 = vld [vmem:[#allocation35_spill] sm:$0xff]  ;;  %v5471_v4 = vld [vmem:[#allocation36_spill] sm:$0xff] }
 0x15d   : > { %5455 = vst [vmem:[#allocation7_spill] sm:$0xff] %v3973_v48  ;;  %5457 = vst [vmem:[#allocation12_spill] sm:$0xff] %v3979_v40  ;;  %2144 = vrot.lane.b32.xlu0 %v2113_v24, %s2559_s21  ;;  %v5462_v47 = vrot.slane %v3890_v57, 1  ;;  %v5463_v37 = vrot.slane %v3689_v62, 1  ;;  %v461_v22 = vsel %vm248_vm2, %v5452_v2, %v5464_v16  ;;  %v462_v19 = vsel %vm248_vm2, %v5464_v16, %v5460_v36  ;;  %v1394_v20 = vpop.permute.xlu1 %1393  ;;  %v5469_v2 = vld [vmem:[#allocation27_spill] sm:$0xff]  ;;  %v5472_v36 = vld [vmem:[#allocation38_spill] sm:$0xff] }
 0x15e   : > { %5458 = vst [vmem:[#allocation11_spill] sm:$0xff] %v3983_v10  ;;  %5459 = vst [vmem:[#allocation13_spill] sm:$0xff] %v3986_v55  ;;  %v463_v35 = vsel %vm248_vm2, %v5466_v21, %v5465_v17  ;;  %v5467_v24 = vrot.slane %v3699_v46, 1  ;;  %v464_v7 = vsel %vm248_vm2, %v5465_v17, %v5468_v42  ;;  %v465_v30 = vsel %vm248_vm2, %v5468_v42, %v5469_v2  ;;  %v5473_v17 = vld [vmem:[#allocation37_spill] sm:$0xff]  ;;  %v2505_v0 = vld [vmem:[%s2621_s24 + $0x28] sm:$0xff] }
 0x15f   : > { %5461 = vst [vmem:[#allocation14_spill] sm:$0xff] %v3990_v8  ;;  %v2119_v11 = vsel %vm1599_vm1, %v5463_v37, %v5462_v47  ;;  %v578_v25 = vsel %vm248_vm2, %v5471_v4, %v5470_v14  ;;  %v579_v46 = vsel %vm248_vm2, %v5470_v14, %v5472_v36  ;;  %v1392_v47 = vpop.permute.xlu0 %1391  ;;  %v2500_v37 = vld [vmem:[%s2621_s24] sm:$0xff]  ;;  %v4039_v14 = vadd.f32 %v461_v22, %v3796_v54  ;;  %v5478_v54 = vld [vmem:[#allocation40_spill] sm:$0xff]  ;;  %v5479_v22 = vld [vmem:[#allocation39_spill] sm:$0xff] }
 0x160   : > { %v2117_v62 = vsel %vm1599_vm1, %v5467_v24, %v5252_v52  ;;  %v4026_v16 = vmul.f32 %v2500_v37, %v5471_v4  ;;  %v580_v24 = vsel %vm248_vm2, %v5472_v36, %v5473_v17  ;;  %v4032_v42 = vsel %vm248_vm2, %v1390_v12, %v1392_v47  ;;  %2150 = vrot.lane.b32.xlu1 %v2119_v11, %s2559_s21  ;;  %v2501_v12 = vld [vmem:[%s2621_s24 + $0x8] sm:$0xff] }
 0x161   : > { %5474 = vst [vmem:[#allocation15_spill] sm:$0xff] %v4032_v42  ;;  %v4035_v52 = vsel %vm248_vm2, %v1392_v47, %v1394_v20  ;;  %5476 = vst [vmem:[#allocation18_spill] sm:$0xff] %v4039_v14  ;;  %v4042_v40 = vadd.f32 %v462_v19, %v3806_v32  ;;  %v4046_v37 = vadd.f32 %v5466_v21, %v3616_v5  ;;  %2148 = vrot.lane.b32.xlu0 %v2117_v62, %s2559_s21  ;;  %v2503_v21 = vld [vmem:[%s2621_s24 + $0x18] sm:$0xff]  ;;  %v5483_v62 = vld [vmem:[#allocation42_spill] sm:$0xff] }
 0x162   : > { %5475 = vst [vmem:[#allocation16_spill] sm:$0xff] %v4035_v52  ;;  %v4049_v36 = vadd.f32 %v463_v35, %v3711_v60  ;;  %v4053_v47 = vmul.f32 %v2501_v12, %v578_v25  ;;  %v2502_v52 = vld [vmem:[%s2621_s24 + $0x10] sm:$0xff]  ;;  %v581_v32 = vsel %vm248_vm2, %v5473_v17, %v5478_v54  ;;  %v4064_v5 = vsel %vm248_vm2, %v5478_v54, %v5479_v22  ;;  %v4066_v60 = vpop.permute.xlu1 %1397  ;;  %v5484_v42 = vld [vmem:[#allocation41_spill] sm:$0xff]  ;;  %v2504_v54 = vld [vmem:[%s2621_s24 + $0x20] sm:$0xff] }
 0x163   : > { %5477 = vst [vmem:[#allocation17_spill] sm:$0xff] %v4042_v40  ;;  %v4056_v11 = vmul.f32 %v2502_v52, %v579_v46  ;;  %5480 = vst [vmem:[#allocation20_spill] sm:$0xff] %v4066_v60  ;;  %v4069_v19 = vadd.f32 %v464_v7, %v3716_v43  ;;  %v4072_v52 = vadd.f32 %v465_v30, %v3664_v58  ;;  %v1396_v12 = vpop.permute.xlu0 %1395  ;;  %v5487_v30 = vrot.slane %v3736_v31, 1 }
 0x164   : > { %v4075_v35 = vmul.f32 %v2503_v21, %v580_v24  ;;  %v4080_v17 = vsel %vm248_vm2, %v5479_v22, %v5483_v62  ;;  %v4086_v43 = vsel %vm248_vm2, %v5483_v62, %v5484_v42  ;;  %v4089_v58 = vsel %vm248_vm2, %v1394_v20, %v1396_v12  ;;  %v5488_v22 = vld [vmem:[#allocation32_spill] sm:$0xff] }
 0x165   : > { %5481 = vst [vmem:[#allocation19_spill] sm:$0xff] %v4069_v19  ;;  %5482 = vst [vmem:[#allocation21_spill] sm:$0xff] %v4072_v52  ;;  %v4093_v7 = vsel %vm248_vm2, %v1396_v12, %v4066_v60  ;;  %2154 = vrot.lane.b32.xlu1 %v5487_v30, %s2559_s21  ;;  %v4101_v21 = vsel %vm248_vm2, %v5469_v2, %v5488_v22  ;;  %v4104_v62 = vmul.f32 %v2504_v54, %v581_v32  ;;  %v5490_v30 = vld [vmem:[#allocation31_spill] sm:$0xff]  ;;  %v2507_v60 = vld [vmem:[%s2621_s24 + $0x30] sm:$0xff] }
 0x166   : > { %5485 = vst [vmem:[#allocation22_spill] sm:$0xff] %v4089_v58  ;;  %5486 = vst [vmem:[#allocation23_spill] sm:$0xff] %v4093_v7  ;;  %v4108_v20 = vmul.f32 %v2505_v0, %v4064_v5  ;;  %v2506_v58 = vld [vmem:[%s2621_s24 + $0x40] sm:$0xff]  ;;  %v5489_v31 = vrot.slane %v3744_v59, 1  ;;  %v4120_v2 = vsel %vm248_vm2, %v5488_v22, %v5490_v30  ;;  %v4126_v0 = vmul.f32 %v2507_v60, %v4080_v17  ;;  %v1402_v52 = vpop.permute.xlu1 %1401 }
 0x167   : > { %v4112_v12 = vmul.f32 %v2506_v58, %v5484_v42  ;;  %v5491_v58 = vld [vmem:[#allocation34_spill] sm:$0xff]  ;;  %v4135_v59 = vmul.f32 %v3608_v6, %v5471_v4  ;;  %v4142_v7 = vpop.permute.xlu0 %1399  ;;  %v4145_v60 = vmul.f32 %v3559_v53, %v578_v25  ;;  %v4148_v40 = vmul.f32 %v3548_v27, %v579_v46 }
 0x168   : > { %2152 = vrot.lane.b32.xlu0 %v5489_v31, %s2559_s21  ;;  %v4131_v19 = vsel %vm248_vm2, %v5490_v30, %v5491_v58  ;;  %v2508_v31 = vld [vmem:[%s2621_s24 + $0x38] sm:$0xff]  ;;  %5492 = vst [vmem:[#allocation24_spill] sm:$0xff] %v4142_v7  ;;  %v5493_v30 = vrot.slane %v4026_v16, 7  ;;  %v4155_v4 = vsel %vm248_vm2, %v4142_v7, %v1402_v52  ;;  %v4161_v22 = vmul.f32 %v3580_v56, %v580_v24  ;;  %v5499_v7 = vld [vmem:[#allocation43_spill] sm:$0xff]  ;;  %v5500_v56 = vld [vmem:[#allocation44_spill] sm:$0xff] }
 0x169   : > { %v4140_v54 = vmul.f32 %v2508_v31, %v4086_v43  ;;  %5494 = vst [vmem:[#allocation28_spill] sm:$0xff] %v4155_v4  ;;  %v5495_v31 = vrot.slane %v3781_v34, 1  ;;  %v5497_v34 = vrot.slane %v4053_v47, 7  ;;  %v5502_v4 = vld [vmem:[#allocation46_spill] sm:$0xff] }
 0x16a   : > { %v684_v14 = vadd.f32 %v5493_v30, %v3852_v26  ;;  %v5496_v26 = vrot.slane %v3791_v18, 1  ;;  %v4170_v30 = vmul.f32 %v3571_v44, %v581_v32  ;;  %v1406_v46 = vpop.permute.xlu1 %1405  ;;  %v860_v18 = vsel %vm248_vm2, %v5500_v56, %v5499_v7 }
 0x16b   : > { %2158 = vrot.lane.b32.xlu1 %v5495_v31, %s2559_s21  ;;  %v685_v24 = vadd.f32 %v5497_v34, %v3879_v9  ;;  %v5498_v31 = vrot.slane %v4056_v11, 7  ;;  %v5501_v32 = vrot.slane %v4075_v35, 7  ;;  %v861_v44 = vsel %vm248_vm2, %v5499_v7, %v5502_v4  ;;  %v1404_v9 = vpop.permute.xlu0 %1403  ;;  %v5503_v34 = vld [vmem:[#allocation45_spill] sm:$0xff] }
 0x16c   : > { %2156 = vrot.lane.b32.xlu0 %v5496_v26, %s2559_s21  ;;  %v4196_v27 = vsel %vm248_vm2, %v1402_v52, %v1404_v9  ;;  %v4199_v6 = vsel %vm248_vm2, %v1404_v9, %v1406_v46  ;;  %v908_v7 = vadd.f32 %v5500_v56, %v684_v14  ;;  %v5510_v52 = vrot.slane %v4112_v12, 7 }
 0x16d   : > { %v686_v25 = vadd.f32 %v5498_v31, %v3893_v15  ;;  %v687_v26 = vadd.f32 %v5501_v32, %v3906_v33  ;;  %v862_v15 = vsel %vm248_vm2, %v5502_v4, %v5503_v34  ;;  %v5504_v31 = vld [vmem:[#allocation49_spill] sm:$0xff]  ;;  %5505 = vst [vmem:[#allocation27_spill] sm:$0xff] %v4196_v27  ;;  %5506 = vst [vmem:[#allocation35_spill] sm:$0xff] %v4199_v6  ;;  %v5507_v33 = vrot.slane %v3830_v28, 1  ;;  %v5518_v27 = vld [vmem:[#allocation70_spill] sm:$0xff] }
 0x16e   : > { %v863_v53 = vsel %vm248_vm2, %v5503_v34, %v5504_v31  ;;  %v5508_v32 = vrot.slane %v4104_v62, 7  ;;  %v5509_v34 = vrot.slane %v4108_v20, 7  ;;  %v692_v9 = vadd.f32 %v5510_v52, %v3915_v63  ;;  %v1410_v63 = vpop.permute.xlu1 %1409 }
 0x16f   : > { %2162 = vrot.lane.b32.xlu1 %v5507_v33, %s2559_s21  ;;  %v5511_v6 = vrot.slane %v3845_v45, 1  ;;  %v909_v28 = vadd.f32 %v860_v18, %v685_v24  ;;  %v5512_v33 = vld [vmem:[#allocation48_spill] sm:$0xff]  ;;  %v911_v52 = vadd.f32 %v862_v15, %v687_v26  ;;  %v1408_v18 = vpop.permute.xlu0 %1407  ;;  %v5523_v26 = vld [vmem:[#allocation97_spill] sm:$0xff] }
 0x170   : > { %v688_v4 = vadd.f32 %v5508_v32, %v3909_v41  ;;  %v689_v8 = vadd.f32 %v5509_v34, %v3912_v50  ;;  %v864_v56 = vsel %vm248_vm2, %v5504_v31, %v5512_v33  ;;  %v5513_v41 = vrot.slane %v4126_v0, 7  ;;  %v5514_v32 = vld [vmem:[#allocation93_spill] sm:$0xff] }
 0x171   : > { %2160 = vrot.lane.b32.xlu0 %v5511_v6, %s2559_s21  ;;  %v4226_v50 = vsel %vm248_vm2, %v5514_v32, %v3530_v1  ;;  %v910_v34 = vadd.f32 %v861_v44, %v686_v25  ;;  %v5516_v6 = vrot.slane %v4140_v54, 7  ;;  %v5517_v31 = vld [vmem:[#allocation69_spill] sm:$0xff]  ;;  %v4237_v10 = vsel %vm248_vm2, %v1406_v46, %v1408_v18 }
 0x172   : > { %v690_v14 = vadd.f32 %v5513_v41, %v3958_v49  ;;  %5515 = vst [vmem:[#allocation36_spill] sm:$0xff] %v4226_v50  ;;  %v912_v45 = vadd.f32 %v863_v53, %v688_v4  ;;  %v1076_v55 = vsel %vm248_vm2, %v5518_v27, %v5517_v31  ;;  %v2509_v49 = vld [vmem:[%s2621_s24] sm:$0xfe]  ;;  %5519 = vst [vmem:[#allocation38_spill] sm:$0xff] %v4237_v10  ;;  %v5521_v53 = vrot.slane %v3890_v57, 1 }
 0x173   : > { %v691_v24 = vadd.f32 %v5516_v6, %v3960_v38  ;;  %v1220_v41 = vmul.f32 %v2509_v49, %v5514_v32  ;;  %v4240_v48 = vsel %vm248_vm2, %v1408_v18, %v1410_v63  ;;  %v913_v44 = vadd.f32 %v864_v56, %v689_v8  ;;  %v5522_v38 = vld [vmem:[#allocation50_spill] sm:$0xff]  ;;  %v2510_v4 = vld [vmem:[%s2621_s24 + $0x8] sm:$0xfe]  ;;  %v4268_v49 = vpop.permute.xlu1 %1413 }
 0x174   : > { %5520 = vst [vmem:[#allocation37_spill] sm:$0xff] %v4240_v48  ;;  %2166 = vrot.lane.b32.xlu1 %v5521_v53, %s2559_s21  ;;  %v916_v25 = vadd.f32 %v5522_v38, %v692_v9  ;;  %v4249_v15 = vsel %vm248_vm2, %v3530_v1, %v5523_v26  ;;  %v1221_v46 = vmul.f32 %v2510_v4, %v4226_v50  ;;  %v5524_v6 = vrot.slane %v3903_v13, 1  ;;  %v5525_v18 = vld [vmem:[#allocation51_spill] sm:$0xff]  ;;  %v5529_v53 = vld [vmem:[#allocation72_spill] sm:$0xff]  ;;  %v5531_v48 = vld [vmem:[#allocation74_spill] sm:$0xff] }
 0x175   : > { %v865_v57 = vsel %vm248_vm2, %v5512_v33, %v5525_v18  ;;  %v866_v8 = vsel %vm248_vm2, %v5525_v18, %v5522_v38  ;;  %v1124_v9 = vadd.f32 %v5518_v27, %v908_v7  ;;  %v5526_v1 = vld [vmem:[#allocation95_spill] sm:$0xff]  ;;  %5528 = vst [vmem:[#allocation39_spill] sm:$0xff] %v4268_v49  ;;  %v1125_v13 = vadd.f32 %v1076_v55, %v909_v28  ;;  %v1412_v7 = vpop.permute.xlu0 %1411  ;;  %v2511_v38 = vld [vmem:[%s2621_s24 + $0x10] sm:$0xfe]  ;;  %v5534_v50 = vld [vmem:[#allocation102_spill] sm:$0xff] }
 0x176   : > { %2164 = vrot.lane.b32.xlu0 %v5524_v6, %s2559_s21  ;;  %v4266_v56 = vsel %vm248_vm2, %v5523_v26, %v5526_v1  ;;  %v1077_v4 = vsel %vm248_vm2, %v5517_v31, %v5529_v53  ;;  %v5530_v33 = vld [vmem:[#allocation71_spill] sm:$0xff]  ;;  %v1222_v26 = vmul.f32 %v2511_v38, %v4249_v15  ;;  %v4282_v10 = vsel %vm248_vm2, %v1410_v63, %v1412_v7  ;;  %v2512_v31 = vld [vmem:[%s2621_s24 + $0x18] sm:$0xfe]  ;;  %v5535_v63 = vld [vmem:[#allocation100_spill] sm:$0xff] }
 0x177   : > { %5527 = vst [vmem:[#allocation40_spill] sm:$0xff] %v4266_v56  ;;  %v1078_v6 = vsel %vm248_vm2, %v5529_v53, %v5530_v33  ;;  %v1079_v27 = vsel %vm248_vm2, %v5530_v33, %v5531_v48  ;;  %v1247_v18 = vadd.f32 %v1220_v41, %v1124_v9  ;;  %5532 = vst [vmem:[#allocation42_spill] sm:$0xff] %v4282_v10  ;;  %v5537_v10 = vld [vmem:[#allocation73_spill] sm:$0xff] }
 0x178   : > { %v4286_v55 = vsel %vm248_vm2, %v1412_v7, %v4268_v49  ;;  %v914_v28 = vadd.f32 %v865_v57, %v690_v14  ;;  %v1223_v53 = vmul.f32 %v2512_v31, %v4266_v56  ;;  %v4293_v33 = vsel %vm248_vm2, %v5526_v1, %v5534_v50  ;;  %v5536_v7 = vld [vmem:[#allocation108_spill] sm:$0xff]  ;;  %v1643_v14 = vpop.permute.xlu1 %1642  ;;  %v5538_v1 = vld [vmem:[#allocation109_spill] sm:$0xff] }
 0x179   : > { %5533 = vst [vmem:[#allocation41_spill] sm:$0xff] %v4286_v55  ;;  %v1248_v32 = vadd.f32 %v1221_v46, %v1125_v13  ;;  %v915_v41 = vadd.f32 %v866_v8, %v691_v24  ;;  %v1126_v9 = vadd.f32 %v1077_v4, %v910_v34  ;;  %v4298_v38 = vsel %vm248_vm2, %v5534_v50, %v5535_v63  ;;  %v1641_v46 = vpop.permute.xlu0 %1640  ;;  %v2513_v13 = vld [vmem:[%s2621_s24 + $0x20] sm:$0xfe]  ;;  %v2514_v4 = vld [vmem:[%s2621_s24 + $0x28] sm:$0xfe] }
 0x17a   : > { %v1463_v55 = vadd.f32 %v5536_v7, %v1247_v18  ;;  %v1127_v57 = vadd.f32 %v1078_v6, %v911_v52  ;;  %v1080_v31 = vsel %vm248_vm2, %v5531_v48, %v5537_v10  ;;  %v1128_v49 = vadd.f32 %v1079_v27, %v912_v45  ;;  %v5540_v6 = vld [vmem:[#allocation106_spill] sm:$0xff]  ;;  %v5542_v18 = vld [vmem:[#allocation75_spill] sm:$0xff]  ;;  %v5544_v7 = vld [vmem:[#allocation104_spill] sm:$0xff] }
 0x17b   : > { %v1464_v56 = vadd.f32 %v5538_v1, %v1248_v32  ;;  %v1224_v34 = vmul.f32 %v2513_v13, %v4293_v33  ;;  %v1249_v24 = vadd.f32 %v1222_v26, %v1126_v9  ;;  %v1688_v50 = vsel %vm248_vm2, %v1641_v46, %v1643_v14  ;;  %v5543_v9 = vld [vmem:[#allocation76_spill] sm:$0xff] }
 0x17c   : > { %v4308_v8 = vadd.f32 %v1641_v46, %v1463_v55  ;;  %v1225_v52 = vmul.f32 %v2514_v4, %v4298_v38  ;;  %v4315_v48 = vsel %vm248_vm2, %v5535_v63, %v5540_v6  ;;  %v1250_v32 = vadd.f32 %v1223_v53, %v1127_v57  ;;  %v1647_v46 = vpop.permute.xlu1 %1646  ;;  %v2515_v57 = vld [vmem:[%s2621_s24 + $0x40] sm:$0xfe]  ;;  %v2516_v13 = vld [vmem:[%s2621_s24 + $0x30] sm:$0xfe] }
 0x17d   : > { %v4317_v45 = vadd.f32 %v1688_v50, %v1464_v56  ;;  %v1129_v27 = vadd.f32 %v1080_v31, %v913_v44  ;;  %v1132_v26 = vadd.f32 %v5542_v18, %v916_v25  ;;  %v1081_v55 = vsel %vm248_vm2, %v5537_v10, %v5543_v9  ;;  %v5545_v44 = vld [vmem:[#allocation26_spill] sm:$0xff]  ;;  %v1645_v31 = vpop.permute.xlu0 %1644 }
 0x17e   : > { %5539 = vst [vmem:[#allocation32_spill] sm:$0xff] %v4308_v8  ;;  %v4326_v1 = vsel %vm248_vm2, %v5540_v6, %v5544_v7  ;;  %v1082_v53 = vsel %vm248_vm2, %v5543_v9, %v5542_v18  ;;  %v1465_v56 = vadd.f32 %v3765_v23, %v1249_v24  ;;  %v1466_v63 = vadd.f32 %v5545_v44, %v1250_v32  ;;  %v5548_v24 = vld [vmem:[#allocation105_spill] sm:$0xff]  ;;  %v5549_v44 = vld [vmem:[#allocation2_spill] sm:$0xff] }
 0x17f   : > { %5541 = vst [vmem:[#allocation31_spill] sm:$0xff] %v4317_v45  ;;  %v1228_v25 = vmul.f32 %v2515_v57, %v5544_v7  ;;  %v1226_v10 = vmul.f32 %v2516_v13, %v4315_v48  ;;  %v1251_v50 = vadd.f32 %v1224_v34, %v1128_v49  ;;  %v1689_v4 = vsel %vm248_vm2, %v1643_v14, %v1645_v31  ;;  %v2517_v45 = vld [vmem:[%s2621_s24 + $0x38] sm:$0xfe]  ;;  %v5550_v49 = vld [vmem:[#allocation103_spill] sm:$0xff] }
 0x180   : > { %v1690_v6 = vsel %vm248_vm2, %v1645_v31, %v1647_v46  ;;  %v1227_v8 = vmul.f32 %v2517_v45, %v4326_v1  ;;  %v1252_v18 = vadd.f32 %v1225_v52, %v1129_v27  ;;  %v4341_v9 = vadd.f32 %v1689_v4, %v1465_v56  ;;  %v1651_v31 = vpop.permute.xlu1 %1650  ;;  %v5551_v52 = vld [vmem:[#allocation47_spill] sm:$0xff]  ;;  %v5552_v56 = vld [vmem:[#allocation10_spill] sm:$0xff] }
 0x181   : > { %v4343_v23 = vadd.f32 %v1690_v6, %v1466_v63  ;;  %v4347_v32 = vmul.f32 %v5548_v24, %v4064_v5  ;;  %v4351_v57 = vmul.f32 %v5549_v44, %v5484_v42  ;;  %v4355_v14 = vmul.f32 %v5550_v49, %v4080_v17  ;;  %v1649_v4 = vpop.permute.xlu0 %1648  ;;  %v5553_v5 = vld [vmem:[#allocation107_spill] sm:$0xff] }
 0x182   : > { %5546 = vst [vmem:[#allocation34_spill] sm:$0xff] %v4341_v9  ;;  %v1130_v34 = vadd.f32 %v1081_v55, %v914_v28  ;;  %v1131_v45 = vadd.f32 %v1082_v53, %v915_v41  ;;  %v1467_v27 = vadd.f32 %v5551_v52, %v1251_v50  ;;  %v1468_v63 = vadd.f32 %v5552_v56, %v1252_v18  ;;  %v5556_v18 = vld [vmem:[#allocation4_spill] sm:$0xff]  ;;  %v5562_v56 = vld [vmem:[#allocation33_spill] sm:$0xff] }
 0x183   : > { %5547 = vst [vmem:[#allocation43_spill] sm:$0xff] %v4343_v23  ;;  %v1255_v13 = vadd.f32 %v1228_v25, %v1132_v26  ;;  %v4361_v6 = vmul.f32 %v5553_v5, %v4086_v43  ;;  %v1691_v42 = vsel %vm248_vm2, %v1647_v46, %v1649_v4  ;;  %v1692_v9 = vsel %vm248_vm2, %v1649_v4, %v1651_v31 }
 0x184   : > { %v1253_v23 = vadd.f32 %v1226_v10, %v1130_v34  ;;  %v1254_v28 = vadd.f32 %v1227_v8, %v1131_v45  ;;  %v4366_v55 = vadd.f32 %v1691_v42, %v1467_v27  ;;  %v4368_v41 = vadd.f32 %v1692_v9, %v1468_v63  ;;  %v1655_v10 = vpop.permute.xlu1 %1654  ;;  %v5561_v27 = vld [vmem:[#allocation3_spill] sm:$0xff] }
 0x185   : > { %v1471_v17 = vadd.f32 %v3835_v29, %v1255_v13  ;;  %v639_v53 = vrot.slane %v4135_v59, 7  ;;  %v641_v26 = vrot.slane %v4145_v60, 7  ;;  %v643_v25 = vrot.slane %v4148_v40, 7  ;;  %v1653_v34 = vpop.permute.xlu0 %1652  ;;  %v5564_v13 = vld [vmem:[#allocation29_spill] sm:$0xff] }
 0x186   : > { %5554 = vst [vmem:[#allocation44_spill] sm:$0xff] %v4366_v55  ;;  %5555 = vst [vmem:[#allocation46_spill] sm:$0xff] %v4368_v41  ;;  %v645_v43 = vrot.slane %v4161_v22, 7  ;;  %v647_v46 = vrot.slane %v4170_v30, 7  ;;  %v1469_v50 = vadd.f32 %v3871_v39, %v1253_v23  ;;  %v1470_v29 = vadd.f32 %v5556_v18, %v1254_v28  ;;  %v5560_v23 = vld [vmem:[#allocation6_spill] sm:$0xff] }
 0x187   : > { %v4377_v8 = vadd.f32 %v1655_v10, %v1471_v17  ;;  %v649_v9 = vrot.slane %v4347_v32, 7  ;;  %v655_v59 = vrot.slane %v4351_v57, 7  ;;  %v1693_v60 = vsel %vm248_vm2, %v1651_v31, %v1653_v34  ;;  %v2519_v41 = vld [vmem:[%s2621_s24 + $0x98] sm:$0x1] }
 0x188   : > { %v1694_v40 = vsel %vm248_vm2, %v1653_v34, %v1655_v10  ;;  %v651_v22 = vrot.slane %v4355_v14, 7  ;;  %v653_v45 = vrot.slane %v4361_v6, 7  ;;  %v4385_v30 = vadd.f32 %v1693_v60, %v1469_v50  ;;  %v4399_v63 = vpop.permute.xlu1 %1802  ;;  %v5565_v6 = vld [vmem:[#allocation25_spill] sm:$0xff] }
 0x189   : > { %5557 = vst [vmem:[#allocation45_spill] sm:$0xff] %v4377_v8  ;;  %v4387_v39 = vadd.f32 %v1694_v40, %v1470_v29  ;;  %v519_v52 = vadd.f32 %v4101_v21, %v5560_v23  ;;  %v520_v32 = vadd.f32 %v4120_v2, %v5561_v27  ;;  %v469_v57 = vsel %vm248_vm2, %v5491_v58, %v5562_v56  ;;  %v4411_v28 = vpop.permute.xlu0 %1656  ;;  %v5572_v34 = vld [vmem:[#allocation9_spill] sm:$0xff] }
 0x18a   : > { %5558 = vst [vmem:[#allocation49_spill] sm:$0xff] %v4385_v30  ;;  %v5563_v31 = vrot.slane %v4026_v16, 7  ;;  %v523_v4 = vadd.f32 %v5562_v56, %v5564_v13  ;;  %v521_v42 = vadd.f32 %v4131_v19, %v5565_v6  ;;  %v5566_v21 = vrot.slane %v4053_v47, 7  ;;  %v5577_v6 = vld [vmem:[#allocation13_spill] sm:$0xff]  ;;  %v5616_v30 = vld [vmem:[#allocation91_spill] sm:$0xff] }
 0x18b   : > { %5559 = vst [vmem:[#allocation48_spill] sm:$0xff] %v4387_v39  ;;  %v5567_v17 = vrot.slane %v4056_v11, 7  ;;  %v5568_v16 = vrot.slane %v4075_v35, 7  ;;  %v5569_v50 = vrot.slane %v4104_v62, 7  ;;  %v5570_v19 = vrot.slane %v4108_v20, 7  ;;  %v5615_v39 = vld [vmem:[#allocation92_spill] sm:$0xff] }
 0x18c   : > { %v640_v14 = vsel %vm376_vm0, %v5563_v31, %v639_v53  ;;  %v642_v2 = vsel %vm376_vm0, %v5566_v21, %v641_v26  ;;  %v5571_v29 = vrot.slane %v4112_v12, 7  ;;  %v522_v60 = vadd.f32 %v469_v57, %v5572_v34  ;;  %v4437_v13 = vpop.permute.xlu1 %1806  ;;  %v5575_v57 = vld [vmem:[#allocation7_spill] sm:$0xff]  ;;  %v5586_v34 = vld [vmem:[#allocation54_spill] sm:$0xff] }
 0x18d   : > { %v644_v58 = vsel %vm376_vm0, %v5567_v17, %v643_v25  ;;  %v646_v10 = vsel %vm376_vm0, %v5568_v16, %v645_v43  ;;  %v648_v18 = vsel %vm376_vm0, %v5569_v50, %v647_v46  ;;  %v650_v47 = vsel %vm376_vm0, %v5570_v19, %v649_v9  ;;  %v5578_v17 = vld [vmem:[#allocation14_spill] sm:$0xff]  ;;  %v4443_v16 = vpop.permute.xlu0 %1804  ;;  %v5584_v19 = vld [vmem:[#allocation53_spill] sm:$0xff] }
 0x18e   : > { %v656_v11 = vsel %vm376_vm0, %v5571_v29, %v655_v59  ;;  %v693_v40 = vadd.f32 %v640_v14, %v3964_v3  ;;  %v5573_v35 = vrot.slane %v4126_v0, 7  ;;  %v5574_v62 = vrot.slane %v4140_v54, 7  ;;  %v5576_v14 = vld [vmem:[#allocation11_spill] sm:$0xff]  ;;  %v5579_v50 = vld [vmem:[#allocation18_spill] sm:$0xff] }
 0x18f   : > { %v694_v20 = vadd.f32 %v642_v2, %v3967_v51  ;;  %v695_v56 = vadd.f32 %v644_v58, %v3970_v61  ;;  %v702_v12 = vadd.f32 %v639_v53, %v4046_v37  ;;  %v703_v31 = vadd.f32 %v641_v26, %v4049_v36  ;;  %v5580_v2 = vld [vmem:[#allocation17_spill] sm:$0xff]  ;;  %v5581_v58 = vld [vmem:[#allocation19_spill] sm:$0xff]  ;;  %v5583_v26 = vld [vmem:[#allocation52_spill] sm:$0xff] }
 0x190   : > { %v652_v23 = vsel %vm376_vm0, %v5573_v35, %v651_v22  ;;  %v654_v27 = vsel %vm376_vm0, %v5574_v62, %v653_v45  ;;  %v696_v3 = vadd.f32 %v646_v10, %v5575_v57  ;;  %v697_v0 = vadd.f32 %v648_v18, %v5576_v14  ;;  %v5582_v53 = vld [vmem:[#allocation21_spill] sm:$0xff]  ;;  %v5585_v29 = vld [vmem:[#allocation55_spill] sm:$0xff]  ;;  %v5588_v62 = vld [vmem:[#allocation56_spill] sm:$0xff]  ;;  %v4464_v57 = vpop.permute.xlu1 %1810 }
 0x191   : > { %v698_v21 = vadd.f32 %v650_v47, %v5577_v6  ;;  %v701_v54 = vadd.f32 %v656_v11, %v5578_v17  ;;  %v699_v51 = vadd.f32 %v652_v23, %v5579_v50  ;;  %v700_v61 = vadd.f32 %v654_v27, %v5580_v2  ;;  %v5587_v23 = vld [vmem:[#allocation57_spill] sm:$0xff]  ;;  %v5589_v6 = vld [vmem:[#allocation59_spill] sm:$0xff]  ;;  %v5590_v2 = vld [vmem:[#allocation58_spill] sm:$0xff] }
 0x192   : > { %v704_v37 = vadd.f32 %v643_v25, %v5581_v58  ;;  %v705_v36 = vadd.f32 %v645_v43, %v5582_v53  ;;  %v867_v10 = vsel %vm248_vm2, %v5584_v19, %v5583_v26  ;;  %v868_v18 = vsel %vm248_vm2, %v5583_v26, %v5585_v29  ;;  %v5591_v53 = vld [vmem:[#allocation60_spill] sm:$0xff] }
 0x193   : > { %v706_v47 = vadd.f32 %v647_v46, %v519_v52  ;;  %v707_v11 = vadd.f32 %v649_v9, %v520_v32  ;;  %v869_v35 = vsel %vm248_vm2, %v5585_v29, %v5586_v34  ;;  %v870_v25 = vsel %vm248_vm2, %v5586_v34, %v5587_v23  ;;  %v4470_v32 = vpop.permute.xlu0 %1808  ;;  %v5593_v29 = vld [vmem:[#allocation64_spill] sm:$0xff]  ;;  %v5596_v34 = vld [vmem:[#allocation65_spill] sm:$0xff] }
 0x194   : > { %v871_v43 = vsel %vm248_vm2, %v5587_v23, %v5588_v62  ;;  %v710_v27 = vadd.f32 %v655_v59, %v523_v4  ;;  %v917_v14 = vadd.f32 %v5584_v19, %v693_v40  ;;  %v872_v46 = vsel %vm248_vm2, %v5588_v62, %v5589_v6  ;;  %v5592_v59 = vld [vmem:[#allocation61_spill] sm:$0xff]  ;;  %v5597_v23 = vld [vmem:[#allocation68_spill] sm:$0xff]  ;;  %v5598_v62 = vld [vmem:[#allocation67_spill] sm:$0xff] }
 0x195   : > { %v708_v9 = vadd.f32 %v651_v22, %v521_v42  ;;  %v709_v52 = vadd.f32 %v653_v45, %v522_v60  ;;  %v918_v17 = vadd.f32 %v867_v10, %v694_v20  ;;  %v919_v50 = vadd.f32 %v868_v18, %v695_v56  ;;  %v5594_v60 = vld [vmem:[#allocation63_spill] sm:$0xff]  ;;  %v5595_v56 = vld [vmem:[#allocation66_spill] sm:$0xff]  ;;  %v4488_v18 = vpop.permute.xlu1 %1814 }
 0x196   : > { %v873_v58 = vsel %vm248_vm2, %v5589_v6, %v5590_v2  ;;  %v874_v4 = vsel %vm248_vm2, %v5592_v59, %v5591_v53  ;;  %v920_v26 = vadd.f32 %v869_v35, %v696_v3  ;;  %v921_v40 = vadd.f32 %v870_v25, %v697_v0  ;;  %v5599_v6 = vld [vmem:[#allocation77_spill] sm:$0xff] }
 0x197   : > { %v922_v19 = vadd.f32 %v871_v43, %v698_v21  ;;  %v875_v22 = vsel %vm248_vm2, %v5591_v53, %v5593_v29  ;;  %v925_v45 = vadd.f32 %v5590_v2, %v701_v54  ;;  %v923_v42 = vadd.f32 %v872_v46, %v699_v51  ;;  %v4494_v54 = vpop.permute.xlu0 %1812  ;;  %v5601_v2 = vld [vmem:[#allocation80_spill] sm:$0xff]  ;;  %v5602_v53 = vld [vmem:[#allocation79_spill] sm:$0xff] }
 0x198   : > { %v876_v20 = vsel %vm248_vm2, %v5593_v29, %v5594_v60  ;;  %v877_v10 = vsel %vm248_vm2, %v5594_v60, %v5595_v56  ;;  %v924_v3 = vadd.f32 %v873_v58, %v700_v61  ;;  %v926_v0 = vadd.f32 %v5592_v59, %v702_v12  ;;  %v5600_v61 = vld [vmem:[#allocation78_spill] sm:$0xff]  ;;  %v5604_v60 = vld [vmem:[#allocation81_spill] sm:$0xff] }
 0x199   : > { %v927_v21 = vadd.f32 %v874_v4, %v703_v31  ;;  %v878_v35 = vsel %vm248_vm2, %v5595_v56, %v5596_v34  ;;  %v928_v51 = vadd.f32 %v875_v22, %v704_v37  ;;  %v879_v25 = vsel %vm248_vm2, %v5596_v34, %v5597_v23  ;;  %v5603_v29 = vld [vmem:[#allocation82_spill] sm:$0xff] }
 0x19a   : > { %v880_v43 = vsel %vm248_vm2, %v5597_v23, %v5598_v62  ;;  %v1083_v12 = vsel %vm248_vm2, %v5600_v61, %v5599_v6  ;;  %v929_v31 = vadd.f32 %v876_v20, %v705_v36  ;;  %v930_v46 = vadd.f32 %v877_v10, %v706_v47  ;;  %v4518_v47 = vpop.permute.xlu1 %1658 }
 0x19b   : > { %v1084_v58 = vsel %vm248_vm2, %v5599_v6, %v5601_v2  ;;  %v1085_v37 = vsel %vm248_vm2, %v5601_v2, %v5602_v53  ;;  %v931_v59 = vadd.f32 %v878_v35, %v707_v11  ;;  %v934_v4 = vadd.f32 %v5598_v62, %v710_v27  ;;  %v4521_v23 = vpop.permute.xlu0 %1816  ;;  %v5605_v35 = vld [vmem:[#allocation84_spill] sm:$0xff]  ;;  %v5606_v6 = vld [vmem:[#allocation83_spill] sm:$0xff] }
 0x19c   : > { %v1086_v22 = vsel %vm248_vm2, %v5602_v53, %v5603_v29  ;;  %v1087_v36 = vsel %vm248_vm2, %v5603_v29, %v5604_v60  ;;  %v932_v20 = vadd.f32 %v879_v25, %v708_v9  ;;  %v933_v56 = vadd.f32 %v880_v43, %v709_v52  ;;  %v5607_v52 = vld [vmem:[#allocation85_spill] sm:$0xff]  ;;  %v5609_v25 = vld [vmem:[#allocation88_spill] sm:$0xff] }
 0x19d   : > { %v1133_v10 = vadd.f32 %v5600_v61, %v917_v14  ;;  %v1134_v34 = vadd.f32 %v1083_v12, %v918_v17  ;;  %v1135_v11 = vadd.f32 %v1084_v58, %v919_v50  ;;  %v1136_v27 = vadd.f32 %v1085_v37, %v920_v26  ;;  %v5608_v14 = vld [vmem:[#allocation86_spill] sm:$0xff]  ;;  %v5610_v26 = vld [vmem:[#allocation87_spill] sm:$0xff] }
 0x19e   : > { %v1088_v62 = vsel %vm248_vm2, %v5604_v60, %v5605_v35  ;;  %v1089_v2 = vsel %vm248_vm2, %v5605_v35, %v5606_v6  ;;  %v1137_v53 = vadd.f32 %v1086_v22, %v921_v40  ;;  %v1138_v29 = vadd.f32 %v1087_v36, %v922_v19  ;;  %v5611_v61 = vld [vmem:[#allocation90_spill] sm:$0xff]  ;;  %v5612_v40 = vld [vmem:[#allocation89_spill] sm:$0xff]  ;;  %v2518_v35 = vld [vmem:[%s2621_s24 + $0x90] sm:$0x1] }
 0x19f   : > { %v1141_v9 = vadd.f32 %v5606_v6, %v925_v45  ;;  %v1090_v17 = vsel %vm248_vm2, %v5608_v14, %v5607_v52  ;;  %v1091_v50 = vsel %vm248_vm2, %v5607_v52, %v5609_v25  ;;  %v1092_v43 = vsel %vm248_vm2, %v5609_v25, %v5610_v26  ;;  %v4545_v45 = vpop.permute.xlu1 %1662  ;;  %v5613_v22 = vld [vmem:[#allocation93_spill] sm:$0xff]  ;;  %v4551_v52 = vpop.permute.xlu0 %1660 }
 0x1a0   : > { %v1093_v12 = vsel %vm248_vm2, %v5610_v26, %v5611_v61  ;;  %v1094_v19 = vsel %vm248_vm2, %v5611_v61, %v5612_v40  ;;  %v1139_v58 = vadd.f32 %v1088_v62, %v923_v42  ;;  %v1140_v37 = vadd.f32 %v1089_v2, %v924_v3  ;;  %v5614_v60 = vld [vmem:[#allocation101_spill] sm:$0xff] }
 0x1a1   : > { %v1229_v36 = vmul.f32 %v5614_v60, %v5613_v22  ;;  %v1238_v6 = vmul.f32 %v2518_v35, %v5613_v22  ;;  %v1142_v25 = vadd.f32 %v5608_v14, %v926_v0  ;;  %v1143_v26 = vadd.f32 %v1090_v17, %v927_v21  ;;  %v5617_v35 = vld [vmem:[#allocation94_spill] sm:$0xff]  ;;  %v5618_v21 = vld [vmem:[#allocation36_spill] sm:$0xff] }
 0x1a2   : > { %v1095_v61 = vsel %vm248_vm2, %v5612_v40, %v5615_v39  ;;  %v1096_v42 = vsel %vm248_vm2, %v5615_v39, %v5616_v30  ;;  %v1144_v3 = vadd.f32 %v1091_v50, %v928_v51  ;;  %v1145_v62 = vadd.f32 %v1092_v43, %v929_v31  ;;  %v5619_v14 = vld [vmem:[#allocation96_spill] sm:$0xff]  ;;  %v2520_v43 = vld [vmem:[%s2621_s24 + $0xa0] sm:$0x1] }
 0x1a3   : > { %v1146_v2 = vadd.f32 %v1093_v12, %v930_v46  ;;  %v1147_v8 = vadd.f32 %v1094_v19, %v931_v59  ;;  %v1150_v22 = vadd.f32 %v5616_v30, %v934_v4  ;;  %v1231_v0 = vmul.f32 %v5617_v35, %v4249_v15  ;;  %v4567_v55 = vpop.permute.xlu1 %1666  ;;  %v4571_v59 = vpop.permute.xlu0 %1664  ;;  %v5620_v30 = vld [vmem:[#allocation40_spill] sm:$0xff]  ;;  %v5621_v4 = vld [vmem:[#allocation99_spill] sm:$0xff]  ;;  %v5622_v35 = vld [vmem:[#allocation98_spill] sm:$0xff] }
 0x1a4   : > { %v1230_v17 = vmul.f32 %v5619_v14, %v5618_v21  ;;  %v1239_v40 = vmul.f32 %v2519_v41, %v5618_v21  ;;  %v1148_v39 = vadd.f32 %v1095_v61, %v932_v20  ;;  %v1149_v51 = vadd.f32 %v1096_v42, %v933_v56  ;;  %v2521_v19 = vld [vmem:[%s2621_s24 + $0xa8] sm:$0x1] }
 0x1a5   : > { %v1256_v31 = vadd.f32 %v1229_v36, %v1133_v10  ;;  %v4569_v46 = vadd.f32 %v1238_v6, %v1142_v25  ;;  %v1232_v50 = vmul.f32 %v5621_v4, %v5620_v30  ;;  %v1240_v12 = vmul.f32 %v2520_v43, %v4249_v15  ;;  %v2522_v6 = vld [vmem:[%s2621_s24 + $0xb0] sm:$0x1]  ;;  %v2524_v4 = vld [vmem:[%s2621_s24 + $0xc0] sm:$0x1]  ;;  %v2525_v43 = vld [vmem:[%s2621_s24 + $0xc8] sm:$0x1] }
 0x1a6   : > { %v1241_v41 = vmul.f32 %v2521_v19, %v5620_v30  ;;  %v1233_v20 = vmul.f32 %v5622_v35, %v4293_v33  ;;  %v1234_v56 = vmul.f32 %v5548_v24, %v4298_v38  ;;  %v1235_v10 = vmul.f32 %v5550_v49, %v4315_v48  ;;  %v2523_v30 = vld [vmem:[%s2621_s24 + $0xb8] sm:$0x1]  ;;  %v2526_v19 = vld [vmem:[%s2621_s24 + $0xd0] sm:$0x1] }
 0x1a7   : > { %v1236_v36 = vmul.f32 %v5553_v5, %v4326_v1  ;;  %v1237_v15 = vmul.f32 %v5549_v44, %v5544_v7  ;;  %v1242_v25 = vmul.f32 %v2522_v6, %v4293_v33  ;;  %v1257_v61 = vadd.f32 %v1230_v17, %v1134_v34  ;;  %v4591_v14 = vpop.permute.xlu1 %1670  ;;  %v4601_v33 = vpop.permute.xlu0 %1668 }
 0x1a8   : > { %v1258_v42 = vadd.f32 %v1231_v0, %v1135_v11  ;;  %v1266_v21 = vadd.f32 %v1239_v40, %v1143_v26  ;;  %5623 = vst [vmem:[#allocation69_spill] sm:$0xff] %v4591_v14  ;;  %v1243_v24 = vmul.f32 %v2523_v30, %v4298_v38  ;;  %v1244_v49 = vmul.f32 %v2524_v4, %v4315_v48  ;;  %v2527_v14 = vld [vmem:[%s2621_s24] sm:$0xfc]  ;;  %v2528_v4 = vld [vmem:[%s2621_s24 + $0x90] sm:$0x3] }
 0x1a9   : > { %v1245_v5 = vmul.f32 %v2525_v43, %v4326_v1  ;;  %v1246_v35 = vmul.f32 %v2526_v19, %v5544_v7  ;;  %v1259_v34 = vadd.f32 %v1232_v50, %v1136_v27  ;;  %v1260_v11 = vadd.f32 %v1233_v20, %v1137_v53 }
 0x1aa   : > { %v1267_v26 = vadd.f32 %v1240_v12, %v1144_v3  ;;  %v1268_v0 = vadd.f32 %v1241_v41, %v1145_v62  ;;  %v1261_v17 = vadd.f32 %v1234_v56, %v1138_v29  ;;  %v1264_v40 = vadd.f32 %v1237_v15, %v1141_v9  ;;  %v5628_v62 = vld [vmem:[#allocation8_spill] sm:$0xff] }
 0x1ab   : > { %v1262_v38 = vadd.f32 %v1235_v10, %v1139_v58  ;;  %v1263_v6 = vadd.f32 %v1236_v36, %v1140_v37  ;;  %v1269_v30 = vadd.f32 %v1242_v25, %v1146_v2  ;;  %v1834_v48 = vmul.f32 %v2527_v14, %v4399_v63  ;;  %v4611_v43 = vpop.permute.xlu1 %1674  ;;  %v4619_v58 = vpop.permute.xlu0 %1672  ;;  %v5627_v37 = vld [vmem:[#allocation5_spill] sm:$0xff]  ;;  %v5629_v2 = vld [vmem:[#allocation62_spill] sm:$0xff]  ;;  %v5632_v41 = vld [vmem:[#allocation16_spill] sm:$0xff] }
 0x1ac   : > { %v1843_v1 = vmul.f32 %v5614_v60, %v4399_v63  ;;  %v4609_v7 = vmul.f32 %v2528_v4, %v4399_v63  ;;  %v1270_v27 = vadd.f32 %v1243_v24, %v1147_v8  ;;  %v4613_v53 = vadd.f32 %v1246_v35, %v1150_v22  ;;  %v5630_v22 = vld [vmem:[#allocation12_spill] sm:$0xff]  ;;  %v5636_v14 = vld [vmem:[#allocation23_spill] sm:$0xff] }
 0x1ad   : > { %v4615_v29 = vadd.f32 %v1244_v49, %v1148_v39  ;;  %v4617_v9 = vadd.f32 %v1245_v5, %v1149_v51  ;;  %v1472_v3 = vadd.f32 %v5627_v37, %v1256_v31  ;;  %v4623_v60 = vadd.f32 %v5628_v62, %v1257_v61  ;;  %v5631_v51 = vld [vmem:[#allocation15_spill] sm:$0xff]  ;;  %v5633_v56 = vld [vmem:[#allocation20_spill] sm:$0xff]  ;;  %v5635_v61 = vld [vmem:[#allocation22_spill] sm:$0xff] }
 0x1ae   : > { %5624 = vst [vmem:[#allocation70_spill] sm:$0xff] %v4613_v53  ;;  %v4626_v50 = vadd.f32 %v5629_v2, %v1258_v42  ;;  %v1818_v8 = vsel %vm248_vm2, %v4399_v63, %v4443_v16  ;;  %v4632_v39 = vadd.f32 %v5630_v22, %v1259_v34  ;;  %v4635_v12 = vadd.f32 %v5631_v51, %v1260_v11  ;;  %v2529_v49 = vld [vmem:[%s2621_s24 + $0x8] sm:$0xfc]  ;;  %v5637_v34 = vld [vmem:[#allocation24_spill] sm:$0xff]  ;;  %v5643_v22 = vld [vmem:[#allocation38_spill] sm:$0xff] }
 0x1af   : > { %5625 = vst [vmem:[#allocation50_spill] sm:$0xff] %v4615_v29  ;;  %5626 = vst [vmem:[#allocation97_spill] sm:$0xff] %v4617_v9  ;;  %v4638_v20 = vadd.f32 %v5632_v41, %v1261_v17  ;;  %v1819_v31 = vsel %vm248_vm2, %v4443_v16, %v4437_v13  ;;  %v4644_v10 = vadd.f32 %v5633_v56, %v1264_v40  ;;  %v1888_v36 = vrot.slane %v1834_v48, 1  ;;  %v4647_v25 = vpop.permute.xlu1 %1678  ;;  %v2530_v16 = vld [vmem:[%s2621_s24 + $0x50] sm:$0xff]  ;;  %v4659_v35 = vpop.permute.xlu0 %1676  ;;  %v5639_v4 = vld [vmem:[#allocation27_spill] sm:$0xff] }
 0x1b0   : > { %v1889_v63 = vrot.slane %v1843_v1, 1  ;;  %v5268_v15 = vrot.slane %v4609_v7, 1  ;;  %5634 = vst [vmem:[#allocation51_spill] sm:$0xff] %v4647_v25  ;;  %v4650_v42 = vadd.f32 %v5635_v61, %v1262_v38  ;;  %v4653_v24 = vadd.f32 %v5636_v14, %v1263_v6  ;;  %v5638_v17 = vld [vmem:[#allocation28_spill] sm:$0xff]  ;;  %v2532_v6 = vld [vmem:[%s2621_s24 + $0x58] sm:$0xff]  ;;  %v5641_v62 = vld [vmem:[#allocation35_spill] sm:$0xff] }
 0x1b1   : > { %v1835_v5 = vmul.f32 %v2529_v49, %v1818_v8  ;;  %v4657_v19 = vmul.f32 %v2530_v16, %v1818_v8  ;;  %v4663_v11 = vadd.f32 %v5637_v34, %v4569_v46  ;;  %v4666_v40 = vadd.f32 %v5638_v17, %v1266_v21  ;;  %v2531_v38 = vld [vmem:[%s2621_s24 + $0x10] sm:$0xfc]  ;;  %v2533_v21 = vld [vmem:[%s2621_s24 + $0x98] sm:$0x3]  ;;  %v2534_v56 = vld [vmem:[%s2621_s24 + $0xa0] sm:$0x3] }
 0x1b2   : > { %v1836_v48 = vmul.f32 %v2531_v38, %v1819_v31  ;;  %v4670_v1 = vmul.f32 %v2532_v6, %v1819_v31  ;;  %v4673_v37 = vadd.f32 %v5639_v4, %v1267_v26  ;;  %v4676_v2 = vadd.f32 %v5641_v62, %v1268_v0  ;;  %v5647_v16 = vld [vmem:[#allocation37_spill] sm:$0xff]  ;;  %v5649_v6 = vld [vmem:[#allocation32_spill] sm:$0xff] }
 0x1b3   : > { %v4679_v51 = vadd.f32 %v5643_v22, %v1269_v30  ;;  %v1820_v46 = vsel %vm248_vm2, %v4437_v13, %v4470_v32  ;;  %v4685_v41 = vmul.f32 %v2533_v21, %v1818_v8  ;;  %v4688_v61 = vmul.f32 %v2534_v56, %v1819_v31  ;;  %v4690_v26 = vpop.permute.xlu1 %1682  ;;  %v4701_v31 = vpop.permute.xlu0 %1680  ;;  %v2535_v17 = vld [vmem:[%s2621_s24 + $0x18] sm:$0xfc]  ;;  %v2537_v22 = vld [vmem:[%s2621_s24 + $0x20] sm:$0xfc]  ;;  %v2538_v56 = vld [vmem:[%s2621_s24 + $0x68] sm:$0xff] }
 0x1b4   : > { %5640 = vst [vmem:[#allocation95_spill] sm:$0xff] %v4673_v37  ;;  %5642 = vst [vmem:[#allocation72_spill] sm:$0xff] %v4676_v2  ;;  %v1890_v0 = vsel %vm1599_vm1, %v1888_v36, %v1889_v63  ;;  %v1916_v30 = vsel %vm1599_vm1, %v1889_v63, %v5268_v15  ;;  %v1745_v14 = vadd.f32 %v4411_v28, %v1472_v3  ;;  %v1891_v49 = vrot.slane %v1835_v5, 1  ;;  %v2536_v5 = vld [vmem:[%s2621_s24 + $0x60] sm:$0xff]  ;;  %v2541_v15 = vld [vmem:[%s2621_s24 + $0x28] sm:$0xfc] }
 0x1b5   : > { %5644 = vst [vmem:[#allocation71_spill] sm:$0xff] %v4679_v51  ;;  %5645 = vst [vmem:[#allocation74_spill] sm:$0xff] %v4690_v26  ;;  %v5269_v13 = vrot.slane %v4657_v19, 1  ;;  %v1821_v8 = vsel %vm248_vm2, %v4470_v32, %v4464_v57  ;;  %v4704_v34 = vadd.f32 %v5647_v16, %v1270_v27  ;;  %v1894_v36 = vrot.slane %v1836_v48, 1 }
 0x1b6   : > { %5646 = vst [vmem:[#allocation102_spill] sm:$0xff] %v4701_v31  ;;  %v5270_v63 = vrot.slane %v4670_v1, 1  ;;  %v1837_v3 = vmul.f32 %v2535_v17, %v1820_v46  ;;  %v4709_v38 = vmul.f32 %v2536_v5, %v1820_v46  ;;  %v1822_v32 = vsel %vm248_vm2, %v4464_v57, %v4494_v54  ;;  %v2539_v57 = vld [vmem:[%s2621_s24 + $0xa8] sm:$0x3] }
 0x1b7   : > { %5648 = vst [vmem:[#allocation100_spill] sm:$0xff] %v4704_v34  ;;  %v4715_v4 = vadd.f32 %v1890_v0, %v5649_v6  ;;  %v4717_v62 = vadd.f32 %v1916_v30, %v1745_v14  ;;  %v4722_v21 = vmul.f32 %v2537_v22, %v1821_v8  ;;  %v4725_v16 = vmul.f32 %v2538_v56, %v1821_v8  ;;  %v4727_v17 = vpop.permute.xlu1 %1686  ;;  %v2540_v30 = vld [vmem:[%s2621_s24 + $0xb0] sm:$0x3]  ;;  %v4738_v6 = vpop.permute.xlu0 %1684  ;;  %v2548_v34 = vld [vmem:[%s2621_s24 + $0x80] sm:$0xff] }
 0x1b8   : > { %5650 = vst [vmem:[#allocation108_spill] sm:$0xff] %v4727_v17  ;;  %v4730_v0 = vmul.f32 %v2539_v57, %v1820_v46  ;;  %v4733_v14 = vmul.f32 %v2540_v30, %v1821_v8  ;;  %v1823_v5 = vsel %vm248_vm2, %v4494_v54, %v4488_v18  ;;  %5651 = vst [vmem:[#allocation73_spill] sm:$0xff] %v4738_v6  ;;  %v1897_v56 = vrot.slane %v1837_v3, 1  ;;  %v2542_v30 = vld [vmem:[%s2621_s24 + $0x70] sm:$0xff]  ;;  %v2546_v54 = vld [vmem:[%s2621_s24 + $0xb8] sm:$0x3] }
 0x1b9   : > { %v1893_v22 = vsel %vm1599_vm1, %v1891_v49, %v5269_v13  ;;  %v1839_v46 = vmul.f32 %v2541_v15, %v1822_v32  ;;  %v1824_v8 = vsel %vm248_vm2, %v4488_v18, %v4521_v23  ;;  %v1896_v57 = vsel %vm1599_vm1, %v1894_v36, %v5270_v63  ;;  %v2543_v49 = vld [vmem:[%s2621_s24 + $0x40] sm:$0xfc]  ;;  %v2544_v13 = vld [vmem:[%s2621_s24 + $0x30] sm:$0xfc]  ;;  %v2545_v36 = vld [vmem:[%s2621_s24 + $0x78] sm:$0xff] }
 0x1ba   : > { %v4752_v48 = vmul.f32 %v2542_v30, %v1822_v32  ;;  %v1842_v3 = vmul.f32 %v2543_v49, %v4521_v23  ;;  %v4758_v15 = vmul.f32 %v5549_v44, %v4521_v23  ;;  %v1900_v18 = vrot.slane %v4722_v21, 1  ;;  %v2547_v17 = vld [vmem:[%s2621_s24 + $0x38] sm:$0xfc] }
 0x1bb   : > { %v1840_v27 = vmul.f32 %v2544_v13, %v1823_v5  ;;  %v4763_v63 = vmul.f32 %v2545_v36, %v1823_v5  ;;  %v4766_v9 = vmul.f32 %v2546_v54, %v1822_v32  ;;  %v4768_v30 = vpop.permute.xlu1 %2122  ;;  %v1841_v44 = vmul.f32 %v2547_v17, %v1824_v8  ;;  %v4776_v21 = vpop.permute.xlu0 %2120  ;;  %v2549_v36 = vld [vmem:[%s2621_s24 + $0xc0] sm:$0x3]  ;;  %v5652_v54 = vld [vmem:[#allocation31_spill] sm:$0xff] }
 0x1bc   : > { %v4774_v51 = vmul.f32 %v2548_v34, %v1824_v8  ;;  %v4780_v29 = vmul.f32 %v2549_v36, %v1823_v5  ;;  %v1903_v32 = vrot.slane %v1839_v46, 1  ;;  %v4783_v26 = vadd.f32 %v1893_v22, %v5652_v54  ;;  %v2550_v36 = vld [vmem:[%s2621_s24 + $0xc8] sm:$0x3]  ;;  %v5654_v54 = vld [vmem:[#allocation30_spill] sm:$0xff]  ;;  %s2480_s24 = sshll.u32 %s5701_s13, 7 }
 0x1bd   : > { %v1904_v6 = vrot.slane %v4752_v48, 1  ;;  %v1695_v17 = vsel %vm248_vm2, %v4411_v28, %v4518_v47  ;;  %v1912_v34 = vrot.slane %v1842_v3, 1  ;;  %v1913_v49 = vrot.slane %v4758_v15, 1  ;;  %s5097_s9 = scalar_lea.vmem %s5137_s3, %s2480_s24 }
 0x1be   : > { %v1906_v53 = vrot.slane %v1840_v27, 1  ;;  %v1907_v31 = vrot.slane %v4763_v63, 1  ;;  %v5653_v46 = vrot.slane %v4709_v38, 1  ;;  %v4798_v48 = vmul.f32 %v2550_v36, %v1824_v8  ;;  %v5658_v63 = vld [vmem:[#allocation44_spill] sm:$0xff] }
 0x1bf   : > { %v4792_v5 = vpop.permute.xlu1 %2126  ;;  %v4802_v28 = vmul.f32 %v4521_v23, %v5654_v54  ;;  %v1909_v3 = vrot.slane %v1841_v44, 1  ;;  %v1910_v27 = vrot.slane %v4774_v51, 1  ;;  %v2125_v15 = vpop.permute.xlu0 %2124  ;;  %v1746_v13 = vadd.f32 %v1695_v17, %v4623_v60 }
 0x1c0   : > { %v1899_v22 = vsel %vm1599_vm1, %v1897_v56, %v5653_v46  ;;  %v1696_v2 = vsel %vm248_vm2, %v4518_v47, %v4551_v52  ;;  %v5655_v56 = vld [vmem:[#allocation34_spill] sm:$0xff]  ;;  %v1697_v8 = vsel %vm248_vm2, %v4551_v52, %v4545_v45  ;;  %v5656_v23 = vrot.slane %v4725_v16, 1 }
 0x1c1   : > { %v1962_v46 = vadd.f32 %v1896_v57, %v5655_v56  ;;  %v1905_v51 = vsel %vm1599_vm1, %v1903_v32, %v1904_v6  ;;  %v1914_v36 = vsel %vm1599_vm1, %v1912_v34, %v1913_v49  ;;  %v1698_v60 = vsel %vm248_vm2, %v4545_v45, %v4571_v59  ;;  %v5657_v57 = vld [vmem:[#allocation43_spill] sm:$0xff]  ;;  %v5661_v32 = vld [vmem:[#allocation49_spill] sm:$0xff] }
 0x1c2   : > { %v1902_v44 = vsel %vm1599_vm1, %v1900_v18, %v5656_v23  ;;  %v1699_v47 = vsel %vm248_vm2, %v4571_v59, %v4567_v55  ;;  %v1963_v17 = vadd.f32 %v1899_v22, %v5657_v57  ;;  %v1908_v52 = vsel %vm1599_vm1, %v1906_v53, %v1907_v31  ;;  %v5659_v59 = vld [vmem:[#allocation46_spill] sm:$0xff]  ;;  %v5660_v57 = vld [vmem:[#allocation45_spill] sm:$0xff] }
 0x1c3   : > { %v4826_v54 = vpop.permute.xlu1 %2130  ;;  %v1747_v34 = vadd.f32 %v1696_v2, %v4626_v50  ;;  %v2129_v56 = vpop.permute.xlu0 %2128  ;;  %v1911_v23 = vsel %vm1599_vm1, %v1909_v3, %v1910_v27  ;;  %v1748_v45 = vadd.f32 %v1697_v8, %v4632_v39  ;;  %v4835_v37 = vadd.f32 %v1902_v44, %v5658_v63  ;;  %v5664_v8 = vld [vmem:[#allocation69_spill] sm:$0xff] }
 0x1c4   : > { %v4838_v22 = vadd.f32 %v1905_v51, %v5659_v59  ;;  %v4841_v25 = vadd.f32 %v1914_v36, %v5660_v57  ;;  %v1749_v53 = vadd.f32 %v1698_v60, %v4635_v12  ;;  %v1750_v18 = vadd.f32 %v1699_v47, %v4638_v20  ;;  %v5665_v20 = vld [vmem:[#allocation48_spill] sm:$0xff] }
 0x1c5   : > { %v4846_v50 = vadd.f32 %v1908_v52, %v5661_v32  ;;  %v5662_v2 = vrot.slane %v4685_v41, 1  ;;  %v5663_v39 = vrot.slane %v4657_v19, 1  ;;  %v1700_v63 = vsel %vm248_vm2, %v4567_v55, %v4601_v33 }
 0x1c6   : > { %v1701_v44 = vsel %vm248_vm2, %v4601_v33, %v5664_v8  ;;  %v4862_v51 = vadd.f32 %v1911_v23, %v5665_v20  ;;  %v5666_v36 = vrot.slane %v4688_v61, 1  ;;  %v5667_v60 = vrot.slane %v4670_v1, 1 }
 0x1c7   : > { %v1918_v3 = vsel %vm1599_vm1, %v5663_v39, %v5662_v2  ;;  %v4859_v12 = vpop.permute.xlu1 %2134  ;;  %v4869_v47 = vpop.permute.xlu0 %2132  ;;  %v5668_v55 = vrot.slane %v4730_v0, 1  ;;  %v5669_v32 = vrot.slane %v4709_v38, 1  ;;  %v5670_v57 = vrot.slane %v4733_v14, 1 }
 0x1c8   : > { %v1920_v19 = vsel %vm1599_vm1, %v5667_v60, %v5666_v36  ;;  %v1970_v52 = vadd.f32 %v1918_v3, %v1746_v13  ;;  %v5671_v23 = vrot.slane %v4725_v16, 1  ;;  %v1753_v1 = vadd.f32 %v5664_v8, %v4644_v10 }
 0x1c9   : > { %v1922_v33 = vsel %vm1599_vm1, %v5669_v32, %v5668_v55  ;;  %v1971_v59 = vadd.f32 %v1920_v19, %v1747_v34  ;;  %v2168_v13 = vsel %vm248_vm2, %v4776_v21, %v4768_v30  ;;  %v5672_v3 = vrot.slane %v4766_v9, 1 }
 0x1ca   : > { %v1924_v2 = vsel %vm1599_vm1, %v5671_v23, %v5670_v57  ;;  %v1972_v39 = vadd.f32 %v1922_v33, %v1748_v45  ;;  %v1751_v34 = vadd.f32 %v1700_v63, %v4650_v42  ;;  %v1752_v20 = vadd.f32 %v1701_v44, %v4653_v24 }
 0x1cb   : > { %v1926_v38 = vsel %vm1599_vm1, %v1904_v6, %v5672_v3  ;;  %v1973_v36 = vadd.f32 %v1924_v2, %v1749_v53  ;;  %v1702_v60 = vsel %vm248_vm2, %v4619_v58, %v4611_v43  ;;  %v2216_v10 = vadd.f32 %v4776_v21, %v4715_v4  ;;  %v2139_v8 = vpop.permute.xlu1 %2138  ;;  %v2137_v21 = vpop.permute.xlu0 %2136 }
 0x1cc   : > { %v1974_v16 = vadd.f32 %v1926_v38, %v1750_v18  ;;  %v5673_v45 = vrot.slane %v4802_v28, 1  ;;  %v5674_v6 = vrot.slane %v4780_v29, 1  ;;  %v1754_v24 = vadd.f32 %v4619_v58, %v4663_v11 }
 0x1cd   : > { %v2217_v18 = vadd.f32 %v2168_v13, %v4783_v26  ;;  %v2169_v53 = vsel %vm248_vm2, %v4768_v30, %v2125_v15  ;;  %v2170_v4 = vsel %vm248_vm2, %v2125_v15, %v4792_v5  ;;  %v2175_v63 = vsel %vm248_vm2, %v2137_v21, %v2139_v8 }
 0x1ce   : > { %v1932_v19 = vsel %vm1599_vm1, %v1913_v49, %v5673_v45  ;;  %v1928_v42 = vsel %vm1599_vm1, %v1907_v31, %v5674_v6  ;;  %v4911_v49 = vadd.f32 %v2137_v21, %v4717_v62  ;;  %v5675_v31 = vrot.slane %v4798_v48, 1 }
 0x1cf   : > { %v1977_v44 = vadd.f32 %v1932_v19, %v1753_v1  ;;  %v1755_v58 = vadd.f32 %v1702_v60, %v4666_v40  ;;  %v4917_v11 = vadd.f32 %v2175_v63, %v1970_v52  ;;  %v1975_v26 = vadd.f32 %v1928_v42, %v1751_v34  ;;  %v2143_v23 = vpop.permute.xlu1 %2142  ;;  %v2141_v13 = vpop.permute.xlu0 %2140 }
 0x1d0   : > { %v1930_v55 = vsel %vm1599_vm1, %v1910_v27, %v5675_v31  ;;  %v2270_v32 = vrot.slane %v2216_v10, 1  ;;  %v2218_v33 = vadd.f32 %v2169_v53, %v1962_v46  ;;  %v2219_v15 = vadd.f32 %v2170_v4, %v1963_v17  ;;  %v5678_v53 = vld [vmem:[#allocation51_spill] sm:$0xff] }
 0x1d1   : > { %v1976_v30 = vadd.f32 %v1930_v55, %v1752_v20  ;;  %v2271_v57 = vrot.slane %v4911_v49, 1  ;;  %v2273_v2 = vrot.slane %v2217_v18, 1  ;;  %v2172_v62 = vsel %vm248_vm2, %v2129_v56, %v4826_v54 }
 0x1d2   : > { %v2274_v1 = vrot.slane %v4917_v11, 1  ;;  %v5676_v27 = vrot.slane %v4609_v7, 1  ;;  %v2171_v52 = vsel %vm248_vm2, %v4792_v5, %v2129_v56  ;;  %v2176_v46 = vsel %vm248_vm2, %v2139_v8, %v2141_v13 }
 0x1d3   : > { %v2177_v17 = vsel %vm248_vm2, %v2141_v13, %v2143_v23  ;;  %v2272_v3 = vsel %vm1599_vm1, %v2270_v32, %v2271_v57  ;;  %v4934_v38 = vadd.f32 %v2176_v46, %v1971_v59  ;;  %v5677_v5 = vrot.slane %v4685_v41, 1  ;;  %v2145_v6 = vpop.permute.xlu0 %2144  ;;  %v5680_v13 = vld [vmem:[#allocation72_spill] sm:$0xff] }
 0x1d4   : > { %v4925_v40 = vadd.f32 %v5676_v27, %v1754_v24  ;;  %v4936_v34 = vadd.f32 %v2177_v17, %v1972_v39  ;;  %2315 = vrot.lane.b32.xlu0 %v2272_v3, %s2559_s21  ;;  %v2275_v7 = vsel %vm1599_vm1, %v2273_v2, %v2274_v1  ;;  %v1703_v20 = vsel %vm248_vm2, %v4611_v43, %v4659_v35  ;;  %v2147_v39 = vpop.permute.xlu1 %2146  ;;  %v5681_v27 = vld [vmem:[#allocation102_spill] sm:$0xff] }
 0x1d5   : > { %v1979_v56 = vadd.f32 %v5677_v5, %v1755_v58  ;;  %v2276_v60 = vrot.slane %v2218_v33, 1  ;;  %v2279_v10 = vrot.slane %v2219_v15, 1  ;;  %v2221_v59 = vadd.f32 %v2172_v62, %v4838_v22  ;;  %2317 = vrot.lane.b32.xlu1 %v2275_v7, %s2559_s21 }
 0x1d6   : > { %v2220_v8 = vadd.f32 %v2171_v52, %v4835_v37  ;;  %v2173_v45 = vsel %vm248_vm2, %v4826_v54, %v4869_v47  ;;  %v2277_v41 = vrot.slane %v4934_v38, 1  ;;  %v2280_v19 = vrot.slane %v4936_v34, 1 }
 0x1d7   : > { %v2224_v43 = vadd.f32 %v4859_v12, %v4841_v25  ;;  %v2174_v22 = vsel %vm248_vm2, %v4869_v47, %v4859_v12  ;;  %v2178_v42 = vsel %vm248_vm2, %v2143_v23, %v2145_v6  ;;  %v2179_v37 = vsel %vm248_vm2, %v2145_v6, %v2147_v39  ;;  %v5679_v47 = vld [vmem:[#allocation95_spill] sm:$0xff]  ;;  %v2149_v32 = vpop.permute.xlu0 %2148 }
 0x1d8   : > { %v4962_v24 = vadd.f32 %v2178_v42, %v1973_v36  ;;  %v4964_v18 = vadd.f32 %v2179_v37, %v1974_v16  ;;  %v2281_v54 = vsel %vm1599_vm1, %v2279_v10, %v2280_v19  ;;  %v2278_v25 = vsel %vm1599_vm1, %v2276_v60, %v2277_v41  ;;  %v2151_v16 = vpop.permute.xlu1 %2150  ;;  %v5682_v60 = vld [vmem:[#allocation70_spill] sm:$0xff]  ;;  %v5683_v10 = vld [vmem:[#allocation39_spill] sm:$0xff] }
 0x1d9   : > { %v1704_v12 = vsel %vm248_vm2, %v4659_v35, %v5678_v53  ;;  %v1756_v4 = vadd.f32 %v1703_v20, %v5679_v47  ;;  %v2285_v21 = vrot.slane %v2221_v59, 1  ;;  %v2222_v36 = vadd.f32 %v2173_v45, %v4846_v50  ;;  %2321 = vrot.lane.b32.xlu1 %v2281_v54, %s2559_s21  ;;  %2319 = vrot.lane.b32.xlu0 %v2278_v25, %s2559_s21 }
 0x1da   : > { %v2223_v63 = vadd.f32 %v2174_v22, %v4862_v51  ;;  %v2283_v31 = vrot.slane %v4962_v24, 1  ;;  %v2286_v55 = vrot.slane %v4964_v18, 1  ;;  %v4982_v58 = vadd.f32 %v2151_v16, %v1977_v44  ;;  %v5686_v22 = vld [vmem:[#allocation42_spill] sm:$0xff] }
 0x1db   : > { %v2282_v35 = vrot.slane %v2220_v8, 1  ;;  %v2294_v33 = vrot.slane %v2224_v43, 1  ;;  %v2180_v15 = vsel %vm248_vm2, %v2147_v39, %v2149_v32  ;;  %v2181_v50 = vsel %vm248_vm2, %v2149_v32, %v2151_v16  ;;  %v2153_v5 = vpop.permute.xlu0 %2152  ;;  %v5684_v39 = vld [vmem:[#allocation74_spill] sm:$0xff] }
 0x1dc   : > { %v2295_v23 = vrot.slane %v4982_v58, 1  ;;  %v4987_v2 = vadd.f32 %v2180_v15, %v1975_v26  ;;  %v4989_v62 = vadd.f32 %v2181_v50, %v1976_v30  ;;  %v2287_v51 = vsel %vm1599_vm1, %v2285_v21, %v2286_v55  ;;  %v2155_v17 = vpop.permute.xlu1 %2154  ;;  %v5685_v43 = vld [vmem:[#allocation50_spill] sm:$0xff]  ;;  %v5692_v15 = vld [vmem:[#allocation73_spill] sm:$0xff] }
 0x1dd   : > { %v1757_v44 = vadd.f32 %v1704_v12, %v5680_v13  ;;  %v1705_v52 = vsel %vm248_vm2, %v5678_v53, %v5681_v27  ;;  %v2288_v46 = vrot.slane %v2222_v36, 1  ;;  %2325 = vrot.lane.b32.xlu1 %v2287_v51, %s2559_s21  ;;  %v2284_v26 = vsel %vm1599_vm1, %v2282_v35, %v2283_v31  ;;  %v5687_v53 = vld [vmem:[#allocation71_spill] sm:$0xff]  ;;  %v5691_v35 = vld [vmem:[#allocation108_spill] sm:$0xff] }
 0x1de   : > { %v2291_v30 = vrot.slane %v2223_v63, 1  ;;  %v2289_v3 = vrot.slane %v4987_v2, 1  ;;  %v2292_v7 = vrot.slane %v4989_v62, 1  ;;  %2323 = vrot.lane.b32.xlu0 %v2284_v26, %s2559_s21  ;;  %v2296_v20 = vsel %vm1599_vm1, %v2294_v33, %v2295_v23  ;;  %v5690_v63 = vld [vmem:[#allocation100_spill] sm:$0xff] }
 0x1df   : > { %v1489_v59 = vadd.f32 %v5683_v10, %v5682_v60  ;;  %v1706_v8 = vsel %vm248_vm2, %v5681_v27, %v5684_v39  ;;  %v2182_v45 = vsel %vm248_vm2, %v2153_v5, %v2155_v17  ;;  %v2234_v6 = vadd.f32 %v2153_v5, %v4925_v40  ;;  %v2157_v13 = vpop.permute.xlu0 %2156  ;;  %v5693_v27 = vld [vmem:[#allocation97_spill] sm:$0xff] }
 0x1e0   : > { %v1487_v42 = vadd.f32 %v5686_v22, %v5685_v43  ;;  %v2235_v37 = vadd.f32 %v2182_v45, %v1979_v56  ;;  %v2293_v54 = vsel %vm1599_vm1, %v2291_v30, %v2292_v7  ;;  %v2290_v25 = vsel %vm1599_vm1, %v2288_v46, %v2289_v3  ;;  %v2159_v21 = vpop.permute.xlu1 %2158 }
 0x1e1   : > { %v1758_v12 = vadd.f32 %v1705_v52, %v5687_v53  ;;  %v2297_v47 = vrot.slane %v2234_v6, 1  ;;  %2329 = vrot.lane.b32.xlu1 %v2293_v54, %s2559_s21  ;;  %v5688_v40 = vrot.slane %v4688_v61, 1  ;;  %v5689_v16 = vrot.slane %v4730_v0, 1  ;;  %v5694_v52 = vld [vmem:[#allocation41_spill] sm:$0xff] }
 0x1e2   : > { %v1759_v32 = vadd.f32 %v1706_v8, %v5690_v63  ;;  %v1762_v33 = vadd.f32 %v5691_v35, %v1489_v59  ;;  %v1707_v50 = vsel %vm248_vm2, %v5684_v39, %v5692_v15  ;;  %v2299_v51 = vrot.slane %v2235_v37, 1  ;;  %2327 = vrot.lane.b32.xlu0 %v2290_v25, %s2559_s21 }
 0x1e3   : > { %v1980_v36 = vadd.f32 %v5688_v40, %v1756_v4  ;;  %v1981_v56 = vadd.f32 %v5689_v16, %v1757_v44  ;;  %v1708_v61 = vsel %vm248_vm2, %v5692_v15, %v5691_v35  ;;  %v2183_v4 = vsel %vm248_vm2, %v2155_v17, %v2157_v13  ;;  %v2161_v6 = vpop.permute.xlu0 %2160 }
 0x1e4   : > { %v2184_v0 = vsel %vm248_vm2, %v2157_v13, %v2159_v21  ;;  %v2298_v44 = vsel %vm1599_vm1, %v2271_v57, %v2297_v47  ;;  %v1488_v46 = vadd.f32 %v5694_v52, %v5693_v27  ;;  %v2300_v5 = vsel %vm1599_vm1, %v2274_v1, %v2299_v51  ;;  %v2163_v10 = vpop.permute.xlu1 %2162 }
 0x1e5   : > { %v2236_v26 = vadd.f32 %v2183_v4, %v1980_v36  ;;  %v2237_v30 = vadd.f32 %v2184_v0, %v1981_v56  ;;  %v1760_v60 = vadd.f32 %v1707_v50, %v1487_v42  ;;  %2333 = vrot.lane.b32.xlu1 %v2298_v44, %s2559_s21  ;;  %v5695_v17 = vrot.slane %v4733_v14, 1 }
 0x1e6   : > { %v1761_v39 = vadd.f32 %v1708_v61, %v1488_v46  ;;  %2331 = vrot.lane.b32.xlu0 %v2296_v20, %s2559_s21  ;;  %v5696_v57 = vrot.slane %v4766_v9, 1  ;;  %v2185_v11 = vsel %vm248_vm2, %v2159_v21, %v2161_v6  ;;  %v2186_v1 = vsel %vm248_vm2, %v2161_v6, %v2163_v10 }
 0x1e7   : > { %v1982_v59 = vadd.f32 %v5695_v17, %v1758_v12  ;;  %v2301_v49 = vrot.slane %v2236_v26, 1  ;;  %v2303_v8 = vrot.slane %v2237_v30, 1  ;;  %v5697_v43 = vrot.slane %v4802_v28, 1 }
 0x1e8   : > { %v1983_v45 = vadd.f32 %v5696_v57, %v1759_v32  ;;  %v2167_v9 = vpop.permute.xlu1 %2166  ;;  %v5698_v54 = vrot.slane %v4780_v29, 1  ;;  %v5699_v47 = vrot.slane %v4798_v48, 1  ;;  %v2165_v21 = vpop.permute.xlu0 %2164 }
 0x1e9   : > { %v1986_v22 = vadd.f32 %v5697_v43, %v1762_v33  ;;  %v2238_v42 = vadd.f32 %v2185_v11, %v1982_v59  ;;  %v2302_v14 = vsel %vm1599_vm1, %v2277_v41, %v2301_v49  ;;  %v2304_v20 = vsel %vm1599_vm1, %v2280_v19, %v2303_v8 }
 0x1ea   : > { %v2239_v37 = vadd.f32 %v2186_v1, %v1983_v45  ;;  %2337 = vrot.lane.b32.xlu1 %v2302_v14, %s2559_s21  ;;  %v1984_v25 = vadd.f32 %v5698_v54, %v1760_v60  ;;  %2335 = vrot.lane.b32.xlu0 %v2300_v5, %s2559_s21  ;;  %v1985_v38 = vadd.f32 %v5699_v47, %v1761_v39 }
 0x1eb   : > { %v2305_v53 = vrot.slane %v2238_v42, 1  ;;  %v2242_v28 = vadd.f32 %v2167_v9, %v1986_v22  ;;  %v2187_v41 = vsel %vm248_vm2, %v2163_v10, %v2165_v21  ;;  %v2188_v34 = vsel %vm248_vm2, %v2165_v21, %v2167_v9 }
 0x1ec   : > { %v2307_v12 = vrot.slane %v2239_v37, 1  ;;  %v2240_v40 = vadd.f32 %v2187_v41, %v1984_v25  ;;  %v2241_v36 = vadd.f32 %v2188_v34, %v1985_v38 }
 0x1ed   : > { %v2313_v19 = vrot.slane %v2242_v28, 1  ;;  %v2306_v29 = vsel %vm1599_vm1, %v2283_v31, %v2305_v53 }
 0x1ee   : > { %2341 = vrot.lane.b32.xlu1 %v2306_v29, %s2559_s21  ;;  %v2308_v48 = vsel %vm1599_vm1, %v2286_v55, %v2307_v12  ;;  %v2309_v16 = vrot.slane %v2240_v40, 1  ;;  %v2311_v56 = vrot.slane %v2241_v36, 1  ;;  %2339 = vrot.lane.b32.xlu0 %v2304_v20, %s2559_s21 }
 0x1ef   : > { %v2314_v63 = vsel %vm1599_vm1, %v2295_v23, %v2313_v19 }
 0x1f0   : > { %v2310_v24 = vsel %vm1599_vm1, %v2289_v3, %v2309_v16  ;;  %v2312_v31 = vsel %vm1599_vm1, %v2292_v7, %v2311_v56 }
 0x1f2   : > { %2345 = vrot.lane.b32.xlu1 %v2310_v24, %s2559_s21  ;;  %2343 = vrot.lane.b32.xlu0 %v2308_v48, %s2559_s21 }
 0x1f6   : > { %2349 = vrot.lane.b32.xlu1 %v2314_v63, %s2559_s21  ;;  %2347 = vrot.lane.b32.xlu0 %v2312_v31, %s2559_s21 }
 0x246   : > { %v2316_v18 = vpop.permute.xlu0 %2315 }
 0x247   : > { %v2318_v55 = vpop.permute.xlu1 %2317 }
 0x248   : > { %v2351_v58 = vsel %vm248_vm2, %v2316_v18, %v2318_v55 }
 0x249   : > { %2383 = vst [vmem:[%s5097_s9] sm:$0xff] %v2351_v58 }
 0x24b   : > { %v2322_v23 = vpop.permute.xlu1 %2321  ;;  %v2320_v2 = vpop.permute.xlu0 %2319 }
 0x24c   : > { %v2352_v62 = vsel %vm248_vm2, %v2318_v55, %v2320_v2  ;;  %v2353_v3 = vsel %vm248_vm2, %v2320_v2, %v2322_v23 }
 0x24d   : > { %2384 = vst [vmem:[%s5097_s9 + $0x8] sm:$0xff] %v2352_v62  ;;  %2385 = vst [vmem:[%s5097_s9 + $0x10] sm:$0xff] %v2353_v3 }
 0x24f   : > { %v2326_v7 = vpop.permute.xlu1 %2325 }
 0x250   : > { %v2324_v32 = vpop.permute.xlu0 %2323 }
 0x251   : > { %v2354_v35 = vsel %vm248_vm2, %v2322_v23, %v2324_v32  ;;  %v2355_v33 = vsel %vm248_vm2, %v2324_v32, %v2326_v7 }
 0x252   : > { %2386 = vst [vmem:[%s5097_s9 + $0x18] sm:$0xff] %v2354_v35  ;;  %2387 = vst [vmem:[%s5097_s9 + $0x20] sm:$0xff] %v2355_v33 }
 0x253   : > { %v2330_v15 = vpop.permute.xlu1 %2329 }
 0x254   : > { %v2328_v50 = vpop.permute.xlu0 %2327 }
 0x255   : > { %v2356_v51 = vsel %vm248_vm2, %v2326_v7, %v2328_v50  ;;  %v2357_v13 = vsel %vm248_vm2, %v2328_v50, %v2330_v15 }
 0x256   : > { %2388 = vst [vmem:[%s5097_s9 + $0x28] sm:$0xff] %v2356_v51  ;;  %2389 = vst [vmem:[%s5097_s9 + $0x30] sm:$0xff] %v2357_v13 }
 0x257   : > { %v2334_v61 = vpop.permute.xlu1 %2333 }
 0x258   : > { %v2332_v4 = vpop.permute.xlu0 %2331 }
 0x259   : > { %v2358_v0 = vsel %vm248_vm2, %v2330_v15, %v2332_v4 }
 0x25a   : > { %2390 = vst [vmem:[%s5097_s9 + $0x38] sm:$0xff] %v2358_v0 }
 0x25c   : > { %v2338_v44 = vpop.permute.xlu1 %2337  ;;  %v2336_v27 = vpop.permute.xlu0 %2335 }
 0x25d   : > { %v2359_v52 = vsel %vm248_vm2, %v2334_v61, %v2336_v27  ;;  %v2360_v46 = vsel %vm248_vm2, %v2336_v27, %v2338_v44 }
 0x25e   : > { %2391 = vst [vmem:[%s5097_s9 + $0x40] sm:$0xff] %v2359_v52  ;;  %2392 = vst [vmem:[%s5097_s9 + $0x48] sm:$0xff] %v2360_v46 }
 0x260   : > { %v2342_v26 = vpop.permute.xlu1 %2341  ;;  %v2340_v30 = vpop.permute.xlu0 %2339 }
 0x261   : > { %v2361_v5 = vsel %vm248_vm2, %v2338_v44, %v2340_v30  ;;  %v2362_v60 = vsel %vm248_vm2, %v2340_v30, %v2342_v26 }
 0x262   : > { %2393 = vst [vmem:[%s5097_s9 + $0x50] sm:$0xff] %v2361_v5  ;;  %2394 = vst [vmem:[%s5097_s9 + $0x58] sm:$0xff] %v2362_v60 }
 0x264   : > { %v2346_v10 = vpop.permute.xlu1 %2345  ;;  %v2344_v17 = vpop.permute.xlu0 %2343 }
 0x265   : > { %v2363_v59 = vsel %vm248_vm2, %v2342_v26, %v2344_v17  ;;  %v2364_v39 = vsel %vm248_vm2, %v2344_v17, %v2346_v10 }
 0x266   : > { %2395 = vst [vmem:[%s5097_s9 + $0x60] sm:$0xff] %v2363_v59  ;;  %2396 = vst [vmem:[%s5097_s9 + $0x68] sm:$0xff] %v2364_v39 }
 0x268   : > { %v2350_v49 = vpop.permute.xlu1 %2349  ;;  %v2348_v8 = vpop.permute.xlu0 %2347 }
 0x269   : > { %v2365_v57 = vsel %vm248_vm2, %v2346_v10, %v2348_v8  ;;  %v2366_v45 = vsel %vm248_vm2, %v2348_v8, %v2350_v49 }
 0x26a   : > { %2397 = vst [vmem:[%s5097_s9 + $0x70] sm:$0xff] %v2365_v57  ;;  %2398 = vst [vmem:[%s5097_s9 + $0x78] sm:$0xff] %v2366_v45 }
 0x26b PF: > { %s13_s12 = sadd.s32 1, %s2557_s12  }
 0x26c   : > { %p10_p4 = scmp.ge.s32.totalorder %s13_s12, 4  }
 0x26e   :  { %12 = sbr.rel (!%p10_p4) target bundleno = 1 (0x1), region = 70 }

</bundles_post_ra>
